<compile_context>
chip_gen: v5e
topology: v5e:2x2
jax: 0.10.0
libtpu: 0.0.40
codegen_flags: <defaults>
</compile_context>

<pallas_src>
import functools
import math

import jax
import jax.numpy as jnp
from jax.experimental import pallas as pl
from jax.experimental.pallas import tpu as pltpu

BN_EPS = 1e-5


# --------------------------------------------------------------------------- #
# Hardware-aware knobs
# --------------------------------------------------------------------------- #
def _vmem_budget():
    """Generation-aware scoped-VMEM budget (bytes)."""
    cap = 128 * 1024 * 1024
    try:
        cap = int(getattr(pltpu.get_tpu_info(), "vmem_capacity_bytes", cap))
    except Exception:
        pass
    # headroom for double-buffering / compiler scratch:
    #   v7x (64 MiB) -> 48 MiB,   v5e/v6e (128 MiB) -> 96 MiB
    return min((cap * 3) // 4, 96 * 1024 * 1024)


def _k_fuse_threshold():
    """MXU contraction depth used to decide 9-tap vs 3-tap fusion."""
    try:
        name = str(getattr(pltpu.get_tpu_info(), "chip_version", "")).lower()
        if "5" in name:          # v5e / v5p: 128-deep MXU
            return 128
    except Exception:
        pass
    return 256                   # v6e / v7x


def _cparams(sem, vmem_bytes):
    return pltpu.CompilerParams(dimension_semantics=sem,
                                vmem_limit_bytes=int(vmem_bytes))


def _pick_conv_strip(H, W, cin, cout, fuse9, has_residual, vmem_bytes):
    """Largest divisor of H whose strip working set fits the VMEM budget."""
    budget = max(vmem_bytes // 3, 1 << 20)
    kfac = 9 if fuse9 else 3
    fallback = None
    for th in range(H, 0, -1):
        if H % th:
            continue
        per_in = (th + 2) * W * cin * 2 * (2 if has_residual else 1)
        patch = th * W * kfac * cin * 2 * 2
        acc = th * W * cout * 4
        outs = th * W * (cout + cin) * 2
        est = 2 * (per_in + outs) + patch + acc
        if est <= budget:
            if (th * W) % 8 == 0:
                return th
            if fallback is None:
                fallback = th
    return fallback if fallback is not None else 1


def _pick_pool_strip(Ho, W, C, has_residual, vmem_bytes):
    budget = max(vmem_bytes // 3, 1 << 20)
    for th in range(Ho, 0, -1):
        if Ho % th:
            continue
        est = 2 * (2 * th * W * C * 2 * (2 if has_residual else 1)
                   + 2 * th * W * C * 2 + th * (W // 2) * C * 2)
        est += 2 * th * W * C * 4 + th * W * C * 4
        if est <= budget:
            return th
    return 1


# --------------------------------------------------------------------------- #
# Fused conv stage:
#   [optional prologue: act = ReLU(y_prev*scale + shift [+ res])]  ->  3x3 conv
#   + bias  ->  f32 BN partials  ->  bf16 y written to HBM
# --------------------------------------------------------------------------- #
def _make_conv_kernel(TH, W, cin, cout, fuse9, has_prologue, has_residual):
    def kernel(*refs):
        it = iter(refs)
        x_ref, xt_ref, xb_ref = next(it), next(it), next(it)
        r_ref = rt_ref = rb_ref = None
        if has_residual:
            r_ref, rt_ref, rb_ref = next(it), next(it), next(it)
        sc_ref = sh_ref = None
        if has_prologue:
            sc_ref, sh_ref = next(it), next(it)
        w_ref, b_ref = next(it), next(it)
        y_ref = next(it)
        a_ref = next(it) if has_prologue else None
        s_ref = next(it)
        acc_ref = next(it)

        t = pl.program_id(1)
        first = t == 0
        last = t == pl.num_programs(1) - 1

        if has_prologue:
            sc = sc_ref[...]                                     # (1, cin) f32
            sh = sh_ref[...]

            def norm(yv, rv):
                a = yv.astype(jnp.float32) * sc + sh
                if rv is not None:
                    a = a + rv.astype(jnp.float32)
                return jnp.maximum(a, 0.0).astype(jnp.bfloat16)

            x_mid = norm(x_ref[0], r_ref[0] if has_residual else None)   # (TH,W,cin)
            a_ref[0] = x_mid                                             # materialize act
            x_top = norm(xt_ref[0], rt_ref[0] if has_residual else None)  # (1,W,cin)
            x_bot = norm(xb_ref[0], rb_ref[0] if has_residual else None)
        else:
            x_mid, x_top, x_bot = x_ref[0], xt_ref[0], xb_ref[0]

        # conv 'same' padding: halo rows are zero at the image boundary
        zero_row = jnp.zeros_like(x_top)
        x_top = jnp.where(first, zero_row, x_top)
        x_bot = jnp.where(last, zero_row, x_bot)

        xp = jnp.concatenate([x_top, x_mid, x_bot], axis=0)       # (TH+2, W, cin)
        zcol = jnp.zeros((TH + 2, 1, cin), xp.dtype)
        xp = jnp.concatenate([zcol, xp, zcol], axis=1)            # (TH+2, W+2, cin)

        def tap_rows(kh):
            rows = xp[kh:kh + TH]                                 # (TH, W+2, cin)
            return jnp.concatenate(
                [rows[:, 0:W], rows[:, 1:W + 1], rows[:, 2:W + 2]], axis=-1)

        if fuse9:
            # single fat MXU matmul, K = 9*Cin (small-Cin regime)
            patch = jnp.concatenate([tap_rows(0), tap_rows(1), tap_rows(2)], axis=-1)
            acc_ref[...] = jnp.dot(patch.reshape(TH * W, 9 * cin), w_ref[...],
                                   preferred_element_type=jnp.float32) + b_ref[...]
        else:
            # 3 matmuls with K = 3*Cin, bias folded into the first store
            # TODO(synk): per-tap matmuls + pltpu.roll combine for Cin >= MXU depth.
            for kh in range(3):
                c = jnp.dot(tap_rows(kh).reshape(TH * W, 3 * cin), w_ref[kh],
                            preferred_element_type=jnp.float32)
                if kh == 0:
                    acc_ref[...] = c + b_ref[...]
                else:
                    acc_ref[...] += c

        acc = acc_ref[...]                                        # (TH*W, cout) f32
        # BN partials from the f32 accumulator BEFORE the bf16 downcast.
        s_ref[0, 0] = jnp.concatenate(
            [jnp.sum(acc, axis=0, keepdims=True),
             jnp.sum(acc * acc, axis=0, keepdims=True)], axis=0)  # (2, cout)
        y_ref[...] = acc.astype(y_ref.dtype)
    return kernel


def _conv_stage(w, b, *, x_act=None, y_prev=None, scale=None, shift=None,
                res=None, th_rows=None, vmem_bytes=64 * 1024 * 1024):
    """One fused stage.  Returns (y[N,H,W,cout] bf16, stats[N,T,2,cout] f32, act|None)."""
    has_prologue = y_prev is not None
    xin = y_prev if has_prologue else x_act
    assert xin is not None
    if res is not None:
        assert has_prologue and res.shape == xin.shape
    N, H, W, cin = xin.shape
    assert w.shape[:3] == (3, 3, cin)
    cout = w.shape[3]
    has_residual = res is not None
    fuse9 = 3 * cin < _k_fuse_threshold()

    TH = th_rows if th_rows is not None else _pick_conv_strip(
        H, W, cin, cout, fuse9, has_residual, vmem_bytes)
    TH = min(TH, H)
    assert H % TH == 0, "strip rows must divide H"
    T = H // TH
    assert (TH * W) % 8 == 0 or (N == 1 and T == 1), \
        "TODO(synk): sublane-unaligned strips would need a 4-D y layout"

    if fuse9:
        w_k = w.reshape(9 * cin, cout).astype(jnp.bfloat16)
        w_spec = pl.BlockSpec((9 * cin, cout), lambda n, t: (0, 0))
    else:
        w_k = w.reshape(3, 3 * cin, cout).astype(jnp.bfloat16)
        w_spec = pl.BlockSpec((3, 3 * cin, cout), lambda n, t: (0, 0, 0))

    main_spec = pl.BlockSpec((1, TH, W, cin), lambda n, t: (n, t, 0, 0))
    top_spec = pl.BlockSpec(
        (1, 1, W, cin), lambda n, t: (n, jnp.maximum(t * TH - 1, 0), 0, 0))
    bot_spec = pl.BlockSpec(
        (1, 1, W, cin), lambda n, t: (n, jnp.minimum(t * TH + TH, H - 1), 0, 0))
    cvec_spec = pl.BlockSpec((1, cin), lambda n, t: (0, 0))

    args = [xin, xin, xin]
    in_specs = [main_spec, top_spec, bot_spec]
    if has_residual:
        args += [res, res, res]
        in_specs += [main_spec, top_spec, bot_spec]
    if has_prologue:
        args += [scale, shift]
        in_specs += [cvec_spec, cvec_spec]
    args += [w_k, b.reshape(1, -1).astype(jnp.float32)]
    in_specs += [w_spec, pl.BlockSpec((1, cout), lambda n, t: (0, 0))]

    out_shape = [jax.ShapeDtypeStruct((N * H * W, cout), jnp.bfloat16)]
    out_specs = [pl.BlockSpec((TH * W, cout), lambda n, t: (n * T + t, 0))]
    if has_prologue:
        out_shape.append(jax.ShapeDtypeStruct((N, H, W, cin), jnp.bfloat16))
        out_specs.append(pl.BlockSpec((1, TH, W, cin), lambda n, t: (n, t, 0, 0)))
    out_shape.append(jax.ShapeDtypeStruct((N, T, 2, cout), jnp.float32))
    out_specs.append(pl.BlockSpec((1, 1, 2, cout), lambda n, t: (n, t, 0, 0)))

    outs = pl.pallas_call(
        _make_conv_kernel(TH, W, cin, cout, fuse9, has_prologue, has_residual),
        grid=(N, T),
        in_specs=in_specs,
        out_specs=tuple(out_specs),
        out_shape=tuple(out_shape),
        scratch_shapes=[pltpu.VMEM((TH * W, cout), jnp.float32)],
        compiler_params=_cparams(("parallel", "parallel"), vmem_bytes),
    )(*args)

    if has_prologue:
        y_flat, act, stats = outs
    else:
        y_flat, stats = outs
        act = None
    return y_flat.reshape(N, H, W, cout), stats, act


# --------------------------------------------------------------------------- #
# Final stage epilogues
# --------------------------------------------------------------------------- #
def _make_pool_kernel(th, W, C, has_residual):
    Wo = W // 2

    def kernel(*refs):
        it = iter(refs)
        y_ref = next(it)
        r_ref = next(it) if has_residual else None
        sc_ref, sh_ref = next(it), next(it)
        bp_ref, po_ref = next(it), next(it)
        mp_ref = next(it)

        a = y_ref[0].astype(jnp.float32) * sc_ref[...] + sh_ref[...]
        if has_residual:
            a = a + r_ref[0].astype(jnp.float32)
        a = jnp.maximum(a, 0.0)                          # (2*th, W, C) f32
        bp_ref[0] = a.astype(bp_ref.dtype)
        # 2x2/stride-2 max-pool: rows via a leading-dim reshape, columns via a
        # sublane-strided ref read (C stays lane-dense, no (Wo, 2C) relayout).
        r = a.reshape(th, 2, W, C)
        mp_ref[...] = jnp.maximum(r[:, 0], r[:, 1])      # (th, W, C)
        po = jnp.maximum(mp_ref[:, pl.ds(0, Wo, stride=2), :],
                         mp_ref[:, pl.ds(1, Wo, stride=2), :])
        po_ref[0] = po.astype(po_ref.dtype)
    return kernel


def _bn_act_pool(y4, scale, shift, res4=None, *, th_out=None, vmem_bytes=64 << 20):
    N, H, W, C = y4.shape
    assert H % 2 == 0 and W % 2 == 0
    Ho, Wo = H // 2, W // 2
    th = th_out if th_out is not None else _pick_pool_strip(
        Ho, W, C, res4 is not None, vmem_bytes)
    th = min(th, Ho)
    assert Ho % th == 0
    big_spec = pl.BlockSpec((1, 2 * th, W, C), lambda n, t: (n, t, 0, 0))
    vec_spec = pl.BlockSpec((1, C), lambda n, t: (0, 0))
    args, in_specs, aliases = [y4], [big_spec], {}
    if res4 is not None:
        args.append(res4)
        in_specs.append(big_spec)
        aliases = {1: 0}   # residual act is dead after this call -> donate to before_pool
    args += [scale, shift]
    in_specs += [vec_spec, vec_spec]
    return pl.pallas_call(
        _make_pool_kernel(th, W, C, res4 is not None),
        grid=(N, Ho // th),
        in_specs=in_specs,
        out_specs=(big_spec,
                   pl.BlockSpec((1, th, Wo, C), lambda n, t: (n, t, 0, 0))),
        out_shape=(jax.ShapeDtypeStruct((N, H, W, C), jnp.bfloat16),
                   jax.ShapeDtypeStruct((N, Ho, Wo, C), jnp.bfloat16)),
        input_output_aliases=aliases,
        scratch_shapes=[pltpu.VMEM((th, W, C), jnp.float32)],
        compiler_params=_cparams(("parallel", "parallel"), vmem_bytes),
    )(*args)


def _make_bn_act_kernel(has_residual):
    def kernel(*refs):
        it = iter(refs)
        y_ref = next(it)
        r_ref = next(it) if has_residual else None
        sc_ref, sh_ref = next(it), next(it)
        o_ref = next(it)
        a = y_ref[...].astype(jnp.float32) * sc_ref[...] + sh_ref[...]
        if has_residual:
            a = a + r_ref[...].astype(jnp.float32)
        o_ref[...] = jnp.maximum(a, 0.0).astype(o_ref.dtype)
    return kernel


def _bn_act(y4, scale, shift, res4=None, *, vmem_bytes=64 << 20):
    """pooling=False epilogue: BN affine [+ residual] + ReLU over a lane-dense repack."""
    N, H, W, C = y4.shape
    M = N * H * W
    k = 1
    if C % 128 != 0:
        k = 128 // math.gcd(C, 128)
        if M % k != 0:
            k = 1   # TODO(synk): lane-thin fallback for awkward shapes
    Mr, Cr = M // k, C * k
    y = y4.reshape(Mr, Cr)
    res = res4.reshape(Mr, Cr) if res4 is not None else None
    sc = jnp.tile(scale, (1, k))
    sh = jnp.tile(shift, (1, k))
    tm = min(Mr, max(8, ((1 << 21) // max(Cr * 2, 1)) // 8 * 8))
    row_spec = pl.BlockSpec((tm, Cr), lambda i: (i, 0))
    vec_spec = pl.BlockSpec((1, Cr), lambda i: (0, 0))
    args, in_specs, aliases = [y], [row_spec], {}
    if res is not None:
        args.append(res)
        in_specs.append(row_spec)
        aliases = {1: 0}
    args += [sc, sh]
    in_specs += [vec_spec, vec_spec]
    out = pl.pallas_call(
        _make_bn_act_kernel(res is not None),
        grid=(pl.cdiv(Mr, tm),),
        in_specs=in_specs,
        out_specs=pl.BlockSpec((tm, Cr), lambda i: (i, 0)),
        out_shape=jax.ShapeDtypeStruct((Mr, Cr), jnp.bfloat16),
        input_output_aliases=aliases,
        compiler_params=_cparams(("parallel",), vmem_bytes),
    )(*args)
    return out.reshape(N, H, W, C)


# --------------------------------------------------------------------------- #
# BN finalize (tiny reduction outside the kernels)
# --------------------------------------------------------------------------- #
def _bn_affine(stats, gamma, beta, count):
    s = jnp.sum(stats, axis=(0, 1))                 # (2, C) f32
    mean = s[0] / count
    var = jnp.maximum(s[1] / count - mean * mean, 0.0)
    # TODO(synk): switch to per-strip centered (Welford) combines if E[x^2]-mean^2
    # cancellation becomes visible at very large N*H*W.
    inv = jax.lax.rsqrt(var + BN_EPS)
    scale = gamma.reshape(-1) * inv
    shift = beta.reshape(-1) - mean * scale
    return (scale.reshape(1, -1).astype(jnp.float32),
            shift.reshape(1, -1).astype(jnp.float32))


# --------------------------------------------------------------------------- #
# DownConv forward
# --------------------------------------------------------------------------- #
@functools.partial(jax.jit, static_argnames=("pooling", "residual", "th_rows"))
def down_conv_forward(x_nchw, params, *, pooling=True, residual=True, th_rows=None):
    """Pallas DownConv.forward -> (x2, before_pool), both NCHW float32."""
    # TODO(synk): only dilation=1 (module default dilations=[]) and norm=BatchNorm2d with
    # training-mode batch statistics are implemented (no InstanceNorm / running stats).
    x = jnp.transpose(x_nchw, (0, 2, 3, 1)).astype(jnp.bfloat16)   # NCHW -> NHWC bf16
    N, H, W, _ = x.shape
    vmem_bytes = _vmem_budget()

    stages = [(params["conv1"], False)] + [(p, residual) for p in params["blocks"]]

    y_prev = scale_prev = shift_prev = None
    a_in_prev = None        # activation that fed the previous stage's conv
    prev_use_res = False

    for si, ((w, b, g, be), use_res) in enumerate(stages):
        if si == 0:
            y, stats, _ = _conv_stage(w, b, x_act=x, th_rows=th_rows,
                                      vmem_bytes=vmem_bytes)
            a_in_cur = x
        else:
            y, stats, a_in_cur = _conv_stage(
                w, b, y_prev=y_prev, scale=scale_prev, shift=shift_prev,
                res=a_in_prev if prev_use_res else None,
                th_rows=th_rows, vmem_bytes=vmem_bytes)
        scale, shift = _bn_affine(stats, g, be, N * H * W)
        y_prev, scale_prev, shift_prev = y, scale, shift
        a_in_prev, prev_use_res = a_in_cur, use_res

    res_final = a_in_prev if prev_use_res else None
    if pooling:
        before_pool, x2 = _bn_act_pool(y_prev, scale_prev, shift_prev, res_final,
                                       vmem_bytes=vmem_bytes)
    else:
        before_pool = _bn_act(y_prev, scale_prev, shift_prev, res_final,
                              vmem_bytes=vmem_bytes)
        x2 = before_pool
    return (jnp.transpose(x2, (0, 3, 1, 2)).astype(jnp.float32),
            jnp.transpose(before_pool, (0, 3, 1, 2)).astype(jnp.float32))


# --------------------------------------------------------------------------- #
# Deterministic parameter init (synthetic; matches PyTorch shapes, HWIO weights)
# --------------------------------------------------------------------------- #
def init_params(key, in_channels, out_channels, blocks):
    keys = jax.random.split(key, 4 * (blocks + 1))

    def conv_bn(k0, k1, k2, k3, cin, cout):
        w = 0.1 * jax.random.normal(k0, (3, 3, cin, cout), jnp.float32)
        b = 0.1 * jax.random.normal(k1, (1, cout), jnp.float32)
        gamma = 1.0 + 0.1 * jax.random.normal(k2, (1, cout), jnp.float32)
        beta = 0.1 * jax.random.normal(k3, (1, cout), jnp.float32)
        return (w, b, gamma, beta)

    return {
        "conv1": conv_bn(*keys[0:4], in_channels, out_channels),
        "blocks": [conv_bn(*keys[4 * (i + 1):4 * (i + 2)], out_channels, out_channels)
                   for i in range(blocks)],
    }


# --------------------------------------------------------------------------- #
# Pure-JAX reference (mirrors the kernels' mixed-precision pipeline)
# --------------------------------------------------------------------------- #
def _reference(x_nchw, params, *, pooling=True, residual=True):
    x = jnp.transpose(x_nchw, (0, 2, 3, 1)).astype(jnp.bfloat16)

    def stage(a_bf16, w, b, g, be, use_res):
        y = jax.lax.conv_general_dilated(
            a_bf16, w.astype(jnp.bfloat16), window_strides=(1, 1), padding="SAME",
            dimension_numbers=("NHWC", "HWIO", "NHWC"),
            preferred_element_type=jnp.float32)
        y = y + b.reshape(1, 1, 1, -1)
        m = jnp.mean(y, axis=(0, 1, 2))
        v = jnp.maximum(jnp.mean(y * y, axis=(0, 1, 2)) - m * m, 0.0)
        inv = jax.lax.rsqrt(v + BN_EPS)
        scale = g.reshape(-1) * inv
        shift = be.reshape(-1) - m * scale
        yq = y.astype(jnp.bfloat16).astype(jnp.float32)   # y makes a bf16 HBM round trip
        out = yq * scale + shift
        if use_res:
            out = out + a_bf16.astype(jnp.float32)
        return jnp.maximum(out, 0.0).astype(jnp.bfloat16)

    w1, b1, g1, be1 = params["conv1"]
    a = stage(x, w1, b1, g1, be1, False)
    for (w2, b2, g2, be2) in params["blocks"]:
        a = stage(a, w2, b2, g2, be2, residual)
    bp = a
    if pooling:
        x2 = jax.lax.reduce_window(bp.astype(jnp.float32), -jnp.inf, jax.lax.max,
                                   (1, 2, 2, 1), (1, 2, 2, 1), "VALID").astype(jnp.bfloat16)
    else:
        x2 = bp
    return (jnp.transpose(x2, (0, 3, 1, 2)).astype(jnp.float32),
            jnp.transpose(bp, (0, 3, 1, 2)).astype(jnp.float32))


# --------------------------------------------------------------------------- #
if __name__ == "__main__":
    key = jax.random.PRNGKey(0)
    kx, kp = jax.random.split(key)

    N, Cin, H, W = 2, 4, 16, 16
    Cout, blocks = 8, 2

    x = jax.random.normal(kx, (N, Cin, H, W), jnp.float32)
    params = init_params(kp, Cin, Cout, blocks)

    # th_rows=8 -> two H-strips per image so the 1-row halo path is exercised/checked.
    x2, before_pool = down_conv_forward(x, params, pooling=True, residual=True, th_rows=8)
    jax.block_until_ready((x2, before_pool))

    assert x2.shape == (N, Cout, H // 2, W // 2)
    assert before_pool.shape == (N, Cout, H, W)

    r2, rbp = _reference(x, params, pooling=True, residual=True)
    assert jnp.allclose(before_pool, rbp, atol=5e-2, rtol=5e-2), \
        float(jnp.max(jnp.abs(before_pool - rbp)))
    assert jnp.allclose(x2, r2, atol=5e-2, rtol=5e-2), \
        float(jnp.max(jnp.abs(x2 - r2)))

    # pooling=False path (flat, lane-dense epilogue)
    y2, ybp = down_conv_forward(x, params, pooling=False, residual=True, th_rows=8)
    jax.block_until_ready((y2, ybp))
    ry2, rybp = _reference(x, params, pooling=False, residual=True)
    assert jnp.allclose(ybp, rybp, atol=5e-2, rtol=5e-2), \
        float(jnp.max(jnp.abs(ybp - rybp)))
    assert jnp.allclose(y2, ry2, atol=5e-2, rtol=5e-2), \
        float(jnp.max(jnp.abs(y2 - ry2)))

    print("KERNEL_OK")
</pallas_src>

<mosaic_0001>
module attributes {stable_mosaic.version = 11 : i64} {
  func.func @kernel(%arg0: i32, %arg1: i32, %arg2: memref<1x8x16x4xbf16, #tpu.memory_space<vmem>>, %arg3: memref<1x1x16x4xbf16, #tpu.memory_space<vmem>>, %arg4: memref<1x1x16x4xbf16, #tpu.memory_space<vmem>>, %arg5: memref<36x8xbf16, #tpu.memory_space<vmem>>, %arg6: memref<1x8xf32, #tpu.memory_space<vmem>>, %arg7: memref<128x8xbf16, #tpu.memory_space<vmem>>, %arg8: memref<1x1x2x8xf32, #tpu.memory_space<vmem>>, %arg9: memref<128x8xf32, #tpu.memory_space<vmem>>) attributes {dimension_semantics = [#tpu.dimension_semantics<parallel>, #tpu.dimension_semantics<parallel>], iteration_bounds = array<i64: 2, 2>, scalar_prefetch = 0 : i64, scratch_operands = 1 : i64, tpu.core_type = #tpu.core_type<tc>, window_params = [{transform_indices = @transform_0, window_bounds = array<i64: 1, 8, 16, 4>}, {transform_indices = @transform_1, window_bounds = array<i64: 1, 1, 16, 4>}, {transform_indices = @transform_2, window_bounds = array<i64: 1, 1, 16, 4>}, {pipeline_mode = #tpu.pipeline_mode<synchronous>, transform_indices = @transform_3, window_bounds = array<i64: 36, 8>}, {pipeline_mode = #tpu.pipeline_mode<synchronous>, transform_indices = @transform_4, window_bounds = array<i64: 1, 8>}, {transform_indices = @transform_5, window_bounds = array<i64: 128, 8>}, {transform_indices = @transform_6, window_bounds = array<i64: 1, 1, 2, 8>}]} {
    %c0_i32 = arith.constant 0 : i32
    %0 = arith.cmpi eq, %arg1, %c0_i32 : i32
    %c1_i32 = arith.constant 1 : i32
    %1 = arith.cmpi eq, %arg1, %c1_i32 : i32
    %c0 = arith.constant 0 : index
    %c0_0 = arith.constant 0 : index
    %c0_1 = arith.constant 0 : index
    %c0_2 = arith.constant 0 : index
    %2 = vector.load %arg2[%c0, %c0_0, %c0_1, %c0_2] : memref<1x8x16x4xbf16, #tpu.memory_space<vmem>>, vector<1x8x16x4xbf16>
    %3 = vector.shape_cast %2 : vector<1x8x16x4xbf16> to vector<8x16x4xbf16>
    %c0_3 = arith.constant 0 : index
    %c0_4 = arith.constant 0 : index
    %c0_5 = arith.constant 0 : index
    %c0_6 = arith.constant 0 : index
    %4 = vector.load %arg3[%c0_3, %c0_4, %c0_5, %c0_6] : memref<1x1x16x4xbf16, #tpu.memory_space<vmem>>, vector<1x1x16x4xbf16>
    %5 = vector.shape_cast %4 : vector<1x1x16x4xbf16> to vector<1x16x4xbf16>
    %c0_7 = arith.constant 0 : index
    %c0_8 = arith.constant 0 : index
    %c0_9 = arith.constant 0 : index
    %c0_10 = arith.constant 0 : index
    %6 = vector.load %arg4[%c0_7, %c0_8, %c0_9, %c0_10] : memref<1x1x16x4xbf16, #tpu.memory_space<vmem>>, vector<1x1x16x4xbf16>
    %7 = vector.shape_cast %6 : vector<1x1x16x4xbf16> to vector<1x16x4xbf16>
    %cst = arith.constant 0.000000e+00 : bf16
    %8 = vector.broadcast %cst : bf16 to vector<1x16x4xbf16>
    %9 = arith.select %0, %8, %5 : vector<1x16x4xbf16>
    %10 = arith.select %1, %8, %7 : vector<1x16x4xbf16>
    %11 = tpu.concatenate %9, %3, %10 in 0 : vector<1x16x4xbf16>, vector<8x16x4xbf16>, vector<1x16x4xbf16> -> vector<10x16x4xbf16>
    %cst_11 = arith.constant 0.000000e+00 : bf16
    %12 = vector.broadcast %cst_11 : bf16 to vector<10x1x4xbf16>
    %13 = tpu.concatenate %12, %11, %12 in 1 : vector<10x1x4xbf16>, vector<10x16x4xbf16>, vector<10x1x4xbf16> -> vector<10x18x4xbf16>
    %14 = vector.extract_strided_slice %13 {offsets = [0, 0, 0], sizes = [8, 18, 4], strides = [1, 1, 1]} : vector<10x18x4xbf16> to vector<8x18x4xbf16>
    %15 = vector.extract_strided_slice %14 {offsets = [0, 0, 0], sizes = [8, 16, 4], strides = [1, 1, 1]} : vector<8x18x4xbf16> to vector<8x16x4xbf16>
    %16 = vector.extract_strided_slice %14 {offsets = [0, 1, 0], sizes = [8, 16, 4], strides = [1, 1, 1]} : vector<8x18x4xbf16> to vector<8x16x4xbf16>
    %17 = vector.extract_strided_slice %14 {offsets = [0, 2, 0], sizes = [8, 16, 4], strides = [1, 1, 1]} : vector<8x18x4xbf16> to vector<8x16x4xbf16>
    %18 = tpu.concatenate %15, %16, %17 in 2 : vector<8x16x4xbf16>, vector<8x16x4xbf16>, vector<8x16x4xbf16> -> vector<8x16x12xbf16>
    %19 = vector.extract_strided_slice %13 {offsets = [1, 0, 0], sizes = [8, 18, 4], strides = [1, 1, 1]} : vector<10x18x4xbf16> to vector<8x18x4xbf16>
    %20 = vector.extract_strided_slice %19 {offsets = [0, 0, 0], sizes = [8, 16, 4], strides = [1, 1, 1]} : vector<8x18x4xbf16> to vector<8x16x4xbf16>
    %21 = vector.extract_strided_slice %19 {offsets = [0, 1, 0], sizes = [8, 16, 4], strides = [1, 1, 1]} : vector<8x18x4xbf16> to vector<8x16x4xbf16>
    %22 = vector.extract_strided_slice %19 {offsets = [0, 2, 0], sizes = [8, 16, 4], strides = [1, 1, 1]} : vector<8x18x4xbf16> to vector<8x16x4xbf16>
    %23 = tpu.concatenate %20, %21, %22 in 2 : vector<8x16x4xbf16>, vector<8x16x4xbf16>, vector<8x16x4xbf16> -> vector<8x16x12xbf16>
    %24 = vector.extract_strided_slice %13 {offsets = [2, 0, 0], sizes = [8, 18, 4], strides = [1, 1, 1]} : vector<10x18x4xbf16> to vector<8x18x4xbf16>
    %25 = vector.extract_strided_slice %24 {offsets = [0, 0, 0], sizes = [8, 16, 4], strides = [1, 1, 1]} : vector<8x18x4xbf16> to vector<8x16x4xbf16>
    %26 = vector.extract_strided_slice %24 {offsets = [0, 1, 0], sizes = [8, 16, 4], strides = [1, 1, 1]} : vector<8x18x4xbf16> to vector<8x16x4xbf16>
    %27 = vector.extract_strided_slice %24 {offsets = [0, 2, 0], sizes = [8, 16, 4], strides = [1, 1, 1]} : vector<8x18x4xbf16> to vector<8x16x4xbf16>
    %28 = tpu.concatenate %25, %26, %27 in 2 : vector<8x16x4xbf16>, vector<8x16x4xbf16>, vector<8x16x4xbf16> -> vector<8x16x12xbf16>
    %29 = tpu.concatenate %18, %23, %28 in 2 : vector<8x16x12xbf16>, vector<8x16x12xbf16>, vector<8x16x12xbf16> -> vector<8x16x36xbf16>
    %30 = vector.shape_cast %29 : vector<8x16x36xbf16> to vector<128x36xbf16>
    %c0_12 = arith.constant 0 : index
    %c0_13 = arith.constant 0 : index
    %31 = vector.load %arg5[%c0_12, %c0_13] : memref<36x8xbf16, #tpu.memory_space<vmem>>, vector<36x8xbf16>
    %cst_14 = arith.constant dense<0.000000e+00> : vector<128x8xf32>
    %32 = tpu.matmul %30, %31, %cst_14 {dimension_numbers = #tpu.dot_dimension_numbers<[1], [0], [0], [1], [0, 0, 1, 1], [], []>} : vector<128x36xbf16>, vector<36x8xbf16>, vector<128x8xf32> -> vector<128x8xf32>
    %c0_15 = arith.constant 0 : index
    %c0_16 = arith.constant 0 : index
    %33 = vector.load %arg6[%c0_15, %c0_16] : memref<1x8xf32, #tpu.memory_space<vmem>>, vector<1x8xf32>
    %34 = vector.broadcast %33 : vector<1x8xf32> to vector<128x8xf32>
    %35 = arith.addf %32, %34 : vector<128x8xf32>
    %c0_17 = arith.constant 0 : index
    %c0_18 = arith.constant 0 : index
    %36 = vector.load %arg9[%c0_17, %c0_18] : memref<128x8xf32, #tpu.memory_space<vmem>>, vector<128x8xf32>
    tpu.vector_store %arg9[%c0_17, %c0_18], %35 {strides = array<i32>} : memref<128x8xf32, #tpu.memory_space<vmem>>, vector<128x8xf32>,
    %c0_19 = arith.constant 0 : index
    %c0_20 = arith.constant 0 : index
    %37 = vector.load %arg9[%c0_19, %c0_20] : memref<128x8xf32, #tpu.memory_space<vmem>>, vector<128x8xf32>
    %cst_21 = arith.constant dense<0.000000e+00> : vector<8xf32>
    %38 = vector.multi_reduction <add>, %37, %cst_21 [0] : vector<128x8xf32> to vector<8xf32>
    %39 = vector.shape_cast %38 : vector<8xf32> to vector<1x8xf32>
    %40 = arith.mulf %37, %37 : vector<128x8xf32>
    %cst_22 = arith.constant dense<0.000000e+00> : vector<8xf32>
    %41 = vector.multi_reduction <add>, %40, %cst_22 [0] : vector<128x8xf32> to vector<8xf32>
    %42 = vector.shape_cast %41 : vector<8xf32> to vector<1x8xf32>
    %43 = tpu.concatenate %39, %42 in 0 : vector<1x8xf32>, vector<1x8xf32> -> vector<2x8xf32>
    %c0_23 = arith.constant 0 : index
    %c0_24 = arith.constant 0 : index
    %c0_25 = arith.constant 0 : index
    %c0_26 = arith.constant 0 : index
    %44 = vector.load %arg8[%c0_23, %c0_24, %c0_25, %c0_26] : memref<1x1x2x8xf32, #tpu.memory_space<vmem>>, vector<1x1x2x8xf32>
    %45 = vector.shape_cast %44 : vector<1x1x2x8xf32> to vector<2x8xf32>
    %46 = vector.shape_cast %43 : vector<2x8xf32> to vector<1x1x2x8xf32>
    tpu.vector_store %arg8[%c0_23, %c0_24, %c0_25, %c0_26], %46 {strides = array<i32>} : memref<1x1x2x8xf32, #tpu.memory_space<vmem>>, vector<1x1x2x8xf32>,
    %47 = arith.truncf %37 : vector<128x8xf32> to vector<128x8xbf16>
    %c0_27 = arith.constant 0 : index
    %c0_28 = arith.constant 0 : index
    %48 = vector.load %arg7[%c0_27, %c0_28] : memref<128x8xbf16, #tpu.memory_space<vmem>>, vector<128x8xbf16>
    tpu.vector_store %arg7[%c0_27, %c0_28], %47 {strides = array<i32>} : memref<128x8xbf16, #tpu.memory_space<vmem>>, vector<128x8xbf16>,
    return
  }
  func.func @transform_0(%arg0: i32, %arg1: i32) -> (i32, i32, i32, i32) {
    %c0_i32 = arith.constant 0 : i32
    %c0_i32_0 = arith.constant 0 : i32
    %c0_i32_1 = arith.constant 0 : i32
    return %arg0, %arg1, %c0_i32, %c0_i32_0 : i32, i32, i32, i32
  }
  func.func @transform_1(%arg0: i32, %arg1: i32) -> (i32, i32, i32, i32) {
    %c8_i32 = arith.constant 8 : i32
    %0 = arith.muli %arg1, %c8_i32 : i32
    %c1_i32 = arith.constant 1 : i32
    %1 = arith.subi %0, %c1_i32 : i32
    %c0_i32 = arith.constant 0 : i32
    %2 = arith.maxsi %1, %c0_i32 : i32
    %c0_i32_0 = arith.constant 0 : i32
    %c0_i32_1 = arith.constant 0 : i32
    %c0_i32_2 = arith.constant 0 : i32
    return %arg0, %2, %c0_i32_0, %c0_i32_1 : i32, i32, i32, i32
  }
  func.func @transform_2(%arg0: i32, %arg1: i32) -> (i32, i32, i32, i32) {
    %c8_i32 = arith.constant 8 : i32
    %0 = arith.muli %arg1, %c8_i32 : i32
    %c8_i32_0 = arith.constant 8 : i32
    %1 = arith.addi %0, %c8_i32_0 : i32
    %c15_i32 = arith.constant 15 : i32
    %2 = arith.minsi %1, %c15_i32 : i32
    %c0_i32 = arith.constant 0 : i32
    %c0_i32_1 = arith.constant 0 : i32
    %c0_i32_2 = arith.constant 0 : i32
    return %arg0, %2, %c0_i32, %c0_i32_1 : i32, i32, i32, i32
  }
  func.func @transform_3(%arg0: i32, %arg1: i32) -> (i32, i32) {
    %c0_i32 = arith.constant 0 : i32
    %c0_i32_0 = arith.constant 0 : i32
    %c0_i32_1 = arith.constant 0 : i32
    return %c0_i32, %c0_i32_0 : i32, i32
  }
  func.func @transform_4(%arg0: i32, %arg1: i32) -> (i32, i32) {
    %c0_i32 = arith.constant 0 : i32
    %c0_i32_0 = arith.constant 0 : i32
    %c0_i32_1 = arith.constant 0 : i32
    return %c0_i32, %c0_i32_0 : i32, i32
  }
  func.func @transform_5(%arg0: i32, %arg1: i32) -> (i32, i32) {
    %c2_i32 = arith.constant 2 : i32
    %0 = arith.muli %arg0, %c2_i32 : i32
    %1 = arith.addi %0, %arg1 : i32
    %c0_i32 = arith.constant 0 : i32
    %c0_i32_0 = arith.constant 0 : i32
    return %1, %c0_i32 : i32, i32
  }
  func.func @transform_6(%arg0: i32, %arg1: i32) -> (i32, i32, i32, i32) {
    %c0_i32 = arith.constant 0 : i32
    %c0_i32_0 = arith.constant 0 : i32
    %c0_i32_1 = arith.constant 0 : i32
    return %arg0, %arg1, %c0_i32, %c0_i32_0 : i32, i32, i32, i32
  }
}

module attributes {stable_mosaic.version = 11 : i64} {
  func.func @kernel(%arg0: i32, %arg1: i32, %arg2: memref<1x8x16x8xbf16, #tpu.memory_space<vmem>>, %arg3: memref<1x1x16x8xbf16, #tpu.memory_space<vmem>>, %arg4: memref<1x1x16x8xbf16, #tpu.memory_space<vmem>>, %arg5: memref<1x8xf32, #tpu.memory_space<vmem>>, %arg6: memref<1x8xf32, #tpu.memory_space<vmem>>, %arg7: memref<72x8xbf16, #tpu.memory_space<vmem>>, %arg8: memref<1x8xf32, #tpu.memory_space<vmem>>, %arg9: memref<128x8xbf16, #tpu.memory_space<vmem>>, %arg10: memref<1x8x16x8xbf16, #tpu.memory_space<vmem>>, %arg11: memref<1x1x2x8xf32, #tpu.memory_space<vmem>>, %arg12: memref<128x8xf32, #tpu.memory_space<vmem>>) attributes {dimension_semantics = [#tpu.dimension_semantics<parallel>, #tpu.dimension_semantics<parallel>], iteration_bounds = array<i64: 2, 2>, scalar_prefetch = 0 : i64, scratch_operands = 1 : i64, tpu.core_type = #tpu.core_type<tc>, window_params = [{transform_indices = @transform_0, window_bounds = array<i64: 1, 8, 16, 8>}, {transform_indices = @transform_1, window_bounds = array<i64: 1, 1, 16, 8>}, {transform_indices = @transform_2, window_bounds = array<i64: 1, 1, 16, 8>}, {pipeline_mode = #tpu.pipeline_mode<synchronous>, transform_indices = @transform_3, window_bounds = array<i64: 1, 8>}, {pipeline_mode = #tpu.pipeline_mode<synchronous>, transform_indices = @transform_4, window_bounds = array<i64: 1, 8>}, {pipeline_mode = #tpu.pipeline_mode<synchronous>, transform_indices = @transform_5, window_bounds = array<i64: 72, 8>}, {pipeline_mode = #tpu.pipeline_mode<synchronous>, transform_indices = @transform_6, window_bounds = array<i64: 1, 8>}, {transform_indices = @transform_7, window_bounds = array<i64: 128, 8>}, {transform_indices = @transform_8, window_bounds = array<i64: 1, 8, 16, 8>}, {transform_indices = @transform_9, window_bounds = array<i64: 1, 1, 2, 8>}]} {
    %c0_i32 = arith.constant 0 : i32
    %0 = arith.cmpi eq, %arg1, %c0_i32 : i32
    %c1_i32 = arith.constant 1 : i32
    %1 = arith.cmpi eq, %arg1, %c1_i32 : i32
    %c0 = arith.constant 0 : index
    %c0_0 = arith.constant 0 : index
    %2 = vector.load %arg5[%c0, %c0_0] : memref<1x8xf32, #tpu.memory_space<vmem>>, vector<1x8xf32>
    %c0_1 = arith.constant 0 : index
    %c0_2 = arith.constant 0 : index
    %3 = vector.load %arg6[%c0_1, %c0_2] : memref<1x8xf32, #tpu.memory_space<vmem>>, vector<1x8xf32>
    %c0_3 = arith.constant 0 : index
    %c0_4 = arith.constant 0 : index
    %c0_5 = arith.constant 0 : index
    %c0_6 = arith.constant 0 : index
    %4 = vector.load %arg2[%c0_3, %c0_4, %c0_5, %c0_6] : memref<1x8x16x8xbf16, #tpu.memory_space<vmem>>, vector<1x8x16x8xbf16>
    %5 = vector.shape_cast %4 : vector<1x8x16x8xbf16> to vector<8x16x8xbf16>
    %6 = arith.extf %5 : vector<8x16x8xbf16> to vector<8x16x8xf32>
    %7 = vector.shape_cast %2 : vector<1x8xf32> to vector<1x1x8xf32>
    %8 = vector.broadcast %7 : vector<1x1x8xf32> to vector<8x16x8xf32>
    %9 = arith.mulf %6, %8 : vector<8x16x8xf32>
    %10 = vector.shape_cast %3 : vector<1x8xf32> to vector<1x1x8xf32>
    %11 = vector.broadcast %10 : vector<1x1x8xf32> to vector<8x16x8xf32>
    %12 = arith.addf %9, %11 : vector<8x16x8xf32>
    %cst = arith.constant 0.000000e+00 : f32
    %13 = vector.broadcast %cst : f32 to vector<8x16x8xf32>
    %14 = arith.maximumf %12, %13 : vector<8x16x8xf32>
    %15 = arith.truncf %14 : vector<8x16x8xf32> to vector<8x16x8xbf16>
    %c0_7 = arith.constant 0 : index
    %c0_8 = arith.constant 0 : index
    %c0_9 = arith.constant 0 : index
    %c0_10 = arith.constant 0 : index
    %16 = vector.load %arg10[%c0_7, %c0_8, %c0_9, %c0_10] : memref<1x8x16x8xbf16, #tpu.memory_space<vmem>>, vector<1x8x16x8xbf16>
    %17 = vector.shape_cast %16 : vector<1x8x16x8xbf16> to vector<8x16x8xbf16>
    %18 = vector.shape_cast %15 : vector<8x16x8xbf16> to vector<1x8x16x8xbf16>
    tpu.vector_store %arg10[%c0_7, %c0_8, %c0_9, %c0_10], %18 {strides = array<i32>} : memref<1x8x16x8xbf16, #tpu.memory_space<vmem>>, vector<1x8x16x8xbf16>,
    %c0_11 = arith.constant 0 : index
    %c0_12 = arith.constant 0 : index
    %c0_13 = arith.constant 0 : index
    %c0_14 = arith.constant 0 : index
    %19 = vector.load %arg3[%c0_11, %c0_12, %c0_13, %c0_14] : memref<1x1x16x8xbf16, #tpu.memory_space<vmem>>, vector<1x1x16x8xbf16>
    %20 = vector.shape_cast %19 : vector<1x1x16x8xbf16> to vector<1x16x8xbf16>
    %21 = arith.extf %20 : vector<1x16x8xbf16> to vector<1x16x8xf32>
    %22 = vector.shape_cast %2 : vector<1x8xf32> to vector<1x1x8xf32>
    %23 = vector.broadcast %22 : vector<1x1x8xf32> to vector<1x16x8xf32>
    %24 = arith.mulf %21, %23 : vector<1x16x8xf32>
    %25 = vector.shape_cast %3 : vector<1x8xf32> to vector<1x1x8xf32>
    %26 = vector.broadcast %25 : vector<1x1x8xf32> to vector<1x16x8xf32>
    %27 = arith.addf %24, %26 : vector<1x16x8xf32>
    %cst_15 = arith.constant 0.000000e+00 : f32
    %28 = vector.broadcast %cst_15 : f32 to vector<1x16x8xf32>
    %29 = arith.maximumf %27, %28 : vector<1x16x8xf32>
    %30 = arith.truncf %29 : vector<1x16x8xf32> to vector<1x16x8xbf16>
    %c0_16 = arith.constant 0 : index
    %c0_17 = arith.constant 0 : index
    %c0_18 = arith.constant 0 : index
    %c0_19 = arith.constant 0 : index
    %31 = vector.load %arg4[%c0_16, %c0_17, %c0_18, %c0_19] : memref<1x1x16x8xbf16, #tpu.memory_space<vmem>>, vector<1x1x16x8xbf16>
    %32 = vector.shape_cast %31 : vector<1x1x16x8xbf16> to vector<1x16x8xbf16>
    %33 = arith.extf %32 : vector<1x16x8xbf16> to vector<1x16x8xf32>
    %34 = vector.shape_cast %2 : vector<1x8xf32> to vector<1x1x8xf32>
    %35 = vector.broadcast %34 : vector<1x1x8xf32> to vector<1x16x8xf32>
    %36 = arith.mulf %33, %35 : vector<1x16x8xf32>
    %37 = vector.shape_cast %3 : vector<1x8xf32> to vector<1x1x8xf32>
    %38 = vector.broadcast %37 : vector<1x1x8xf32> to vector<1x16x8xf32>
    %39 = arith.addf %36, %38 : vector<1x16x8xf32>
    %cst_20 = arith.constant 0.000000e+00 : f32
    %40 = vector.broadcast %cst_20 : f32 to vector<1x16x8xf32>
    %41 = arith.maximumf %39, %40 : vector<1x16x8xf32>
    %42 = arith.truncf %41 : vector<1x16x8xf32> to vector<1x16x8xbf16>
    %cst_21 = arith.constant 0.000000e+00 : bf16
    %43 = vector.broadcast %cst_21 : bf16 to vector<1x16x8xbf16>
    %44 = arith.select %0, %43, %30 : vector<1x16x8xbf16>
    %45 = arith.select %1, %43, %42 : vector<1x16x8xbf16>
    %46 = tpu.concatenate %44, %15, %45 in 0 : vector<1x16x8xbf16>, vector<8x16x8xbf16>, vector<1x16x8xbf16> -> vector<10x16x8xbf16>
    %cst_22 = arith.constant 0.000000e+00 : bf16
    %47 = vector.broadcast %cst_22 : bf16 to vector<10x1x8xbf16>
    %48 = tpu.concatenate %47, %46, %47 in 1 : vector<10x1x8xbf16>, vector<10x16x8xbf16>, vector<10x1x8xbf16> -> vector<10x18x8xbf16>
    %49 = vector.extract_strided_slice %48 {offsets = [0, 0, 0], sizes = [8, 18, 8], strides = [1, 1, 1]} : vector<10x18x8xbf16> to vector<8x18x8xbf16>
    %50 = vector.extract_strided_slice %49 {offsets = [0, 0, 0], sizes = [8, 16, 8], strides = [1, 1, 1]} : vector<8x18x8xbf16> to vector<8x16x8xbf16>
    %51 = vector.extract_strided_slice %49 {offsets = [0, 1, 0], sizes = [8, 16, 8], strides = [1, 1, 1]} : vector<8x18x8xbf16> to vector<8x16x8xbf16>
    %52 = vector.extract_strided_slice %49 {offsets = [0, 2, 0], sizes = [8, 16, 8], strides = [1, 1, 1]} : vector<8x18x8xbf16> to vector<8x16x8xbf16>
    %53 = tpu.concatenate %50, %51, %52 in 2 : vector<8x16x8xbf16>, vector<8x16x8xbf16>, vector<8x16x8xbf16> -> vector<8x16x24xbf16>
    %54 = vector.extract_strided_slice %48 {offsets = [1, 0, 0], sizes = [8, 18, 8], strides = [1, 1, 1]} : vector<10x18x8xbf16> to vector<8x18x8xbf16>
    %55 = vector.extract_strided_slice %54 {offsets = [0, 0, 0], sizes = [8, 16, 8], strides = [1, 1, 1]} : vector<8x18x8xbf16> to vector<8x16x8xbf16>
    %56 = vector.extract_strided_slice %54 {offsets = [0, 1, 0], sizes = [8, 16, 8], strides = [1, 1, 1]} : vector<8x18x8xbf16> to vector<8x16x8xbf16>
    %57 = vector.extract_strided_slice %54 {offsets = [0, 2, 0], sizes = [8, 16, 8], strides = [1, 1, 1]} : vector<8x18x8xbf16> to vector<8x16x8xbf16>
    %58 = tpu.concatenate %55, %56, %57 in 2 : vector<8x16x8xbf16>, vector<8x16x8xbf16>, vector<8x16x8xbf16> -> vector<8x16x24xbf16>
    %59 = vector.extract_strided_slice %48 {offsets = [2, 0, 0], sizes = [8, 18, 8], strides = [1, 1, 1]} : vector<10x18x8xbf16> to vector<8x18x8xbf16>
    %60 = vector.extract_strided_slice %59 {offsets = [0, 0, 0], sizes = [8, 16, 8], strides = [1, 1, 1]} : vector<8x18x8xbf16> to vector<8x16x8xbf16>
    %61 = vector.extract_strided_slice %59 {offsets = [0, 1, 0], sizes = [8, 16, 8], strides = [1, 1, 1]} : vector<8x18x8xbf16> to vector<8x16x8xbf16>
    %62 = vector.extract_strided_slice %59 {offsets = [0, 2, 0], sizes = [8, 16, 8], strides = [1, 1, 1]} : vector<8x18x8xbf16> to vector<8x16x8xbf16>
    %63 = tpu.concatenate %60, %61, %62 in 2 : vector<8x16x8xbf16>, vector<8x16x8xbf16>, vector<8x16x8xbf16> -> vector<8x16x24xbf16>
    %64 = tpu.concatenate %53, %58, %63 in 2 : vector<8x16x24xbf16>, vector<8x16x24xbf16>, vector<8x16x24xbf16> -> vector<8x16x72xbf16>
    %65 = vector.shape_cast %64 : vector<8x16x72xbf16> to vector<128x72xbf16>
    %c0_23 = arith.constant 0 : index
    %c0_24 = arith.constant 0 : index
    %66 = vector.load %arg7[%c0_23, %c0_24] : memref<72x8xbf16, #tpu.memory_space<vmem>>, vector<72x8xbf16>
    %cst_25 = arith.constant dense<0.000000e+00> : vector<128x8xf32>
    %67 = tpu.matmul %65, %66, %cst_25 {dimension_numbers = #tpu.dot_dimension_numbers<[1], [0], [0], [1], [0, 0, 1, 1], [], []>} : vector<128x72xbf16>, vector<72x8xbf16>, vector<128x8xf32> -> vector<128x8xf32>
    %c0_26 = arith.constant 0 : index
    %c0_27 = arith.constant 0 : index
    %68 = vector.load %arg8[%c0_26, %c0_27] : memref<1x8xf32, #tpu.memory_space<vmem>>, vector<1x8xf32>
    %69 = vector.broadcast %68 : vector<1x8xf32> to vector<128x8xf32>
    %70 = arith.addf %67, %69 : vector<128x8xf32>
    %c0_28 = arith.constant 0 : index
    %c0_29 = arith.constant 0 : index
    %71 = vector.load %arg12[%c0_28, %c0_29] : memref<128x8xf32, #tpu.memory_space<vmem>>, vector<128x8xf32>
    tpu.vector_store %arg12[%c0_28, %c0_29], %70 {strides = array<i32>} : memref<128x8xf32, #tpu.memory_space<vmem>>, vector<128x8xf32>,
    %c0_30 = arith.constant 0 : index
    %c0_31 = arith.constant 0 : index
    %72 = vector.load %arg12[%c0_30, %c0_31] : memref<128x8xf32, #tpu.memory_space<vmem>>, vector<128x8xf32>
    %cst_32 = arith.constant dense<0.000000e+00> : vector<8xf32>
    %73 = vector.multi_reduction <add>, %72, %cst_32 [0] : vector<128x8xf32> to vector<8xf32>
    %74 = vector.shape_cast %73 : vector<8xf32> to vector<1x8xf32>
    %75 = arith.mulf %72, %72 : vector<128x8xf32>
    %cst_33 = arith.constant dense<0.000000e+00> : vector<8xf32>
    %76 = vector.multi_reduction <add>, %75, %cst_33 [0] : vector<128x8xf32> to vector<8xf32>
    %77 = vector.shape_cast %76 : vector<8xf32> to vector<1x8xf32>
    %78 = tpu.concatenate %74, %77 in 0 : vector<1x8xf32>, vector<1x8xf32> -> vector<2x8xf32>
    %c0_34 = arith.constant 0 : index
    %c0_35 = arith.constant 0 : index
    %c0_36 = arith.constant 0 : index
    %c0_37 = arith.constant 0 : index
    %79 = vector.load %arg11[%c0_34, %c0_35, %c0_36, %c0_37] : memref<1x1x2x8xf32, #tpu.memory_space<vmem>>, vector<1x1x2x8xf32>
    %80 = vector.shape_cast %79 : vector<1x1x2x8xf32> to vector<2x8xf32>
    %81 = vector.shape_cast %78 : vector<2x8xf32> to vector<1x1x2x8xf32>
    tpu.vector_store %arg11[%c0_34, %c0_35, %c0_36, %c0_37], %81 {strides = array<i32>} : memref<1x1x2x8xf32, #tpu.memory_space<vmem>>, vector<1x1x2x8xf32>,
    %82 = arith.truncf %72 : vector<128x8xf32> to vector<128x8xbf16>
    %c0_38 = arith.constant 0 : index
    %c0_39 = arith.constant 0 : index
    %83 = vector.load %arg9[%c0_38, %c0_39] : memref<128x8xbf16, #tpu.memory_space<vmem>>, vector<128x8xbf16>
    tpu.vector_store %arg9[%c0_38, %c0_39], %82 {strides = array<i32>} : memref<128x8xbf16, #tpu.memory_space<vmem>>, vector<128x8xbf16>,
    return
  }
  func.func @transform_0(%arg0: i32, %arg1: i32) -> (i32, i32, i32, i32) {
    %c0_i32 = arith.constant 0 : i32
    %c0_i32_0 = arith.constant 0 : i32
    %c0_i32_1 = arith.constant 0 : i32
    return %arg0, %arg1, %c0_i32, %c0_i32_0 : i32, i32, i32, i32
  }
  func.func @transform_1(%arg0: i32, %arg1: i32) -> (i32, i32, i32, i32) {
    %c8_i32 = arith.constant 8 : i32
    %0 = arith.muli %arg1, %c8_i32 : i32
    %c1_i32 = arith.constant 1 : i32
    %1 = arith.subi %0, %c1_i32 : i32
    %c0_i32 = arith.constant 0 : i32
    %2 = arith.maxsi %1, %c0_i32 : i32
    %c0_i32_0 = arith.constant 0 : i32
    %c0_i32_1 = arith.constant 0 : i32
    %c0_i32_2 = arith.constant 0 : i32
    return %arg0, %2, %c0_i32_0, %c0_i32_1 : i32, i32, i32, i32
  }
  func.func @transform_2(%arg0: i32, %arg1: i32) -> (i32, i32, i32, i32) {
    %c8_i32 = arith.constant 8 : i32
    %0 = arith.muli %arg1, %c8_i32 : i32
    %c8_i32_0 = arith.constant 8 : i32
    %1 = arith.addi %0, %c8_i32_0 : i32
    %c15_i32 = arith.constant 15 : i32
    %2 = arith.minsi %1, %c15_i32 : i32
    %c0_i32 = arith.constant 0 : i32
    %c0_i32_1 = arith.constant 0 : i32
    %c0_i32_2 = arith.constant 0 : i32
    return %arg0, %2, %c0_i32, %c0_i32_1 : i32, i32, i32, i32
  }
  func.func @transform_3(%arg0: i32, %arg1: i32) -> (i32, i32) {
    %c0_i32 = arith.constant 0 : i32
    %c0_i32_0 = arith.constant 0 : i32
    %c0_i32_1 = arith.constant 0 : i32
    return %c0_i32, %c0_i32_0 : i32, i32
  }
  func.func @transform_4(%arg0: i32, %arg1: i32) -> (i32, i32) {
    %c0_i32 = arith.constant 0 : i32
    %c0_i32_0 = arith.constant 0 : i32
    %c0_i32_1 = arith.constant 0 : i32
    return %c0_i32, %c0_i32_0 : i32, i32
  }
  func.func @transform_5(%arg0: i32, %arg1: i32) -> (i32, i32) {
    %c0_i32 = arith.constant 0 : i32
    %c0_i32_0 = arith.constant 0 : i32
    %c0_i32_1 = arith.constant 0 : i32
    return %c0_i32, %c0_i32_0 : i32, i32
  }
  func.func @transform_6(%arg0: i32, %arg1: i32) -> (i32, i32) {
    %c0_i32 = arith.constant 0 : i32
    %c0_i32_0 = arith.constant 0 : i32
    %c0_i32_1 = arith.constant 0 : i32
    return %c0_i32, %c0_i32_0 : i32, i32
  }
  func.func @transform_7(%arg0: i32, %arg1: i32) -> (i32, i32) {
    %c2_i32 = arith.constant 2 : i32
    %0 = arith.muli %arg0, %c2_i32 : i32
    %1 = arith.addi %0, %arg1 : i32
    %c0_i32 = arith.constant 0 : i32
    %c0_i32_0 = arith.constant 0 : i32
    return %1, %c0_i32 : i32, i32
  }
  func.func @transform_8(%arg0: i32, %arg1: i32) -> (i32, i32, i32, i32) {
    %c0_i32 = arith.constant 0 : i32
    %c0_i32_0 = arith.constant 0 : i32
    %c0_i32_1 = arith.constant 0 : i32
    return %arg0, %arg1, %c0_i32, %c0_i32_0 : i32, i32, i32, i32
  }
  func.func @transform_9(%arg0: i32, %arg1: i32) -> (i32, i32, i32, i32) {
    %c0_i32 = arith.constant 0 : i32
    %c0_i32_0 = arith.constant 0 : i32
    %c0_i32_1 = arith.constant 0 : i32
    return %arg0, %arg1, %c0_i32, %c0_i32_0 : i32, i32, i32, i32
  }
}

module attributes {stable_mosaic.version = 11 : i64} {
  func.func @kernel(%arg0: i32, %arg1: i32, %arg2: memref<1x8x16x8xbf16, #tpu.memory_space<vmem>>, %arg3: memref<1x1x16x8xbf16, #tpu.memory_space<vmem>>, %arg4: memref<1x1x16x8xbf16, #tpu.memory_space<vmem>>, %arg5: memref<1x8x16x8xbf16, #tpu.memory_space<vmem>>, %arg6: memref<1x1x16x8xbf16, #tpu.memory_space<vmem>>, %arg7: memref<1x1x16x8xbf16, #tpu.memory_space<vmem>>, %arg8: memref<1x8xf32, #tpu.memory_space<vmem>>, %arg9: memref<1x8xf32, #tpu.memory_space<vmem>>, %arg10: memref<72x8xbf16, #tpu.memory_space<vmem>>, %arg11: memref<1x8xf32, #tpu.memory_space<vmem>>, %arg12: memref<128x8xbf16, #tpu.memory_space<vmem>>, %arg13: memref<1x8x16x8xbf16, #tpu.memory_space<vmem>>, %arg14: memref<1x1x2x8xf32, #tpu.memory_space<vmem>>, %arg15: memref<128x8xf32, #tpu.memory_space<vmem>>) attributes {dimension_semantics = [#tpu.dimension_semantics<parallel>, #tpu.dimension_semantics<parallel>], iteration_bounds = array<i64: 2, 2>, scalar_prefetch = 0 : i64, scratch_operands = 1 : i64, tpu.core_type = #tpu.core_type<tc>, window_params = [{transform_indices = @transform_0, window_bounds = array<i64: 1, 8, 16, 8>}, {transform_indices = @transform_1, window_bounds = array<i64: 1, 1, 16, 8>}, {transform_indices = @transform_2, window_bounds = array<i64: 1, 1, 16, 8>}, {transform_indices = @transform_3, window_bounds = array<i64: 1, 8, 16, 8>}, {transform_indices = @transform_4, window_bounds = array<i64: 1, 1, 16, 8>}, {transform_indices = @transform_5, window_bounds = array<i64: 1, 1, 16, 8>}, {pipeline_mode = #tpu.pipeline_mode<synchronous>, transform_indices = @transform_6, window_bounds = array<i64: 1, 8>}, {pipeline_mode = #tpu.pipeline_mode<synchronous>, transform_indices = @transform_7, window_bounds = array<i64: 1, 8>}, {pipeline_mode = #tpu.pipeline_mode<synchronous>, transform_indices = @transform_8, window_bounds = array<i64: 72, 8>}, {pipeline_mode = #tpu.pipeline_mode<synchronous>, transform_indices = @transform_9, window_bounds = array<i64: 1, 8>}, {transform_indices = @transform_10, window_bounds = array<i64: 128, 8>}, {transform_indices = @transform_11, window_bounds = array<i64: 1, 8, 16, 8>}, {transform_indices = @transform_12, window_bounds = array<i64: 1, 1, 2, 8>}]} {
    %c0_i32 = arith.constant 0 : i32
    %0 = arith.cmpi eq, %arg1, %c0_i32 : i32
    %c1_i32 = arith.constant 1 : i32
    %1 = arith.cmpi eq, %arg1, %c1_i32 : i32
    %c0 = arith.constant 0 : index
    %c0_0 = arith.constant 0 : index
    %2 = vector.load %arg8[%c0, %c0_0] : memref<1x8xf32, #tpu.memory_space<vmem>>, vector<1x8xf32>
    %c0_1 = arith.constant 0 : index
    %c0_2 = arith.constant 0 : index
    %3 = vector.load %arg9[%c0_1, %c0_2] : memref<1x8xf32, #tpu.memory_space<vmem>>, vector<1x8xf32>
    %c0_3 = arith.constant 0 : index
    %c0_4 = arith.constant 0 : index
    %c0_5 = arith.constant 0 : index
    %c0_6 = arith.constant 0 : index
    %4 = vector.load %arg2[%c0_3, %c0_4, %c0_5, %c0_6] : memref<1x8x16x8xbf16, #tpu.memory_space<vmem>>, vector<1x8x16x8xbf16>
    %5 = vector.shape_cast %4 : vector<1x8x16x8xbf16> to vector<8x16x8xbf16>
    %c0_7 = arith.constant 0 : index
    %c0_8 = arith.constant 0 : index
    %c0_9 = arith.constant 0 : index
    %c0_10 = arith.constant 0 : index
    %6 = vector.load %arg5[%c0_7, %c0_8, %c0_9, %c0_10] : memref<1x8x16x8xbf16, #tpu.memory_space<vmem>>, vector<1x8x16x8xbf16>
    %7 = vector.shape_cast %6 : vector<1x8x16x8xbf16> to vector<8x16x8xbf16>
    %8 = arith.extf %5 : vector<8x16x8xbf16> to vector<8x16x8xf32>
    %9 = vector.shape_cast %2 : vector<1x8xf32> to vector<1x1x8xf32>
    %10 = vector.broadcast %9 : vector<1x1x8xf32> to vector<8x16x8xf32>
    %11 = arith.mulf %8, %10 : vector<8x16x8xf32>
    %12 = vector.shape_cast %3 : vector<1x8xf32> to vector<1x1x8xf32>
    %13 = vector.broadcast %12 : vector<1x1x8xf32> to vector<8x16x8xf32>
    %14 = arith.addf %11, %13 : vector<8x16x8xf32>
    %15 = arith.extf %7 : vector<8x16x8xbf16> to vector<8x16x8xf32>
    %16 = arith.addf %14, %15 : vector<8x16x8xf32>
    %cst = arith.constant 0.000000e+00 : f32
    %17 = vector.broadcast %cst : f32 to vector<8x16x8xf32>
    %18 = arith.maximumf %16, %17 : vector<8x16x8xf32>
    %19 = arith.truncf %18 : vector<8x16x8xf32> to vector<8x16x8xbf16>
    %c0_11 = arith.constant 0 : index
    %c0_12 = arith.constant 0 : index
    %c0_13 = arith.constant 0 : index
    %c0_14 = arith.constant 0 : index
    %20 = vector.load %arg13[%c0_11, %c0_12, %c0_13, %c0_14] : memref<1x8x16x8xbf16, #tpu.memory_space<vmem>>, vector<1x8x16x8xbf16>
    %21 = vector.shape_cast %20 : vector<1x8x16x8xbf16> to vector<8x16x8xbf16>
    %22 = vector.shape_cast %19 : vector<8x16x8xbf16> to vector<1x8x16x8xbf16>
    tpu.vector_store %arg13[%c0_11, %c0_12, %c0_13, %c0_14], %22 {strides = array<i32>} : memref<1x8x16x8xbf16, #tpu.memory_space<vmem>>, vector<1x8x16x8xbf16>,
    %c0_15 = arith.constant 0 : index
    %c0_16 = arith.constant 0 : index
    %c0_17 = arith.constant 0 : index
    %c0_18 = arith.constant 0 : index
    %23 = vector.load %arg3[%c0_15, %c0_16, %c0_17, %c0_18] : memref<1x1x16x8xbf16, #tpu.memory_space<vmem>>, vector<1x1x16x8xbf16>
    %24 = vector.shape_cast %23 : vector<1x1x16x8xbf16> to vector<1x16x8xbf16>
    %c0_19 = arith.constant 0 : index
    %c0_20 = arith.constant 0 : index
    %c0_21 = arith.constant 0 : index
    %c0_22 = arith.constant 0 : index
    %25 = vector.load %arg6[%c0_19, %c0_20, %c0_21, %c0_22] : memref<1x1x16x8xbf16, #tpu.memory_space<vmem>>, vector<1x1x16x8xbf16>
    %26 = vector.shape_cast %25 : vector<1x1x16x8xbf16> to vector<1x16x8xbf16>
    %27 = arith.extf %24 : vector<1x16x8xbf16> to vector<1x16x8xf32>
    %28 = vector.shape_cast %2 : vector<1x8xf32> to vector<1x1x8xf32>
    %29 = vector.broadcast %28 : vector<1x1x8xf32> to vector<1x16x8xf32>
    %30 = arith.mulf %27, %29 : vector<1x16x8xf32>
    %31 = vector.shape_cast %3 : vector<1x8xf32> to vector<1x1x8xf32>
    %32 = vector.broadcast %31 : vector<1x1x8xf32> to vector<1x16x8xf32>
    %33 = arith.addf %30, %32 : vector<1x16x8xf32>
    %34 = arith.extf %26 : vector<1x16x8xbf16> to vector<1x16x8xf32>
    %35 = arith.addf %33, %34 : vector<1x16x8xf32>
    %cst_23 = arith.constant 0.000000e+00 : f32
    %36 = vector.broadcast %cst_23 : f32 to vector<1x16x8xf32>
    %37 = arith.maximumf %35, %36 : vector<1x16x8xf32>
    %38 = arith.truncf %37 : vector<1x16x8xf32> to vector<1x16x8xbf16>
    %c0_24 = arith.constant 0 : index
    %c0_25 = arith.constant 0 : index
    %c0_26 = arith.constant 0 : index
    %c0_27 = arith.constant 0 : index
    %39 = vector.load %arg4[%c0_24, %c0_25, %c0_26, %c0_27] : memref<1x1x16x8xbf16, #tpu.memory_space<vmem>>, vector<1x1x16x8xbf16>
    %40 = vector.shape_cast %39 : vector<1x1x16x8xbf16> to vector<1x16x8xbf16>
    %c0_28 = arith.constant 0 : index
    %c0_29 = arith.constant 0 : index
    %c0_30 = arith.constant 0 : index
    %c0_31 = arith.constant 0 : index
    %41 = vector.load %arg7[%c0_28, %c0_29, %c0_30, %c0_31] : memref<1x1x16x8xbf16, #tpu.memory_space<vmem>>, vector<1x1x16x8xbf16>
    %42 = vector.shape_cast %41 : vector<1x1x16x8xbf16> to vector<1x16x8xbf16>
    %43 = arith.extf %40 : vector<1x16x8xbf16> to vector<1x16x8xf32>
    %44 = vector.shape_cast %2 : vector<1x8xf32> to vector<1x1x8xf32>
    %45 = vector.broadcast %44 : vector<1x1x8xf32> to vector<1x16x8xf32>
    %46 = arith.mulf %43, %45 : vector<1x16x8xf32>
    %47 = vector.shape_cast %3 : vector<1x8xf32> to vector<1x1x8xf32>
    %48 = vector.broadcast %47 : vector<1x1x8xf32> to vector<1x16x8xf32>
    %49 = arith.addf %46, %48 : vector<1x16x8xf32>
    %50 = arith.extf %42 : vector<1x16x8xbf16> to vector<1x16x8xf32>
    %51 = arith.addf %49, %50 : vector<1x16x8xf32>
    %cst_32 = arith.constant 0.000000e+00 : f32
    %52 = vector.broadcast %cst_32 : f32 to vector<1x16x8xf32>
    %53 = arith.maximumf %51, %52 : vector<1x16x8xf32>
    %54 = arith.truncf %53 : vector<1x16x8xf32> to vector<1x16x8xbf16>
    %cst_33 = arith.constant 0.000000e+00 : bf16
    %55 = vector.broadcast %cst_33 : bf16 to vector<1x16x8xbf16>
    %56 = arith.select %0, %55, %38 : vector<1x16x8xbf16>
    %57 = arith.select %1, %55, %54 : vector<1x16x8xbf16>
    %58 = tpu.concatenate %56, %19, %57 in 0 : vector<1x16x8xbf16>, vector<8x16x8xbf16>, vector<1x16x8xbf16> -> vector<10x16x8xbf16>
    %cst_34 = arith.constant 0.000000e+00 : bf16
    %59 = vector.broadcast %cst_34 : bf16 to vector<10x1x8xbf16>
    %60 = tpu.concatenate %59, %58, %59 in 1 : vector<10x1x8xbf16>, vector<10x16x8xbf16>, vector<10x1x8xbf16> -> vector<10x18x8xbf16>
    %61 = vector.extract_strided_slice %60 {offsets = [0, 0, 0], sizes = [8, 18, 8], strides = [1, 1, 1]} : vector<10x18x8xbf16> to vector<8x18x8xbf16>
    %62 = vector.extract_strided_slice %61 {offsets = [0, 0, 0], sizes = [8, 16, 8], strides = [1, 1, 1]} : vector<8x18x8xbf16> to vector<8x16x8xbf16>
    %63 = vector.extract_strided_slice %61 {offsets = [0, 1, 0], sizes = [8, 16, 8], strides = [1, 1, 1]} : vector<8x18x8xbf16> to vector<8x16x8xbf16>
    %64 = vector.extract_strided_slice %61 {offsets = [0, 2, 0], sizes = [8, 16, 8], strides = [1, 1, 1]} : vector<8x18x8xbf16> to vector<8x16x8xbf16>
    %65 = tpu.concatenate %62, %63, %64 in 2 : vector<8x16x8xbf16>, vector<8x16x8xbf16>, vector<8x16x8xbf16> -> vector<8x16x24xbf16>
    %66 = vector.extract_strided_slice %60 {offsets = [1, 0, 0], sizes = [8, 18, 8], strides = [1, 1, 1]} : vector<10x18x8xbf16> to vector<8x18x8xbf16>
    %67 = vector.extract_strided_slice %66 {offsets = [0, 0, 0], sizes = [8, 16, 8], strides = [1, 1, 1]} : vector<8x18x8xbf16> to vector<8x16x8xbf16>
    %68 = vector.extract_strided_slice %66 {offsets = [0, 1, 0], sizes = [8, 16, 8], strides = [1, 1, 1]} : vector<8x18x8xbf16> to vector<8x16x8xbf16>
    %69 = vector.extract_strided_slice %66 {offsets = [0, 2, 0], sizes = [8, 16, 8], strides = [1, 1, 1]} : vector<8x18x8xbf16> to vector<8x16x8xbf16>
    %70 = tpu.concatenate %67, %68, %69 in 2 : vector<8x16x8xbf16>, vector<8x16x8xbf16>, vector<8x16x8xbf16> -> vector<8x16x24xbf16>
    %71 = vector.extract_strided_slice %60 {offsets = [2, 0, 0], sizes = [8, 18, 8], strides = [1, 1, 1]} : vector<10x18x8xbf16> to vector<8x18x8xbf16>
    %72 = vector.extract_strided_slice %71 {offsets = [0, 0, 0], sizes = [8, 16, 8], strides = [1, 1, 1]} : vector<8x18x8xbf16> to vector<8x16x8xbf16>
    %73 = vector.extract_strided_slice %71 {offsets = [0, 1, 0], sizes = [8, 16, 8], strides = [1, 1, 1]} : vector<8x18x8xbf16> to vector<8x16x8xbf16>
    %74 = vector.extract_strided_slice %71 {offsets = [0, 2, 0], sizes = [8, 16, 8], strides = [1, 1, 1]} : vector<8x18x8xbf16> to vector<8x16x8xbf16>
    %75 = tpu.concatenate %72, %73, %74 in 2 : vector<8x16x8xbf16>, vector<8x16x8xbf16>, vector<8x16x8xbf16> -> vector<8x16x24xbf16>
    %76 = tpu.concatenate %65, %70, %75 in 2 : vector<8x16x24xbf16>, vector<8x16x24xbf16>, vector<8x16x24xbf16> -> vector<8x16x72xbf16>
    %77 = vector.shape_cast %76 : vector<8x16x72xbf16> to vector<128x72xbf16>
    %c0_35 = arith.constant 0 : index
    %c0_36 = arith.constant 0 : index
    %78 = vector.load %arg10[%c0_35, %c0_36] : memref<72x8xbf16, #tpu.memory_space<vmem>>, vector<72x8xbf16>
    %cst_37 = arith.constant dense<0.000000e+00> : vector<128x8xf32>
    %79 = tpu.matmul %77, %78, %cst_37 {dimension_numbers = #tpu.dot_dimension_numbers<[1], [0], [0], [1], [0, 0, 1, 1], [], []>} : vector<128x72xbf16>, vector<72x8xbf16>, vector<128x8xf32> -> vector<128x8xf32>
    %c0_38 = arith.constant 0 : index
    %c0_39 = arith.constant 0 : index
    %80 = vector.load %arg11[%c0_38, %c0_39] : memref<1x8xf32, #tpu.memory_space<vmem>>, vector<1x8xf32>
    %81 = vector.broadcast %80 : vector<1x8xf32> to vector<128x8xf32>
    %82 = arith.addf %79, %81 : vector<128x8xf32>
    %c0_40 = arith.constant 0 : index
    %c0_41 = arith.constant 0 : index
    %83 = vector.load %arg15[%c0_40, %c0_41] : memref<128x8xf32, #tpu.memory_space<vmem>>, vector<128x8xf32>
    tpu.vector_store %arg15[%c0_40, %c0_41], %82 {strides = array<i32>} : memref<128x8xf32, #tpu.memory_space<vmem>>, vector<128x8xf32>,
    %c0_42 = arith.constant 0 : index
    %c0_43 = arith.constant 0 : index
    %84 = vector.load %arg15[%c0_42, %c0_43] : memref<128x8xf32, #tpu.memory_space<vmem>>, vector<128x8xf32>
    %cst_44 = arith.constant dense<0.000000e+00> : vector<8xf32>
    %85 = vector.multi_reduction <add>, %84, %cst_44 [0] : vector<128x8xf32> to vector<8xf32>
    %86 = vector.shape_cast %85 : vector<8xf32> to vector<1x8xf32>
    %87 = arith.mulf %84, %84 : vector<128x8xf32>
    %cst_45 = arith.constant dense<0.000000e+00> : vector<8xf32>
    %88 = vector.multi_reduction <add>, %87, %cst_45 [0] : vector<128x8xf32> to vector<8xf32>
    %89 = vector.shape_cast %88 : vector<8xf32> to vector<1x8xf32>
    %90 = tpu.concatenate %86, %89 in 0 : vector<1x8xf32>, vector<1x8xf32> -> vector<2x8xf32>
    %c0_46 = arith.constant 0 : index
    %c0_47 = arith.constant 0 : index
    %c0_48 = arith.constant 0 : index
    %c0_49 = arith.constant 0 : index
    %91 = vector.load %arg14[%c0_46, %c0_47, %c0_48, %c0_49] : memref<1x1x2x8xf32, #tpu.memory_space<vmem>>, vector<1x1x2x8xf32>
    %92 = vector.shape_cast %91 : vector<1x1x2x8xf32> to vector<2x8xf32>
    %93 = vector.shape_cast %90 : vector<2x8xf32> to vector<1x1x2x8xf32>
    tpu.vector_store %arg14[%c0_46, %c0_47, %c0_48, %c0_49], %93 {strides = array<i32>} : memref<1x1x2x8xf32, #tpu.memory_space<vmem>>, vector<1x1x2x8xf32>,
    %94 = arith.truncf %84 : vector<128x8xf32> to vector<128x8xbf16>
    %c0_50 = arith.constant 0 : index
    %c0_51 = arith.constant 0 : index
    %95 = vector.load %arg12[%c0_50, %c0_51] : memref<128x8xbf16, #tpu.memory_space<vmem>>, vector<128x8xbf16>
    tpu.vector_store %arg12[%c0_50, %c0_51], %94 {strides = array<i32>} : memref<128x8xbf16, #tpu.memory_space<vmem>>, vector<128x8xbf16>,
    return
  }
  func.func @transform_0(%arg0: i32, %arg1: i32) -> (i32, i32, i32, i32) {
    %c0_i32 = arith.constant 0 : i32
    %c0_i32_0 = arith.constant 0 : i32
    %c0_i32_1 = arith.constant 0 : i32
    return %arg0, %arg1, %c0_i32, %c0_i32_0 : i32, i32, i32, i32
  }
  func.func @transform_1(%arg0: i32, %arg1: i32) -> (i32, i32, i32, i32) {
    %c8_i32 = arith.constant 8 : i32
    %0 = arith.muli %arg1, %c8_i32 : i32
    %c1_i32 = arith.constant 1 : i32
    %1 = arith.subi %0, %c1_i32 : i32
    %c0_i32 = arith.constant 0 : i32
    %2 = arith.maxsi %1, %c0_i32 : i32
    %c0_i32_0 = arith.constant 0 : i32
    %c0_i32_1 = arith.constant 0 : i32
    %c0_i32_2 = arith.constant 0 : i32
    return %arg0, %2, %c0_i32_0, %c0_i32_1 : i32, i32, i32, i32
  }
  func.func @transform_2(%arg0: i32, %arg1: i32) -> (i32, i32, i32, i32) {
    %c8_i32 = arith.constant 8 : i32
    %0 = arith.muli %arg1, %c8_i32 : i32
    %c8_i32_0 = arith.constant 8 : i32
    %1 = arith.addi %0, %c8_i32_0 : i32
    %c15_i32 = arith.constant 15 : i32
    %2 = arith.minsi %1, %c15_i32 : i32
    %c0_i32 = arith.constant 0 : i32
    %c0_i32_1 = arith.constant 0 : i32
    %c0_i32_2 = arith.constant 0 : i32
    return %arg0, %2, %c0_i32, %c0_i32_1 : i32, i32, i32, i32
  }
  func.func @transform_3(%arg0: i32, %arg1: i32) -> (i32, i32, i32, i32) {
    %c0_i32 = arith.constant 0 : i32
    %c0_i32_0 = arith.constant 0 : i32
    %c0_i32_1 = arith.constant 0 : i32
    return %arg0, %arg1, %c0_i32, %c0_i32_0 : i32, i32, i32, i32
  }
  func.func @transform_4(%arg0: i32, %arg1: i32) -> (i32, i32, i32, i32) {
    %c8_i32 = arith.constant 8 : i32
    %0 = arith.muli %arg1, %c8_i32 : i32
    %c1_i32 = arith.constant 1 : i32
    %1 = arith.subi %0, %c1_i32 : i32
    %c0_i32 = arith.constant 0 : i32
    %2 = arith.maxsi %1, %c0_i32 : i32
    %c0_i32_0 = arith.constant 0 : i32
    %c0_i32_1 = arith.constant 0 : i32
    %c0_i32_2 = arith.constant 0 : i32
    return %arg0, %2, %c0_i32_0, %c0_i32_1 : i32, i32, i32, i32
  }
  func.func @transform_5(%arg0: i32, %arg1: i32) -> (i32, i32, i32, i32) {
    %c8_i32 = arith.constant 8 : i32
    %0 = arith.muli %arg1, %c8_i32 : i32
    %c8_i32_0 = arith.constant 8 : i32
    %1 = arith.addi %0, %c8_i32_0 : i32
    %c15_i32 = arith.constant 15 : i32
    %2 = arith.minsi %1, %c15_i32 : i32
    %c0_i32 = arith.constant 0 : i32
    %c0_i32_1 = arith.constant 0 : i32
    %c0_i32_2 = arith.constant 0 : i32
    return %arg0, %2, %c0_i32, %c0_i32_1 : i32, i32, i32, i32
  }
  func.func @transform_6(%arg0: i32, %arg1: i32) -> (i32, i32) {
    %c0_i32 = arith.constant 0 : i32
    %c0_i32_0 = arith.constant 0 : i32
    %c0_i32_1 = arith.constant 0 : i32
    return %c0_i32, %c0_i32_0 : i32, i32
  }
  func.func @transform_7(%arg0: i32, %arg1: i32) -> (i32, i32) {
    %c0_i32 = arith.constant 0 : i32
    %c0_i32_0 = arith.constant 0 : i32
    %c0_i32_1 = arith.constant 0 : i32
    return %c0_i32, %c0_i32_0 : i32, i32
  }
  func.func @transform_8(%arg0: i32, %arg1: i32) -> (i32, i32) {
    %c0_i32 = arith.constant 0 : i32
    %c0_i32_0 = arith.constant 0 : i32
    %c0_i32_1 = arith.constant 0 : i32
    return %c0_i32, %c0_i32_0 : i32, i32
  }
  func.func @transform_9(%arg0: i32, %arg1: i32) -> (i32, i32) {
    %c0_i32 = arith.constant 0 : i32
    %c0_i32_0 = arith.constant 0 : i32
    %c0_i32_1 = arith.constant 0 : i32
    return %c0_i32, %c0_i32_0 : i32, i32
  }
  func.func @transform_10(%arg0: i32, %arg1: i32) -> (i32, i32) {
    %c2_i32 = arith.constant 2 : i32
    %0 = arith.muli %arg0, %c2_i32 : i32
    %1 = arith.addi %0, %arg1 : i32
    %c0_i32 = arith.constant 0 : i32
    %c0_i32_0 = arith.constant 0 : i32
    return %1, %c0_i32 : i32, i32
  }
  func.func @transform_11(%arg0: i32, %arg1: i32) -> (i32, i32, i32, i32) {
    %c0_i32 = arith.constant 0 : i32
    %c0_i32_0 = arith.constant 0 : i32
    %c0_i32_1 = arith.constant 0 : i32
    return %arg0, %arg1, %c0_i32, %c0_i32_0 : i32, i32, i32, i32
  }
  func.func @transform_12(%arg0: i32, %arg1: i32) -> (i32, i32, i32, i32) {
    %c0_i32 = arith.constant 0 : i32
    %c0_i32_0 = arith.constant 0 : i32
    %c0_i32_1 = arith.constant 0 : i32
    return %arg0, %arg1, %c0_i32, %c0_i32_0 : i32, i32, i32, i32
  }
}

module attributes {stable_mosaic.version = 11 : i64} {
  func.func @kernel(%arg0: i32, %arg1: i32, %arg2: memref<1x16x16x8xbf16, #tpu.memory_space<vmem>>, %arg3: memref<1x16x16x8xbf16, #tpu.memory_space<vmem>>, %arg4: memref<1x8xf32, #tpu.memory_space<vmem>>, %arg5: memref<1x8xf32, #tpu.memory_space<vmem>>, %arg6: memref<1x16x16x8xbf16, #tpu.memory_space<vmem>>, %arg7: memref<1x8x8x8xbf16, #tpu.memory_space<vmem>>, %arg8: memref<8x16x8xf32, #tpu.memory_space<vmem>>) attributes {dimension_semantics = [#tpu.dimension_semantics<parallel>, #tpu.dimension_semantics<parallel>], iteration_bounds = array<i64: 2, 1>, scalar_prefetch = 0 : i64, scratch_operands = 1 : i64, tpu.core_type = #tpu.core_type<tc>, window_params = [{transform_indices = @transform_0, window_bounds = array<i64: 1, 16, 16, 8>}, {transform_indices = @transform_1, window_bounds = array<i64: 1, 16, 16, 8>}, {pipeline_mode = #tpu.pipeline_mode<synchronous>, transform_indices = @transform_2, window_bounds = array<i64: 1, 8>}, {pipeline_mode = #tpu.pipeline_mode<synchronous>, transform_indices = @transform_3, window_bounds = array<i64: 1, 8>}, {transform_indices = @transform_4, window_bounds = array<i64: 1, 16, 16, 8>}, {transform_indices = @transform_5, window_bounds = array<i64: 1, 8, 8, 8>}]} {
    %c0 = arith.constant 0 : index
    %c0_0 = arith.constant 0 : index
    %c0_1 = arith.constant 0 : index
    %c0_2 = arith.constant 0 : index
    %0 = vector.load %arg2[%c0, %c0_0, %c0_1, %c0_2] : memref<1x16x16x8xbf16, #tpu.memory_space<vmem>>, vector<1x16x16x8xbf16>
    %1 = vector.shape_cast %0 : vector<1x16x16x8xbf16> to vector<16x16x8xbf16>
    %2 = arith.extf %1 : vector<16x16x8xbf16> to vector<16x16x8xf32>
    %c0_3 = arith.constant 0 : index
    %c0_4 = arith.constant 0 : index
    %3 = vector.load %arg4[%c0_3, %c0_4] : memref<1x8xf32, #tpu.memory_space<vmem>>, vector<1x8xf32>
    %4 = vector.shape_cast %3 : vector<1x8xf32> to vector<1x1x8xf32>
    %5 = vector.broadcast %4 : vector<1x1x8xf32> to vector<16x16x8xf32>
    %6 = arith.mulf %2, %5 : vector<16x16x8xf32>
    %c0_5 = arith.constant 0 : index
    %c0_6 = arith.constant 0 : index
    %7 = vector.load %arg5[%c0_5, %c0_6] : memref<1x8xf32, #tpu.memory_space<vmem>>, vector<1x8xf32>
    %8 = vector.shape_cast %7 : vector<1x8xf32> to vector<1x1x8xf32>
    %9 = vector.broadcast %8 : vector<1x1x8xf32> to vector<16x16x8xf32>
    %10 = arith.addf %6, %9 : vector<16x16x8xf32>
    %c0_7 = arith.constant 0 : index
    %c0_8 = arith.constant 0 : index
    %c0_9 = arith.constant 0 : index
    %c0_10 = arith.constant 0 : index
    %11 = vector.load %arg3[%c0_7, %c0_8, %c0_9, %c0_10] : memref<1x16x16x8xbf16, #tpu.memory_space<vmem>>, vector<1x16x16x8xbf16>
    %12 = vector.shape_cast %11 : vector<1x16x16x8xbf16> to vector<16x16x8xbf16>
    %13 = arith.extf %12 : vector<16x16x8xbf16> to vector<16x16x8xf32>
    %14 = arith.addf %10, %13 : vector<16x16x8xf32>
    %cst = arith.constant 0.000000e+00 : f32
    %15 = vector.broadcast %cst : f32 to vector<16x16x8xf32>
    %16 = arith.maximumf %14, %15 : vector<16x16x8xf32>
    %17 = arith.truncf %16 : vector<16x16x8xf32> to vector<16x16x8xbf16>
    %c0_11 = arith.constant 0 : index
    %c0_12 = arith.constant 0 : index
    %c0_13 = arith.constant 0 : index
    %c0_14 = arith.constant 0 : index
    %18 = vector.load %arg6[%c0_11, %c0_12, %c0_13, %c0_14] : memref<1x16x16x8xbf16, #tpu.memory_space<vmem>>, vector<1x16x16x8xbf16>
    %19 = vector.shape_cast %18 : vector<1x16x16x8xbf16> to vector<16x16x8xbf16>
    %20 = vector.shape_cast %17 : vector<16x16x8xbf16> to vector<1x16x16x8xbf16>
    tpu.vector_store %arg6[%c0_11, %c0_12, %c0_13, %c0_14], %20 {strides = array<i32>} : memref<1x16x16x8xbf16, #tpu.memory_space<vmem>>, vector<1x16x16x8xbf16>,
    %21 = vector.shape_cast %16 : vector<16x16x8xf32> to vector<8x2x16x8xf32>
    %22 = vector.extract_strided_slice %21 {offsets = [0, 0, 0, 0], sizes = [8, 1, 16, 8], strides = [1, 1, 1, 1]} : vector<8x2x16x8xf32> to vector<8x1x16x8xf32>
    %23 = vector.shape_cast %22 : vector<8x1x16x8xf32> to vector<8x16x8xf32>
    %24 = vector.extract_strided_slice %21 {offsets = [0, 1, 0, 0], sizes = [8, 1, 16, 8], strides = [1, 1, 1, 1]} : vector<8x2x16x8xf32> to vector<8x1x16x8xf32>
    %25 = vector.shape_cast %24 : vector<8x1x16x8xf32> to vector<8x16x8xf32>
    %26 = arith.maximumf %23, %25 : vector<8x16x8xf32>
    %c0_15 = arith.constant 0 : index
    %c0_16 = arith.constant 0 : index
    %c0_17 = arith.constant 0 : index
    %27 = vector.load %arg8[%c0_15, %c0_16, %c0_17] : memref<8x16x8xf32, #tpu.memory_space<vmem>>, vector<8x16x8xf32>
    tpu.vector_store %arg8[%c0_15, %c0_16, %c0_17], %26 {strides = array<i32>} : memref<8x16x8xf32, #tpu.memory_space<vmem>>, vector<8x16x8xf32>,
    %c0_18 = arith.constant 0 : index
    %c0_19 = arith.constant 0 : index
    %c0_20 = arith.constant 0 : index
    %28 = tpu.strided_load %arg8[%c0_18, %c0_19, %c0_20] {strides = array<i32: 1, 2, 1>} : memref<8x16x8xf32, #tpu.memory_space<vmem>>, vector<8x8x8xf32>
    %c0_21 = arith.constant 0 : index
    %c1 = arith.constant 1 : index
    %c0_22 = arith.constant 0 : index
    %29 = tpu.strided_load %arg8[%c0_21, %c1, %c0_22] {strides = array<i32: 1, 2, 1>} : memref<8x16x8xf32, #tpu.memory_space<vmem>>, vector<8x8x8xf32>
    %30 = arith.maximumf %28, %29 : vector<8x8x8xf32>
    %31 = arith.truncf %30 : vector<8x8x8xf32> to vector<8x8x8xbf16>
    %c0_23 = arith.constant 0 : index
    %c0_24 = arith.constant 0 : index
    %c0_25 = arith.constant 0 : index
    %c0_26 = arith.constant 0 : index
    %32 = vector.load %arg7[%c0_23, %c0_24, %c0_25, %c0_26] : memref<1x8x8x8xbf16, #tpu.memory_space<vmem>>, vector<1x8x8x8xbf16>
    %33 = vector.shape_cast %32 : vector<1x8x8x8xbf16> to vector<8x8x8xbf16>
    %34 = vector.shape_cast %31 : vector<8x8x8xbf16> to vector<1x8x8x8xbf16>
    tpu.vector_store %arg7[%c0_23, %c0_24, %c0_25, %c0_26], %34 {strides = array<i32>} : memref<1x8x8x8xbf16, #tpu.memory_space<vmem>>, vector<1x8x8x8xbf16>,
    return
  }
  func.func @transform_0(%arg0: i32, %arg1: i32) -> (i32, i32, i32, i32) {
    %c0_i32 = arith.constant 0 : i32
    %c0_i32_0 = arith.constant 0 : i32
    %c0_i32_1 = arith.constant 0 : i32
    return %arg0, %arg1, %c0_i32, %c0_i32_0 : i32, i32, i32, i32
  }
  func.func @transform_1(%arg0: i32, %arg1: i32) -> (i32, i32, i32, i32) {
    %c0_i32 = arith.constant 0 : i32
    %c0_i32_0 = arith.constant 0 : i32
    %c0_i32_1 = arith.constant 0 : i32
    return %arg0, %arg1, %c0_i32, %c0_i32_0 : i32, i32, i32, i32
  }
  func.func @transform_2(%arg0: i32, %arg1: i32) -> (i32, i32) {
    %c0_i32 = arith.constant 0 : i32
    %c0_i32_0 = arith.constant 0 : i32
    %c0_i32_1 = arith.constant 0 : i32
    return %c0_i32, %c0_i32_0 : i32, i32
  }
  func.func @transform_3(%arg0: i32, %arg1: i32) -> (i32, i32) {
    %c0_i32 = arith.constant 0 : i32
    %c0_i32_0 = arith.constant 0 : i32
    %c0_i32_1 = arith.constant 0 : i32
    return %c0_i32, %c0_i32_0 : i32, i32
  }
  func.func @transform_4(%arg0: i32, %arg1: i32) -> (i32, i32, i32, i32) {
    %c0_i32 = arith.constant 0 : i32
    %c0_i32_0 = arith.constant 0 : i32
    %c0_i32_1 = arith.constant 0 : i32
    return %arg0, %arg1, %c0_i32, %c0_i32_0 : i32, i32, i32, i32
  }
  func.func @transform_5(%arg0: i32, %arg1: i32) -> (i32, i32, i32, i32) {
    %c0_i32 = arith.constant 0 : i32
    %c0_i32_0 = arith.constant 0 : i32
    %c0_i32_1 = arith.constant 0 : i32
    return %arg0, %arg1, %c0_i32, %c0_i32_0 : i32, i32, i32, i32
  }
}

</mosaic_0001>

<bundles_post_ra>
// kernel: down_conv_forward.4
= control target key start
LH: loop header
LB: loop body
LE: loop exit
PB: predicated region body
PF: predicated region fallthrough
CT: control target
= control target key end

     0   :  { %s1623_s21 = smov 0   ;;  %s1625_s22 = smov 0   ;;  %s2166_s0 = inlined_call_operand.vmem [shape: bf16[2,16,16,4], index: 0, kind: input, shape index: {}, may-alias: {0,1,2}]   ;;  %s2167_s1 = inlined_call_operand.vmem [shape: bf16[2,16,16,4], index: 1, kind: input, shape index: {}, may-alias: {0,1,2}]   ;;  %s2168_s2 = inlined_call_operand.vmem [shape: bf16[2,16,16,4], index: 2, kind: input, shape index: {}, may-alias: {0,1,2}]   ;;  %s2169_s3 = inlined_call_operand.vmem [shape: bf16[36,8], index: 3, kind: input, shape index: {}]   ;;  %s2170_s4 = inlined_call_operand.vmem [shape: f32[1,8], index: 4, kind: input, shape index: {}]   ;;  %s2171_s5 = inlined_call_operand.vmem [shape: bf16[512,8], index: 5, kind: output, shape index: {0}]   ;;  %s2172_s6 = inlined_call_operand.vmem [shape: f32[2,2,2,8], index: 6, kind: output, shape index: {1}]  }
   0x1   :  { %s1627_s23 = smov 0   ;;  %s1629_s24 = smov 0  }
   0x2   :  { %s1631_s25 = smov 0  }
   0x3 LB: > { %s26_s26 = sadd.s32 1, %s1574_s23  ;;  %s29_s27 = sadd.s32 1, %s1578_s24  ;;  %s1582_s25 = sphi %s1631_s25, %s17_s25   ;;  %s1578_s24 = sphi %s1629_s24, %s2179_s24   ;;  %s1574_s23 = sphi %s1627_s23, %s2178_s23   ;;  %s1570_s22 = sphi %s1625_s22, %s2177_s22   ;;  %s1566_s21 = sphi %s1623_s21, %s2176_s21  }
   0x4   : > { %p27_p0 = scmp.ge.s32.totalorder %s26_s26, 2  ;;  %p1401_p1 = scmp.ge.s32.totalorder %s1582_s25, 1 }
   0x5   : > { %p305_p2 = scmp.lt.s32.totalorder %s1582_s25, 5 }
   0x6   : > { %s2181_s26 = smov (%p27_p0, %s26_s26), 0  ;;  %s2183_s27 = smov (!%p27_p0, %s29_s27), %s1578_s24 }
   0x7   : > { %p306_p3 = pnand %p1401_p1, %p305_p2  ;;  %p31_p4 = scmp.ge.s32.totalorder %s2183_s27, 2 }
   0x8   : > { %s1658_s28 = sshll.u32 (!%p306_p3), %s1566_s21, 3  ;;  %p377_p5 = scmp.lt.s32.totalorder (!%p306_p3), %s1570_s22, 1 }
   0x9   : > { %s2185_s27 = smov (%p31_p4, %s2183_s27), 0  ;;  %309 = sbr.rel (%p306_p3) target bundleno = 490 (0x1ea), region = 40 }
   0xa   : > { %p379_p6 = scmp.lt.s32.totalorder (!%p306_p3), %s1658_s28, 15  ;;  %s405_s14 = sadd.s32 (!%p306_p3), 8, %s1658_s28 }
   0xb   : > { %s1690_s15 = sadd.s32 (!%p306_p3), 4294967295, %s1658_s28  ;;  %p1700_p7 = scmp.lt.s32.totalorder (!%p306_p3), %s405_s14, 15 }
   0xc   : > { %p389_p8 = scmp.gt.s32.totalorder (!%p306_p3), %s1690_s15, 0  ;;  %p1408_p9 = scmp.lt.s32.totalorder (!%p306_p3), %s1690_s15, 15 }
   0xd   : > { %s1584_s17 = smov (!%p306_p3), 8   ;;  %s1585_s20 = smov (!%p306_p3), 4  }
   0xe   : > { %s1663_s29 = scalar_select %p377_p5, %s1570_s22, 1  ;;  %vm612_vm0 = vcmask 1040384   ;;  %vm613_vm1 = vsmask.f32 256  ;;  %vm764_vm3 = vcmask 1046528   ;;  %vm805_vm7 = vcmask 31744  }
   0xf   : > { %s380_s30 = scalar_select %p379_p6, %s1658_s28, 15  ;;  %vm1681_vm2 = vmand %vm612_vm0, %vm613_vm1  ;;  %vm635_vm4 = vsmask.f32 7424  ;;  %vm822_vm8 = vcmask 64512   ;;  %vm1005_vm9 = vcmask 1041408   ;;  %vm947_vm10 = vcmask 195584  }
  0x10   : > { %s1667_s7 = sshll.u32 %s1663_s29, 5  ;;  %s2187_s14 = smov (!%p1700_p7, %s405_s14), 15  ;;  %vm930_vm11 = vcmask 97280   ;;  %vm988_vm12 = vcmask 293888   ;;  %vm1200_vm13 = vcmask 60416   ;;  %vm1182_vm14 = vcmask 58368  }
  0x11   : > { %s1403_s8 = sshll.u32 %s380_s30, 1  ;;  %s2189_s14 = smov (!%p1700_p7, %s2187_s14), 15 }
  0x12   : > { %s383_s9 = sadd.s32 %s1667_s7, %s1403_s8  ;;  %s1778_s19 = sshll.u32 %s2189_s14, 1 }
  0x13   : > { %s1405_s10 = sshll.u32 %s383_s9, 2  ;;  %s414_s30 = sadd.s32 %s1778_s19, %s1667_s7 }
  0x14   : > { %s1673_s13 = scalar_lea.vmem %s2166_s0, %s1405_s10  ;;  %p441_p10 = scmp.eq.s32.totalorder %s1566_s21, 1 }
  0x15   : > { %v1482_v0 = vld [vmem:[%s1673_s13 + $0x10] sm:$0xff]  ;;  %v1480_v1 = vld [vmem:[%s1673_s13] sm:$0xff]  ;;  %v1481_v2 = vld [vmem:[%s1673_s13 + $0x8] sm:$0xff]  ;;  %s390_s18 = scalar_select %p389_p8, %s1690_s15, 0 }
  0x16   : > { %v1483_v3 = vld [vmem:[%s1673_s13 + $0x18] sm:$0xff]  ;;  %v1484_v4 = vld [vmem:[%s1673_s13 + $0x20] sm:$0xff]  ;;  %v544_v5 = vshrl.u32 %v1482_v0, 16  ;;  %v547_v6 = vshll.u32 %v1482_v0, 16  ;;  %v530_v7 = vshrl.u32 %v1480_v1, 16  ;;  %v533_v8 = vshll.u32 %v1480_v1, 16 }
  0x17   : > { %v537_v10 = vshrl.u32 %v1481_v2, 16  ;;  %v540_v11 = vshll.u32 %v1481_v2, 16  ;;  %v551_v12 = vshrl.u32 %v1483_v3, 16  ;;  %v1687_v15 = vld [vmem:[%s1673_s13 + $0x28] sm:$0xff]  ;;  %v554_v18 = vshll.u32 %v1483_v3, 16  ;;  %s2191_s18 = smov (!%p1408_p9, %s390_s18), 15 }
  0x18   : > { %v546_v13 = vrot.slane %v544_v5, 7  ;;  %v532_v14 = vrot.slane %v530_v7, 7  ;;  %v558_v19 = vshrl.u32 %v1484_v4, 16  ;;  %v561_v30 = vshll.u32 %v1484_v4, 16  ;;  %s1413_s28 = sshll.u32 %s2191_s18, 1  ;;  %s1422_s9 = sshll.u32 %s414_s30, 2 }
  0x19   : > { %v539_v16 = vrot.slane %v537_v10, 7  ;;  %v553_v17 = vrot.slane %v551_v12, 7  ;;  %v565_v31 = vshrl.u32 %v1687_v15, 16  ;;  %v568_v61 = vshll.u32 %v1687_v15, 16  ;;  %v1487_v15 = vld [vmem:[%s1673_s13 + $0x38] sm:$0xff]  ;;  %s1804_s8 = sadd.s32 %s1413_s28, %s1667_s7  ;;  %p440_p11 = scmp.eq.s32.totalorder %s1566_s21, 0 }
  0x1a   : > { %v549_v20 = vor.u32 %v547_v6, %v546_v13  ;;  %v1694_v21 = vsel %vm1681_vm2, %v546_v13, 0  ;;  %v535_v22 = vor.u32 %v533_v8, %v532_v14  ;;  %v626_v23 = vsel %vm1681_vm2, %v532_v14, 0  ;;  %v1486_v6 = vld [vmem:[%s1673_s13 + $0x30] sm:$0xff]  ;;  %s1811_s10 = scalar_select %p441_p10, 1, 0 }
  0x1b   : > { %v775_v24 = vrot.slane %v1694_v21, 1  ;;  %v769_v25 = vrot.slane %v626_v23, 1  ;;  %v542_v26 = vor.u32 %v540_v11, %v539_v16  ;;  %v627_v27 = vsel %vm1681_vm2, %v539_v16, 0  ;;  %s1415_s7 = sshll.u32 %s1804_s8, 2  ;;  %s416_s13 = scalar_lea.vmem %s2168_s2, %s1422_s9 }
  0x1c   : > { %v1709_v28 = vsel %vm1681_vm2, 0, %v549_v20  ;;  %v1713_v29 = vsel %vm1681_vm2, 0, %v535_v22  ;;  %v656_v35 = vshll.u32 %v626_v23, 16  ;;  %v772_v36 = vrot.slane %v627_v27, 1  ;;  %s462_s14 = scalar_select %p440_p11, 1, 0 }
  0x1d   : > { %v774_v32 = vrot.slane %v1709_v28, 1  ;;  %v768_v33 = vrot.slane %v1713_v29, 1  ;;  %v1721_v34 = vsel %vm1681_vm2, 0, %v542_v26  ;;  %v649_v37 = vshrl.u32 %v1713_v29, 16  ;;  %s399_s18 = scalar_lea.vmem %s2167_s1, %s1415_s7  ;;  %s1586_s19 = smov 12  }
  0x1e   : > { %v651_v38 = vshll.u32 %v1713_v29, 16  ;;  %v556_v39 = vor.u32 %v554_v18, %v553_v17  ;;  %v1735_v42 = vsel %vm1681_vm2, %v553_v17, 0  ;;  %v560_v43 = vrot.slane %v558_v19, 7  ;;  %s1423_s7 = sshll.u32 %s1570_s22, 1  ;;  %p433_p13 = scmp.lt.s32.totalorder %s1566_s21, 1 }
  0x1f   : > { %v776_v40 = vsel %vm764_vm3, %v774_v32, %v775_v24  ;;  %v770_v41 = vsel %vm764_vm3, %v768_v33, %v769_v25  ;;  %v771_v44 = vrot.slane %v1721_v34, 1  ;;  %v778_v47 = vrot.slane %v1735_v42, 1  ;;  %s422_s11 = sadd.s32 %s1566_s21, %s1423_s7 }
  0x20   : > { %795 = vrot.lane.b32.xlu0 %v776_v40, %s1584_s17  ;;  %791 = vrot.lane.b32.xlu1 %v770_v41, %s1584_s17  ;;  %v653_v45 = vrot.slane %v651_v38, 1  ;;  %v1743_v46 = vsel %vm1681_vm2, 0, %v556_v39  ;;  %v658_v48 = vrot.slane %v656_v35, 1  ;;  %v563_v50 = vor.u32 %v561_v30, %v560_v43  ;;  %s1424_s12 = sshll.u32 %s422_s11, 4  ;;  %s2195_s21 = smov (!%p433_p13, %s1566_s21), 1 }
  0x21   : > { %v777_v49 = vrot.slane %v1743_v46, 1  ;;  %v1752_v51 = vsel %vm1681_vm2, %v560_v43, 0  ;;  %v661_v53 = vshrl.u32 %v1721_v34, 16  ;;  %v663_v54 = vshll.u32 %v1721_v34, 16  ;;  %p424_p12 = scmp.lt.s32.totalorder %s1424_s12, 63 }
  0x22   : > { %v654_v52 = vor.u32 %v653_v45, %v649_v37  ;;  %v668_v55 = vshll.u32 %v627_v27, 16  ;;  %v1762_v57 = vsel %vm1681_vm2, 0, %v563_v50  ;;  %v673_v58 = vshrl.u32 %v1709_v28, 16 }
  0x23   : > { %v779_v56 = vsel %vm764_vm3, %v777_v49, %v778_v47  ;;  %v675_v59 = vshll.u32 %v1709_v28, 16  ;;  %v665_v60 = vrot.slane %v663_v54, 1  ;;  %v773_v62 = vsel %vm764_vm3, %v771_v44, %v772_v36  ;;  %s2193_s12 = smov (!%p424_p12, %s1424_s12), 63 }
  0x24   : > { %797 = vrot.lane.b32.xlu2 %v779_v56, %s1584_s17  ;;  %v659_v63 = vsel %vm635_vm4, %v654_v52, %v658_v48  ;;  %v680_v1 = vshll.u32 %v1694_v21, 16  ;;  %v780_v2 = vrot.slane %v1762_v57, 1  ;;  %v781_v3 = vrot.slane %v1752_v51, 1  ;;  %s1425_s15 = sshll.u32 %s2193_s12, 2 }
  0x25   : > { %v677_v0 = vrot.slane %v675_v59, 1  ;;  %v670_v4 = vrot.slane %v668_v55, 1  ;;  %v567_v5 = vrot.slane %v565_v31, 7  ;;  %v666_v7 = vor.u32 %v665_v60, %v661_v53  ;;  %v460_v60 = vld [vmem:[%s416_s13] sm:$0xf] }
  0x26   : > { %v682_v10 = vrot.slane %v680_v1, 1  ;;  %v699_v11 = vshll.u32 %v1762_v57, 16  ;;  %v697_v12 = vshrl.u32 %v1762_v57, 16  ;;  %v704_v13 = vshll.u32 %v1752_v51, 16  ;;  %v458_v1 = vld [vmem:[%s399_s18] sm:$0xf] }
  0x27   : > { %v678_v8 = vor.u32 %v677_v0, %v673_v58  ;;  %v570_v14 = vor.u32 %v568_v61, %v567_v5  ;;  %v631_v17 = vsel %vm1681_vm2, %v567_v5, 0  ;;  %v685_v18 = vshrl.u32 %v1743_v46, 16  ;;  %v461_v61 = vld [vmem:[%s416_s13 + $0x4] sm:$0xf] }
  0x28   : > { %793 = vrot.lane.b32.xlu1 %v773_v62, %s1584_s17  ;;  %734 = vrot.lane.b32.xlu0 %v659_v63, %s1585_s20  ;;  %v687_v19 = vshll.u32 %v1743_v46, 16  ;;  %v692_v21 = vshll.u32 %v1735_v42, 16  ;;  %v572_v22 = vshrl.u32 %v1486_v6, 16  ;;  %v575_v23 = vshll.u32 %v1486_v6, 16  ;;  %v459_v6 = vld [vmem:[%s399_s18 + $0x4] sm:$0xf]  ;;  %s2007_s18 = scalar_lea.vmem %s2171_s5, %s1425_s15 }
  0x29   : > { %v683_v16 = vsel %vm635_vm4, %v678_v8, %v682_v10  ;;  %v1797_v20 = vsel %vm1681_vm2, 0, %v570_v14  ;;  %v782_v24 = vsel %vm764_vm3, %v780_v2, %v781_v3  ;;  %v671_v25 = vsel %vm635_vm4, %v666_v7, %v670_v4 }
  0x2a   : > { %v701_v26 = vrot.slane %v699_v11, 1  ;;  %v711_v27 = vshll.u32 %v1797_v20, 16  ;;  %v716_v30 = vshll.u32 %v631_v17, 16  ;;  %v689_v31 = vrot.slane %v687_v19, 1 }
  0x2b   : > { %v574_v32 = vrot.slane %v572_v22, 7  ;;  %v579_v33 = vshrl.u32 %v1487_v15, 16  ;;  %v709_v35 = vshrl.u32 %v1797_v20, 16  ;;  %v694_v37 = vrot.slane %v692_v21, 1 }
  0x2c   : > { %738 = vrot.lane.b32.xlu2 %v683_v16, %s1585_s20  ;;  %v713_v36 = vrot.slane %v711_v27, 1  ;;  %v582_v38 = vshll.u32 %v1487_v15, 16  ;;  %v706_v39 = vrot.slane %v704_v13, 1  ;;  %v690_v40 = vor.u32 %v689_v31, %v685_v18 }
  0x2d   : > { %v577_v41 = vor.u32 %v575_v23, %v574_v32  ;;  %v581_v42 = vrot.slane %v579_v33, 7  ;;  %v702_v43 = vor.u32 %v701_v26, %v697_v12  ;;  %v632_v44 = vsel %vm1681_vm2, %v574_v32, 0 }
  0x2e   : > { %v783_v45 = vrot.slane %v1797_v20, 1  ;;  %v784_v47 = vrot.slane %v631_v17, 1  ;;  %v714_v50 = vor.u32 %v713_v36, %v709_v35  ;;  %v718_v51 = vrot.slane %v716_v30, 1 }
  0x2f   : > { %v1824_v48 = vsel %vm1681_vm2, 0, %v577_v41  ;;  %v584_v49 = vor.u32 %v582_v38, %v581_v42  ;;  %v695_v52 = vsel %vm635_vm4, %v690_v40, %v694_v37  ;;  %v728_v54 = vshll.u32 %v632_v44, 16 }
  0x30   : > { %799 = vrot.lane.b32.xlu1 %v782_v24, %s1584_s17  ;;  %736 = vrot.lane.b32.xlu0 %v671_v25, %s1585_s20  ;;  %v723_v53 = vshll.u32 %v1824_v48, 16  ;;  %v707_v55 = vsel %vm635_vm4, %v702_v43, %v706_v39  ;;  %v721_v56 = vshrl.u32 %v1824_v48, 16  ;;  %v787_v58 = vrot.slane %v632_v44, 1 }
  0x31   : > { %v785_v59 = vsel %vm764_vm3, %v783_v45, %v784_v47  ;;  %v1839_v63 = vsel %vm1681_vm2, 0, %v584_v49  ;;  %v468_v0 = vstv %s1811_s10  ;;  %v463_v2 = vstv %s462_s14 }
  0x32   : > { %v725_v62 = vrot.slane %v723_v53, 1  ;;  %v719_v3 = vsel %vm635_vm4, %v714_v50, %v718_v51  ;;  %v633_v4 = vsel %vm1681_vm2, %v581_v42, 0  ;;  %v842_v5 = vshll.u32 %v1839_v63, 16 }
  0x33   : > { %vm469_vm5 = vcmp.eq.s32.totalorder %v468_v0, 1  ;;  %v730_v7 = vrot.slane %v728_v54, 1  ;;  %vm464_vm6 = vcmp.eq.s32.totalorder %v463_v2, 1  ;;  %v786_v11 = vrot.slane %v1824_v48, 1 }
  0x34   : > { %740 = vrot.lane.b32.xlu2 %v695_v52, %s1585_s20  ;;  %v470_v8 = vsel %vm469_vm5, 0, %v460_v60  ;;  %v471_v10 = vsel %vm469_vm5, 0, %v461_v61  ;;  %v847_v12 = vshll.u32 %v633_v4, 16  ;;  %v726_v15 = vor.u32 %v725_v62, %v721_v56 }
  0x35   : > { %v510_v13 = vunpack.c.l.b16 %v470_v8  ;;  %v511_v14 = vunpack.c.l.b16 %v471_v10  ;;  %v840_v16 = vshrl.u32 %v1839_v63, 16  ;;  %v465_v17 = vsel %vm464_vm6, 0, %v458_v1 }
  0x36   : > { %v466_v18 = vsel %vm464_vm6, 0, %v459_v6  ;;  %v844_v19 = vrot.slane %v842_v5, 1  ;;  %v492_v22 = vunpack.c.l.b16 %v465_v17  ;;  %v731_v27 = vsel %vm635_vm4, %v726_v15, %v730_v7 }
  0x37   : > { %v521_v21 = vpack.c.b16 %v511_v14, %v510_v13  ;;  %v493_v23 = vunpack.c.l.b16 %v466_v18  ;;  %v788_v30 = vsel %vm764_vm3, %v786_v11, %v787_v58  ;;  %v849_v31 = vrot.slane %v847_v12, 1 }
  0x38   : > { %742 = vrot.lane.b32.xlu1 %v707_v55, %s1585_s20  ;;  %744 = vrot.lane.b32.xlu0 %v719_v3, %s1585_s20  ;;  %v845_v32 = vor.u32 %v844_v19, %v840_v16  ;;  %v855_v40 = vrot.slane %v1839_v63, 1  ;;  %v856_v41 = vrot.slane %v633_v4, 1 }
  0x39   : > { %v586_v24 = vshrl.u32 %v521_v21, 16  ;;  %v589_v25 = vshll.u32 %v521_v21, 16  ;;  %v512_v26 = vpack.c.b16 %v493_v23, %v492_v22 }
  0x3a   : > { %v850_v43 = vsel %vm635_vm4, %v845_v32, %v849_v31  ;;  %v857_v52 = vsel %vm764_vm3, %v855_v40, %v856_v41  ;;  %v968_v40 = vld [vmem:[%s2169_s3 + $0x10] sm:$0x3] }
  0x3b   : > { %v588_v33 = vrot.slane %v586_v24, 7  ;;  %v523_v35 = vshrl.u32 %v512_v26, 16  ;;  %v526_v36 = vshll.u32 %v512_v26, 16  ;;  %v982_v41 = vunpack.c.l.b16 %v968_v40 }
  0x3c   : > { %801 = vrot.lane.b32.xlu2 %v785_v59, %s1584_s17 }
  0x3d   : > { %v591_v37 = vor.u32 %v589_v25, %v588_v33  ;;  %v634_v38 = vsel %vm1681_vm2, %v588_v33, 0  ;;  %v525_v39 = vrot.slane %v523_v35, 7 }
  0x3e   : > { %v872_v42 = vshll.u32 %v634_v38, 16  ;;  %v881_v58 = vrot.slane %v634_v38, 1 }
  0x3f   : > { %v1861_v44 = vsel %vm1681_vm2, 0, %v591_v37  ;;  %v528_v45 = vor.u32 %v526_v36, %v525_v39  ;;  %v625_v50 = vsel %vm1681_vm2, %v525_v39, 0 }
  0x40   : > { %746 = vrot.lane.b32.xlu0 %v731_v27, %s1585_s20  ;;  %803 = vrot.lane.b32.xlu1 %v788_v30, %s1584_s17  ;;  %v865_v47 = vshrl.u32 %v1861_v44, 16  ;;  %v867_v49 = vshll.u32 %v1861_v44, 16  ;;  %v874_v54 = vrot.slane %v872_v42, 1  ;;  %v880_v56 = vrot.slane %v1861_v44, 1 }
  0x41   : > { %v1869_v51 = vsel %vm1681_vm2, 0, %v528_v45  ;;  %v644_v60 = vshll.u32 %v625_v50, 16  ;;  %v766_v4 = vrot.slane %v625_v50, 1  ;;  %v985_v42 = vpack.c.b16 %v982_v41, %v982_v41  ;;  %v1489_v45 = vld [vmem:[%s2169_s3 + $0x8] sm:$0xff] }
  0x42   : > { %v869_v53 = vrot.slane %v867_v49, 1  ;;  %v639_v55 = vshll.u32 %v1869_v51, 16  ;;  %v637_v59 = vshrl.u32 %v1869_v51, 16  ;;  %v882_v0 = vsel %vm764_vm3, %v880_v56, %v881_v58 }
  0x43   : > { %v646_v2 = vrot.slane %v644_v60, 1  ;;  %v765_v3 = vrot.slane %v1869_v51, 1 }
  0x44   : > { %851 = vrot.lane.b32.xlu2 %v850_v43, %s1585_s20  ;;  %v870_v61 = vor.u32 %v869_v53, %v865_v47  ;;  %v641_v62 = vrot.slane %v639_v55, 1  ;;  %v1007_v43 = vsel %vm1005_vm9, %v985_v42, 0 }
  0x45   : > { %v767_v6 = vsel %vm764_vm3, %v765_v3, %v766_v4  ;;  %1490 = vmatpush.bf16.msra.mxu1 %v1007_v43  ;;  %1014 = vmatpush.bf16.msra.mxu0 %v1007_v43 }
  0x46   : > { %v875_v9 = vsel %vm635_vm4, %v870_v61, %v874_v54  ;;  %v642_v1 = vor.u32 %v641_v62, %v637_v59  ;;  %1491 = vmatpush.bf16.msra.mxu2 %v1007_v43  ;;  %1492 = vmatpush.bf16.msra.mxu3 %v1007_v43 }
  0x48   : > { %858 = vrot.lane.b32.xlu0 %v857_v52, %s1584_s17  ;;  %876 = vrot.lane.b32.xlu1 %v875_v9, %s1585_s20  ;;  %v647_v5 = vsel %vm635_vm4, %v642_v1, %v646_v2 }
  0x49   : > { %1493 = vmatpush.bf16.msra.mxu1 %v1489_v45  ;;  %1015 = vmatpush.bf16.msra.mxu0 %v1489_v45 }
  0x4a   : > { %1494 = vmatpush.bf16.msra.mxu2 %v1489_v45  ;;  %1495 = vmatpush.bf16.msra.mxu3 %v1489_v45 }
  0x4c   : > { %883 = vrot.lane.b32.xlu2 %v882_v0, %s1584_s17 }
  0x50   : > { %732 = vrot.lane.b32.xlu0 %v647_v5, %s1585_s20  ;;  %789 = vrot.lane.b32.xlu1 %v767_v6, %s1584_s17  ;;  %s1587_s17 = smov 24  }
  0x7e   : > { %v798_v7 = vpop.permute.xlu2 %797 }
  0x86   : > { %v739_v8 = vpop.permute.xlu2 %738 }
  0x87   : > { %v813_v10 = vsel %vm805_vm7, %v1709_v28, %v739_v8 }
  0x8e   : > { %v741_v28 = vpop.permute.xlu2 %740 }
  0x8f   : > { %v815_v18 = vsel %vm805_vm7, %v1743_v46, %v741_v28 }
  0x90   : > { %v1905_v23 = vsel %vm822_vm8, %v815_v18, %v798_v7 }
  0x92   : > { %v796_v11 = vpop.permute.xlu0 %795  ;;  %v792_v12 = vpop.permute.xlu1 %791 }
  0x93   : > { %v1889_v13 = vsel %vm822_vm8, %v813_v10, %v796_v11 }
  0x94   : > { %901 = vrot.lane.b32.xlu1 %v1889_v13, %s1586_s19 }
  0x96   : > { %v802_v24 = vpop.permute.xlu2 %801 }
  0x9a   : > { %v794_v14 = vpop.permute.xlu1 %793  ;;  %v735_v15 = vpop.permute.xlu0 %734 }
  0x9b   : > { %v809_v16 = vsel %vm805_vm7, %v1713_v29, %v735_v15 }
  0x9c   : > { %v1896_v17 = vsel %vm822_vm8, %v809_v16, %v792_v12 }
  0x9d   : > { %897 = vrot.lane.b32.xlu2 %v1896_v17, %s1586_s19 }
  0x9e   : > { %v852_v33 = vpop.permute.xlu2 %851 }
  0x9f   : > { %v861_v35 = vsel %vm805_vm7, %v1839_v63, %v852_v33 }
  0xa2   : > { %v800_v19 = vpop.permute.xlu1 %799  ;;  %v737_v21 = vpop.permute.xlu0 %736 }
  0xa3   : > { %v811_v22 = vsel %vm805_vm7, %v1721_v34, %v737_v21 }
  0xa4   : > { %v828_v29 = vsel %vm822_vm8, %v811_v22, %v794_v14 }
  0xa5   : > { %918 = vrot.lane.b32.xlu2 %v1905_v23, %s1587_s17  ;;  %914 = vrot.lane.b32.xlu0 %v828_v29, %s1587_s17 }
  0xa6   : > { %v884_v38 = vpop.permute.xlu2 %883 }
  0xaa   : > { %v743_v25 = vpop.permute.xlu1 %742  ;;  %v745_v26 = vpop.permute.xlu0 %744 }
  0xab   : > { %v817_v46 = vsel %vm805_vm7, %v1762_v57, %v743_v25  ;;  %v819_v34 = vsel %vm805_vm7, %v1797_v20, %v745_v26 }
  0xac   : > { %v1916_v27 = vsel %vm822_vm8, %v817_v46, %v800_v19  ;;  %v1919_v30 = vsel %vm822_vm8, %v819_v34, %v802_v24 }
  0xad   : > { %899 = vrot.lane.b32.xlu2 %v828_v29, %s1586_s19  ;;  %905 = vrot.lane.b32.xlu0 %v1916_v27, %s1586_s19 }
  0xae   : > { %922 = vrot.lane.b32.xlu1 %v1919_v30, %s1587_s17 }
  0xb2   : > { %v747_v31 = vpop.permute.xlu0 %746  ;;  %v804_v32 = vpop.permute.xlu1 %803 }
  0xb3   : > { %v821_v57 = vsel %vm805_vm7, %v1824_v48, %v747_v31 }
  0xb4   : > { %v1929_v20 = vsel %vm822_vm8, %v821_v57, %v804_v32 }
  0xb5   : > { %916 = vrot.lane.b32.xlu0 %v1889_v13, %s1587_s17 }
  0xb6   : > { %909 = vrot.lane.b32.xlu1 %v1929_v20, %s1586_s19 }
  0xba   : > { %v859_v36 = vpop.permute.xlu0 %858  ;;  %v877_v48 = vpop.permute.xlu1 %876 }
  0xbb   : > { %v863_v37 = vsel %vm822_vm8, %v861_v35, %v859_v36  ;;  %v886_v63 = vsel %vm805_vm7, %v1861_v44, %v877_v48  ;;  %v1488_v44 = vld [vmem:[%s2169_s3] sm:$0xff] }
  0xbc   : > { %926 = vrot.lane.b32.xlu2 %v863_v37, %s1587_s17  ;;  %v888_v39 = vsel %vm822_vm8, %v886_v63, %v884_v38  ;;  %1496 = vmatpush.bf16.msra.mxu1 %v1488_v44 }
  0xbd   : > { %903 = vrot.lane.b32.xlu0 %v1905_v23, %s1586_s19  ;;  %1016 = vmatpush.bf16.msra.mxu0 %v1488_v44 }
  0xbe   : > { %920 = vrot.lane.b32.xlu1 %v1916_v27, %s1587_s17  ;;  %1497 = vmatpush.bf16.msra.mxu2 %v1488_v44 }
  0xbf   : > { %1498 = vmatpush.bf16.msra.mxu3 %v1488_v44 }
  0xc2   : > { %v790_v49 = vpop.permute.xlu1 %789  ;;  %v733_v55 = vpop.permute.xlu0 %732 }
  0xc3   : > { %v807_v56 = vsel %vm805_vm7, %v1869_v51, %v733_v55 }
  0xc4   : > { %907 = vrot.lane.b32.xlu2 %v1919_v30, %s1586_s19  ;;  %v824_v58 = vsel %vm822_vm8, %v807_v56, %v790_v49 }
  0xc5   : > { %924 = vrot.lane.b32.xlu0 %v1929_v20, %s1587_s17 }
  0xc6   : > { %911 = vrot.lane.b32.xlu1 %v863_v37, %s1586_s19  ;;  %s1426_s19 = sshll.u32 %s1663_s29, 1 }
  0xcc   : > { %928 = vrot.lane.b32.xlu2 %v888_v39, %s1587_s17  ;;  %s436_s17 = sadd.s32 %s1426_s19, %s2195_s21 }
  0xcd   : > { %s1427_s20 = sshll.u32 %s436_s17, 1 }
  0xce   : > { %s438_s8 = scalar_lea.vmem %s2172_s6, %s1427_s20 }
  0xf7   : > { %v898_v47 = vpop.permute.xlu2 %897 }
  0xf8   : > { %v932_v59 = vsel %vm930_vm11, %v824_v58, %v898_v47 }
  0xff   : > { %v919_v52 = vpop.permute.xlu2 %918 }
 0x106   : > { %v902_v50 = vpop.permute.xlu1 %901 }
 0x107   : > { %v936_v53 = vsel %vm930_vm11, %v828_v29, %v902_v50  ;;  %v900_v62 = vpop.permute.xlu2 %899 }
 0x108   : > { %v953_v54 = vsel %vm947_vm10, %v936_v53, %v919_v52  ;;  %v934_v3 = vsel %vm930_vm11, %v1896_v17, %v900_v62 }
 0x109   : > { %1470 = vmatmul.msk.bf16.vlgmr.msra.gmra.mxu1 %vm988_vm12, %v953_v54 }
 0x116   : > { %v927_v51 = vpop.permute.xlu2 %926 }
 0x117   : > { %v915_v60 = vpop.permute.xlu0 %914 }
 0x118   : > { %v949_v61 = vsel %vm947_vm10, %v932_v59, %v915_v60 }
 0x119   : > { %1468 = vmatmul.msk.bf16.vlgmr.msra.gmra.mxu0 %vm988_vm12, %v949_v61 }
 0x11e   : > { %v908_v10 = vpop.permute.xlu2 %907 }
 0x11f   : > { %v906_v9 = vpop.permute.xlu0 %905  ;;  %v942_v16 = vsel %vm930_vm11, %v1916_v27, %v908_v10 }
 0x120   : > { %v923_v0 = vpop.permute.xlu1 %922  ;;  %v940_v1 = vsel %vm930_vm11, %v1905_v23, %v906_v9 }
 0x121   : > { %v957_v2 = vsel %vm947_vm10, %v940_v1, %v923_v0 }
 0x122   : > { %1472 = vmatmul.msk.bf16.vlgmr.msra.gmra.mxu2 %vm988_vm12, %v957_v2 }
 0x126   : > { %v929_v28 = vpop.permute.xlu2 %928 }
 0x127   : > { %v917_v4 = vpop.permute.xlu0 %916 }
 0x128   : > { %v910_v5 = vpop.permute.xlu1 %909  ;;  %v951_v6 = vsel %vm947_vm10, %v934_v3, %v917_v4 }
 0x129   : > { %v944_v7 = vsel %vm930_vm11, %v1919_v30, %v910_v5  ;;  %1469 = vmatmul.msk.bf16.gmra.mxu0 %vm988_vm12, %v951_v6 }
 0x12a   : > { %v961_v8 = vsel %vm947_vm10, %v944_v7, %v927_v51 }
 0x12b   : > { %1474 = vmatmul.msk.bf16.vlgmr.msra.gmra.mxu3 %vm988_vm12, %v961_v8 }
 0x12f   : > { %v904_v11 = vpop.permute.xlu0 %903 }
 0x130   : > { %v921_v12 = vpop.permute.xlu1 %920  ;;  %v938_v14 = vsel %vm930_vm11, %v1889_v13, %v904_v11  ;;  %v1999_v13 = vld [vmem:[%s2170_s4] ss:$0 sm:$0xff] }
 0x131   : > { %v955_v15 = vsel %vm947_vm10, %v938_v14, %v921_v12 }
 0x132   : > { %1471 = vmatmul.msk.bf16.gmra.mxu1 %vm988_vm12, %v955_v15 }
 0x137   : > { %v925_v17 = vpop.permute.xlu0 %924 }
 0x138   : > { %v912_v18 = vpop.permute.xlu1 %911  ;;  %v959_v19 = vsel %vm947_vm10, %v942_v16, %v925_v17 }
 0x139   : > { %v946_v21 = vsel %vm930_vm11, %v1929_v20, %v912_v18  ;;  %1473 = vmatmul.msk.bf16.gmra.mxu2 %vm988_vm12, %v959_v19 }
 0x13a   : > { %v963_v22 = vsel %vm947_vm10, %v946_v21, %v929_v28 }
 0x13b   : > { %1475 = vmatmul.msk.bf16.gmra.mxu3 %vm988_vm12, %v963_v22 }
 0x186   : > { %v1028_v23 = vpop.f32.mrf.mxu1 }
 0x187   : > { %v1029_v29 = vadd.f32 %v1999_v13, %v1028_v23 }
 0x189   : > { %1062 = vst.msk [vmem:[#allocation2 + $0x20] sm:$0xff] %vm822_vm8, %v1029_v29 }
 0x18e   : > { %v1030_v24 = vpop.f32.mrf.mxu1 }
 0x18f   : > { %v1031_v25 = vadd.f32 %v1999_v13, %v1030_v24 }
 0x190   : > { %v2009_v26 = vld [vmem:[#allocation2 + $0x20] sm:$0xff] }
 0x191   : > { %v1188_v46 = vpack.c.bf16 %v2009_v26, %v2009_v26  ;;  %1063 = vst.msk [vmem:[#allocation2 + $0x28] sm:$0xff] %vm822_vm8, %v1031_v25  ;;  %v1131_v12 = vmul.f32 %v2009_v26, %v2009_v26  ;;  %v1097_v22 = vsel %vm822_vm8, %v2009_v26, 0.0 }
 0x193   : > { %1205 = vst.msk [vmem:[%s2007_s18 + $0x10] sm:$0xf] %vm1200_vm13, %v1188_v46 }
 0x196   : > { %v1018_v34 = vpop.f32.mrf.mxu0 }
 0x197   : > { %v1019_v27 = vadd.f32 %v1999_v13, %v1018_v34 }
 0x198   : > { %v2017_v30 = vld [vmem:[#allocation2 + $0x28] sm:$0xff] }
 0x199   : > { %v1189_v31 = vpack.c.bf16 %v2017_v30, %v2017_v30  ;;  %1058 = vst.msk [vmem:[#allocation2] sm:$0xff] %vm822_vm8, %v1019_v27  ;;  %v1132_v23 = vmul.f32 %v2017_v30, %v2017_v30  ;;  %v1099_v26 = vsel %vm822_vm8, %v2017_v30, 0.0 }
 0x19b   : > { %1206 = vst.msk [vmem:[%s2007_s18 + $0x14] sm:$0xf] %vm1200_vm13, %v1189_v31  ;;  %v1150_v31 = vsel %vm822_vm8, %v1131_v12, 0.0 }
 0x19e   : > { %v1020_v32 = vpop.f32.mrf.mxu0 }
 0x19f   : > { %v1021_v57 = vadd.f32 %v1999_v13, %v1020_v32 }
 0x1a0   : > { %v1074_v20 = vld [vmem:[#allocation2] sm:$0xff] }
 0x1a1   : > { %v1184_v33 = vpack.c.bf16 %v1074_v20, %v1074_v20  ;;  %1059 = vst.msk [vmem:[#allocation2 + $0x8] sm:$0xff] %vm822_vm8, %v1021_v57  ;;  %v1127_v55 = vmul.f32 %v1074_v20, %v1074_v20  ;;  %v1090_v60 = vsel %vm822_vm8, %v1074_v20, 0.0 }
 0x1a3   : > { %1201 = vst.msk [vmem:[%s2007_s18] sm:$0xf] %vm1200_vm13, %v1184_v33  ;;  %v1143_v6 = vsel %vm822_vm8, %v1127_v55, 0.0 }
 0x1a5   : > { %v1038_v35 = vpop.f32.mrf.mxu2 }
 0x1a6   : > { %v1039_v36 = vadd.f32 %v1999_v13, %v1038_v35  ;;  %v1023_v37 = vpop.f32.mrf.mxu0  ;;  %v1152_v35 = vsel %vm822_vm8, %v1132_v23, 0.0 }
 0x1a7   : > { %v1024_v48 = vadd.f32 %v1999_v13, %v1023_v37 }
 0x1a8   : > { %v1075_v63 = vld [vmem:[#allocation2 + $0x8] sm:$0xff]  ;;  %1066 = vst.msk [vmem:[#allocation2 + $0x40] sm:$0xff] %vm822_vm8, %v1039_v36 }
 0x1a9   : > { %v1185_v38 = vpack.c.bf16 %v1075_v63, %v1075_v63  ;;  %1060 = vst.msk [vmem:[#allocation2 + $0x10] sm:$0xff] %vm822_vm8, %v1024_v48  ;;  %v1128_v54 = vmul.f32 %v1075_v63, %v1075_v63  ;;  %v1091_v56 = vsel %vm822_vm8, %v1075_v63, 0.0 }
 0x1aa   : > { %v1092_v4 = vadd.f32 %v1091_v56, %v1090_v60 }
 0x1ab   : > { %1202 = vst.msk [vmem:[%s2007_s18 + $0x4] sm:$0xf] %vm1200_vm13, %v1185_v38  ;;  %v1144_v0 = vsel %vm822_vm8, %v1128_v54, 0.0 }
 0x1ac   : > { %v1145_v8 = vadd.f32 %v1144_v0, %v1143_v6 }
 0x1ad   : > { %v1040_v39 = vpop.f32.mrf.mxu2 }
 0x1ae   : > { %v1041_v40 = vadd.f32 %v1999_v13, %v1040_v39  ;;  %v1048_v41 = vpop.f32.mrf.mxu3  ;;  %v1025_v42 = vpop.f32.mrf.mxu0 }
 0x1af   : > { %v2035_v43 = vld [vmem:[#allocation2 + $0x40] sm:$0xff]  ;;  %v1049_v45 = vadd.f32 %v1999_v13, %v1048_v41  ;;  %v1033_v44 = vpop.f32.mrf.mxu1  ;;  %v1026_v50 = vadd.f32 %v1999_v13, %v1025_v42 }
 0x1b0   : > { %v1192_v47 = vpack.c.bf16 %v2035_v43, %v2035_v43  ;;  %v1076_v49 = vld [vmem:[#allocation2 + $0x10] sm:$0xff]  ;;  %1067 = vst.msk [vmem:[#allocation2 + $0x48] sm:$0xff] %vm822_vm8, %v1041_v40  ;;  %v1034_v53 = vadd.f32 %v1999_v13, %v1033_v44  ;;  %v1135_v30 = vmul.f32 %v2035_v43, %v2035_v43 }
 0x1b1   : > { %v1186_v52 = vpack.c.bf16 %v1076_v49, %v1076_v49  ;;  %1070 = vst.msk [vmem:[#allocation2 + $0x60] sm:$0xff] %vm822_vm8, %v1049_v45  ;;  %v1129_v58 = vmul.f32 %v1076_v49, %v1076_v49  ;;  %v1093_v1 = vsel %vm822_vm8, %v1076_v49, 0.0 }
 0x1b2   : > { %1209 = vst.msk [vmem:[%s2007_s18 + $0x20] sm:$0xf] %vm1200_vm13, %v1192_v47  ;;  %v1094_v10 = vadd.f32 %v1093_v1, %v1092_v4  ;;  %v1158_v60 = vsel %vm822_vm8, %v1135_v30, 0.0 }
 0x1b3   : > { %1203 = vst.msk [vmem:[%s2007_s18 + $0x8] sm:$0xf] %vm1200_vm13, %v1186_v52  ;;  %v1146_v7 = vsel %vm822_vm8, %v1129_v58, 0.0 }
 0x1b4   : > { %1061 = vst.msk [vmem:[#allocation2 + $0x18] sm:$0xff] %vm822_vm8, %v1026_v50  ;;  %v1147_v18 = vadd.f32 %v1146_v7, %v1145_v8  ;;  %v1105_v50 = vsel %vm822_vm8, %v2035_v43, 0.0 }
 0x1b5   : > { %1064 = vst.msk [vmem:[#allocation2 + $0x30] sm:$0xff] %vm822_vm8, %v1034_v53 }
 0x1b6   : > { %v1050_v59 = vpop.f32.mrf.mxu3 }
 0x1b7   : > { %v2052_v61 = vld [vmem:[#allocation2 + $0x48] sm:$0xff]  ;;  %v1051_v62 = vadd.f32 %v1999_v13, %v1050_v59  ;;  %v1035_v9 = vpop.f32.mrf.mxu1 }
 0x1b8   : > { %v1193_v2 = vpack.c.bf16 %v2052_v61, %v2052_v61  ;;  %v2059_v51 = vld [vmem:[#allocation2 + $0x60] sm:$0xff]  ;;  %v1036_v3 = vadd.f32 %v1999_v13, %v1035_v9  ;;  %v1136_v54 = vmul.f32 %v2052_v61, %v2052_v61  ;;  %v1107_v9 = vsel %vm822_vm8, %v2052_v61, 0.0 }
 0x1b9   : > { %v1196_v5 = vpack.c.bf16 %v2059_v51, %v2059_v51  ;;  %1071 = vst.msk [vmem:[#allocation2 + $0x68] sm:$0xff] %vm822_vm8, %v1051_v62  ;;  %v1139_v8 = vmul.f32 %v2059_v51, %v2059_v51 }
 0x1ba   : > { %1210 = vst.msk [vmem:[%s2007_s18 + $0x24] sm:$0xf] %vm1200_vm13, %v1193_v2  ;;  %v1160_v4 = vsel %vm822_vm8, %v1136_v54, 0.0 }
 0x1bb   : > { %1213 = vst.msk [vmem:[%s2007_s18 + $0x30] sm:$0xf] %vm1200_vm13, %v1196_v5  ;;  %v1077_v11 = vld [vmem:[#allocation2 + $0x18] sm:$0xff]  ;;  %v1166_v23 = vsel %vm822_vm8, %v1139_v8, 0.0 }
 0x1bc   : > { %v1095_v14 = vsel %vm822_vm8, %v1077_v11, 0.0  ;;  %v1130_v15 = vmul.f32 %v1077_v11, %v1077_v11  ;;  %v1187_v16 = vpack.c.bf16 %v1077_v11, %v1077_v11  ;;  %v1080_v17 = vld [vmem:[#allocation2 + $0x30] sm:$0xff]  ;;  %1065 = vst.msk [vmem:[#allocation2 + $0x38] sm:$0xff] %vm822_vm8, %v1036_v3  ;;  %v1043_v28 = vpop.f32.mrf.mxu2 }
 0x1bd   : > { %v1096_v19 = vadd.f32 %v1095_v14, %v1094_v10  ;;  %v1190_v21 = vpack.c.bf16 %v1080_v17, %v1080_v17  ;;  %v1044_v24 = vadd.f32 %v1999_v13, %v1043_v28  ;;  %v1133_v32 = vmul.f32 %v1080_v17, %v1080_v17 }
 0x1be   : > { %v1148_v29 = vsel %vm822_vm8, %v1130_v15, 0.0  ;;  %1204 = vst.msk [vmem:[%s2007_s18 + $0xc] sm:$0xf] %vm1200_vm13, %v1187_v16  ;;  %v1053_v25 = vpop.f32.mrf.mxu3  ;;  %v1101_v36 = vsel %vm822_vm8, %v1080_v17, 0.0  ;;  %v1113_v17 = vsel %vm822_vm8, %v2059_v51, 0.0 }
 0x1bf   : > { %v1098_v46 = vadd.f32 %v1097_v22, %v1096_v19  ;;  %v1149_v34 = vadd.f32 %v1148_v29, %v1147_v18  ;;  %1207 = vst.msk [vmem:[%s2007_s18 + $0x18] sm:$0xf] %vm1200_vm13, %v1190_v21  ;;  %v1054_v27 = vadd.f32 %v1999_v13, %v1053_v25  ;;  %v1154_v39 = vsel %vm822_vm8, %v1133_v32, 0.0 }
 0x1c0   : > { %v2089_v57 = vld [vmem:[#allocation2 + $0x68] sm:$0xff]  ;;  %1068 = vst.msk [vmem:[#allocation2 + $0x50] sm:$0xff] %vm822_vm8, %v1044_v24 }
 0x1c1   : > { %v1151_v20 = vadd.f32 %v1150_v31, %v1149_v34  ;;  %v1100_v33 = vadd.f32 %v1099_v26, %v1098_v46  ;;  %1072 = vst.msk [vmem:[#allocation2 + $0x70] sm:$0xff] %vm822_vm8, %v1054_v27  ;;  %v1197_v37 = vpack.c.bf16 %v2089_v57, %v2089_v57  ;;  %v1140_v28 = vmul.f32 %v2089_v57, %v2089_v57 }
 0x1c2   : > { %v1115_v29 = vsel %vm822_vm8, %v2089_v57, 0.0 }
 0x1c3   : > { %v1102_v48 = vadd.f32 %v1101_v36, %v1100_v33  ;;  %v1153_v63 = vadd.f32 %v1152_v35, %v1151_v20  ;;  %v1081_v38 = vld [vmem:[#allocation2 + $0x38] sm:$0xff]  ;;  %1214 = vst.msk [vmem:[%s2007_s18 + $0x34] sm:$0xf] %vm1200_vm13, %v1197_v37  ;;  %v1168_v46 = vsel %vm822_vm8, %v1140_v28, 0.0 }
 0x1c4   : > { %v1103_v40 = vsel %vm822_vm8, %v1081_v38, 0.0  ;;  %v1134_v41 = vmul.f32 %v1081_v38, %v1081_v38  ;;  %v1191_v42 = vpack.c.bf16 %v1081_v38, %v1081_v38  ;;  %v1045_v45 = vpop.f32.mrf.mxu2 }
 0x1c5   : > { %v1155_v44 = vadd.f32 %v1154_v39, %v1153_v63  ;;  %v1104_v47 = vadd.f32 %v1103_v40, %v1102_v48  ;;  %v1046_v49 = vadd.f32 %v1999_v13, %v1045_v45 }
 0x1c6   : > { %v1156_v52 = vsel %vm822_vm8, %v1134_v41, 0.0  ;;  %1208 = vst.msk [vmem:[%s2007_s18 + $0x1c] sm:$0xf] %vm1200_vm13, %v1191_v42  ;;  %v1055_v53 = vpop.f32.mrf.mxu3 }
 0x1c7   : > { %v1106_v55 = vadd.f32 %v1105_v50, %v1104_v47  ;;  %v1157_v56 = vadd.f32 %v1156_v52, %v1155_v44  ;;  %v1084_v58 = vld [vmem:[#allocation2 + $0x50] sm:$0xff]  ;;  %1069 = vst.msk [vmem:[#allocation2 + $0x58] sm:$0xff] %vm822_vm8, %v1046_v49  ;;  %v1056_v59 = vadd.f32 %v1999_v13, %v1055_v53 }
 0x1c8   : > { %v1194_v43 = vpack.c.bf16 %v1084_v58, %v1084_v58  ;;  %v1088_v62 = vld [vmem:[#allocation2 + $0x70] sm:$0xff]  ;;  %v1137_v1 = vmul.f32 %v1084_v58, %v1084_v58  ;;  %v1109_v5 = vsel %vm822_vm8, %v1084_v58, 0.0 }
 0x1c9   : > { %v1159_v0 = vadd.f32 %v1158_v60, %v1157_v56  ;;  %1073 = vst.msk [vmem:[#allocation2 + $0x78] sm:$0xff] %vm822_vm8, %v1056_v59  ;;  %v1108_v2 = vadd.f32 %v1107_v9, %v1106_v55  ;;  %v1198_v3 = vpack.c.bf16 %v1088_v62, %v1088_v62  ;;  %v1141_v24 = vmul.f32 %v1088_v62, %v1088_v62 }
 0x1ca   : > { %1211 = vst.msk [vmem:[%s2007_s18 + $0x28] sm:$0xf] %vm1200_vm13, %v1194_v43  ;;  %v1162_v6 = vsel %vm822_vm8, %v1137_v1, 0.0  ;;  %v1117_v34 = vsel %vm822_vm8, %v1088_v62, 0.0 }
 0x1cb   : > { %v1161_v13 = vadd.f32 %v1160_v4, %v1159_v0  ;;  %1215 = vst.msk [vmem:[%s2007_s18 + $0x38] sm:$0xf] %vm1200_vm13, %v1198_v3  ;;  %v1110_v7 = vadd.f32 %v1109_v5, %v1108_v2  ;;  %v1170_v32 = vsel %vm822_vm8, %v1141_v24, 0.0 }
 0x1cd   : > { %v1163_v14 = vadd.f32 %v1162_v6, %v1161_v13 }
 0x1ce   : > { %v1085_v61 = vld [vmem:[#allocation2 + $0x58] sm:$0xff] }
 0x1cf   : > { %v1111_v10 = vsel %vm822_vm8, %v1085_v61, 0.0  ;;  %v1138_v11 = vmul.f32 %v1085_v61, %v1085_v61  ;;  %v1195_v12 = vpack.c.bf16 %v1085_v61, %v1085_v61 }
 0x1d0   : > { %v1112_v15 = vadd.f32 %v1111_v10, %v1110_v7  ;;  %v1089_v16 = vld [vmem:[#allocation2 + $0x78] sm:$0xff] }
 0x1d1   : > { %v1164_v18 = vsel %vm822_vm8, %v1138_v11, 0.0  ;;  %1212 = vst.msk [vmem:[%s2007_s18 + $0x2c] sm:$0xf] %vm1200_vm13, %v1195_v12  ;;  %v1199_v19 = vpack.c.bf16 %v1089_v16, %v1089_v16  ;;  %v1142_v27 = vmul.f32 %v1089_v16, %v1089_v16  ;;  %v1119_v20 = vsel %vm822_vm8, %v1089_v16, 0.0 }
 0x1d2   : > { %v1114_v21 = vadd.f32 %v1113_v17, %v1112_v15  ;;  %v1165_v22 = vadd.f32 %v1164_v18, %v1163_v14 }
 0x1d3   : > { %1216 = vst.msk [vmem:[%s2007_s18 + $0x3c] sm:$0xf] %vm1200_vm13, %v1199_v19  ;;  %v1172_v35 = vsel %vm822_vm8, %v1142_v27, 0.0 }
 0x1d4   : > { %v1167_v51 = vadd.f32 %v1166_v23, %v1165_v22  ;;  %v1116_v25 = vadd.f32 %v1115_v29, %v1114_v21 }
 0x1d6   : > { %v1118_v31 = vadd.f32 %v1117_v34, %v1116_v25  ;;  %v1169_v26 = vadd.f32 %v1168_v46, %v1167_v51 }
 0x1d8   : > { %v1120_v57 = vadd.f32 %v1119_v20, %v1118_v31  ;;  %v1171_v33 = vadd.f32 %v1170_v32, %v1169_v26 }
 0x1da   : > { %v1121_v36 = vrot.slane %v1120_v57, 4  ;;  %v1173_v37 = vadd.f32 %v1172_v35, %v1171_v33 }
 0x1dc   : > { %v1122_v30 = vadd.f32 %v1121_v36, %v1120_v57  ;;  %v1174_v48 = vrot.slane %v1173_v37, 4 }
 0x1de   : > { %v1123_v63 = vrot.slane %v1122_v30, 2  ;;  %v1175_v38 = vadd.f32 %v1174_v48, %v1173_v37 }
 0x1e0   : > { %v1124_v39 = vadd.f32 %v1123_v63, %v1122_v30  ;;  %v1176_v40 = vrot.slane %v1175_v38, 2 }
 0x1e2   : > { %v1125_v41 = vrot.slane %v1124_v39, 1  ;;  %v1177_v42 = vadd.f32 %v1176_v40, %v1175_v38 }
 0x1e4   : > { %v1178_v45 = vrot.slane %v1177_v42, 1  ;;  %v1126_v44 = vadd.f32 %v1125_v41, %v1124_v39 }
 0x1e6   : > { %v1179_v47 = vadd.f32 %v1178_v45, %v1177_v42 }
 0x1e8   : > { %v1181_v49 = vsel %vm612_vm0, %v1126_v44, %v1179_v47 }
 0x1e9   : > { %1183 = vst.msk [vmem:[%s438_s8] sm:$0x3] %vm1182_vm14, %v1181_v49 }
 0x1ea PF: > { %s17_s25 = sadd.s32 1, %s1582_s25   ;;  %s2176_s21 = smov %s1574_s23 }
 0x1eb   : > { %p14_p0 = scmp.ge.s32.totalorder %s17_s25, 6   ;;  %s2177_s22 = smov %s1578_s24 }
 0x1ec   : > { %s2178_s23 = smov %s2181_s26  ;;  %s2179_s24 = smov %s2185_s27 }
 0x1ed   :  { %16 = sbr.rel (!%p14_p0) target bundleno = 3 (0x3), region = 88 }

// kernel: down_conv_forward.5
= control target key start
LH: loop header
LB: loop body
LE: loop exit
PB: predicated region body
PF: predicated region fallthrough
CT: control target
= control target key end

     0   :  { %s1969_s30 = smov 0   ;;  %s1971_s10 = smov 0   ;;  %s2616_s0 = inlined_call_operand.vmem [shape: bf16[2,16,16,8], index: 0, kind: input, shape index: {}, may-alias: {0,1,2}]   ;;  %s2617_s1 = inlined_call_operand.vmem [shape: bf16[2,16,16,8], index: 1, kind: input, shape index: {}, may-alias: {0,1,2}]   ;;  %s2618_s2 = inlined_call_operand.vmem [shape: bf16[2,16,16,8], index: 2, kind: input, shape index: {}, may-alias: {0,1,2}]   ;;  %s2619_s3 = inlined_call_operand.vmem [shape: f32[1,8], index: 3, kind: input, shape index: {}]   ;;  %s2620_s4 = inlined_call_operand.vmem [shape: f32[1,8], index: 4, kind: input, shape index: {}]   ;;  %s2621_s5 = inlined_call_operand.vmem [shape: bf16[72,8], index: 5, kind: input, shape index: {}]   ;;  %s2622_s6 = inlined_call_operand.vmem [shape: f32[1,8], index: 6, kind: input, shape index: {}]   ;;  %s2623_s7 = inlined_call_operand.vmem [shape: bf16[512,8], index: 7, kind: output, shape index: {0}]   ;;  %s2624_s8 = inlined_call_operand.vmem [shape: bf16[2,16,16,8], index: 8, kind: output, shape index: {1}]   ;;  %s2625_s9 = inlined_call_operand.vmem [shape: f32[2,2,2,8], index: 9, kind: output, shape index: {2}]  }
   0x1   :  { %s1973_s11 = smov 0   ;;  %s1975_s12 = smov 0  }
   0x2   :  { %s1977_s13 = smov 0  }
   0x3 LB: > { %s29_s14 = sadd.s32 1, %s1905_s11  ;;  %s32_s15 = sadd.s32 1, %s1909_s12  ;;  %s1913_s13 = sphi %s1977_s13, %s20_s13   ;;  %s1909_s12 = sphi %s1975_s12, %s2634_s12   ;;  %s1905_s11 = sphi %s1973_s11, %s2633_s11   ;;  %s1901_s10 = sphi %s1971_s10, %s2632_s10   ;;  %s1897_s30 = sphi %s1969_s30, %s2631_s30  }
   0x4   : > { %p30_p0 = scmp.ge.s32.totalorder %s29_s14, 2  ;;  %p1703_p1 = scmp.ge.s32.totalorder %s1913_s13, 1 }
   0x5   : > { %p384_p2 = scmp.lt.s32.totalorder %s1913_s13, 5 }
   0x6   : > { %s2636_s14 = smov (%p30_p0, %s29_s14), 0  ;;  %s2638_s15 = smov (!%p30_p0, %s32_s15), %s1909_s12 }
   0x7   : > { %p385_p3 = pnand %p1703_p1, %p384_p2  ;;  %p34_p4 = scmp.ge.s32.totalorder %s2638_s15, 2 }
   0x8   : > { %s2004_s16 = sshll.u32 (!%p385_p3), %s1897_s30, 3  ;;  %p472_p5 = scmp.lt.s32.totalorder (!%p385_p3), %s1901_s10, 1 }
   0x9   : > { %s2640_s15 = smov (%p34_p4, %s2638_s15), 0  ;;  %388 = sbr.rel (%p385_p3) target bundleno = 510 (0x1fe), region = 48 }
   0xa   : > { %p474_p6 = scmp.lt.s32.totalorder (!%p385_p3), %s2004_s16, 15  ;;  %s1915_s24 = smov (!%p385_p3), 16  }
   0xb   : > { %s2139_s26 = sadd.s32 (!%p385_p3), 4294967295, %s2004_s16  ;;  %p547_p9 = scmp.eq.s32.totalorder (!%p385_p3), %s1897_s30, 1 }
   0xc   : > { %p484_p8 = scmp.gt.s32.totalorder (!%p385_p3), %s2139_s26, 0  ;;  %s1916_s28 = smov (!%p385_p3), 8  }
   0xd   : > { %p1710_p10 = scmp.lt.s32.totalorder (!%p385_p3), %s2139_s26, 15  ;;  %p546_p11 = scmp.eq.s32.totalorder (!%p385_p3), %s1897_s30, 0 }
   0xe   : > { %s2009_s17 = scalar_select %p472_p5, %s1901_s10, 1  ;;  %v2029_v0 = vld [vmem:[%s2619_s3] ss:$0 sm:$0xff]  ;;  %vm652_vm0 = vcmask 60416   ;;  %vm843_vm1 = vcmask 1040384   ;;  %vm995_vm3 = vcmask 1046528  }
   0xf   : > { %s475_s18 = scalar_select %p474_p6, %s2004_s16, 15  ;;  %v2037_v6 = vld [vmem:[%s2620_s4] ss:$0 sm:$0xff]  ;;  %vm844_vm2 = vsmask.f32 256  ;;  %vm1036_vm8 = vcmask 64512  }
  0x10   : > { %s2013_s19 = sshll.u32 %s2009_s17, 5  ;;  %vm2078_vm4 = vmand %vm843_vm1, %vm844_vm2  ;;  %vm866_vm5 = vsmask.f32 7424  ;;  %vm1053_vm9 = vcmask 130048   ;;  %vm1252_vm10 = vcmask 1043456   ;;  %vm1178_vm11 = vcmask 392192  }
  0x11   : > { %s1705_s20 = sshll.u32 %s475_s18, 1  ;;  %vm1161_vm12 = vcmask 195584   ;;  %vm1235_vm13 = vcmask 588800   ;;  %p539_p13 = scmp.lt.s32.totalorder %s1897_s30, 1  ;;  %vm1429_vm14 = vcmask 58368  }
  0x12   : > { %s2016_s21 = sadd.s32 %s2013_s19, %s1705_s20 }
  0x13   : > { %s1707_s22 = sshll.u32 %s2016_s21, 2  ;;  %s500_s21 = sadd.s32 8, %s2004_s16 }
  0x14   : > { %s2024_s25 = scalar_lea.vmem %s2616_s0, %s1707_s22  ;;  %s2061_s23 = scalar_lea.vmem %s2624_s8, %s1707_s22 }
  0x15   : > { %v1807_v1 = vld [vmem:[%s2024_s25 + $0x10] sm:$0xff]   ;;  %v1767_v2 = vld [vmem:[%s2024_s25] sm:$0xff]   ;;  %v1806_v3 = vld [vmem:[%s2024_s25 + $0x8] sm:$0xff]   ;;  %p2093_p7 = scmp.lt.s32.totalorder %s500_s21, 15 }
  0x16   : > { %v1776_v4 = vunpack.c.l.bf16 %v1807_v1  ;;  %v1777_v5 = vunpack.c.h.bf16 %v1807_v1  ;;  %v1768_v7 = vunpack.c.l.bf16 %v1767_v2  ;;  %v1769_v8 = vunpack.c.h.bf16 %v1767_v2  ;;  %v1808_v9 = vld [vmem:[%s2024_s25 + $0x18] sm:$0xff]   ;;  %v1809_v46 = vld [vmem:[%s2024_s25 + $0x20] sm:$0xff]   ;;  %v1810_v51 = vld [vmem:[%s2024_s25 + $0x28] sm:$0xff]   ;;  %s2170_s27 = scalar_select %p484_p8, %s2139_s26, 0 }
  0x17   : > { %v1772_v10 = vunpack.c.l.bf16 %v1806_v3  ;;  %v1773_v11 = vunpack.c.h.bf16 %v1806_v3  ;;  %v1780_v12 = vunpack.c.l.bf16 %v1808_v9  ;;  %v1781_v13 = vunpack.c.h.bf16 %v1808_v9  ;;  %s2642_s21 = smov (!%p2093_p7, %s500_s21), 15 }
  0x18   : > { %v589_v14 = vmul.f32 %v2029_v0, %v1776_v4  ;;  %v590_v15 = vmul.f32 %v2029_v0, %v1777_v5  ;;  %v585_v16 = vmul.f32 %v2029_v0, %v1768_v7  ;;  %v586_v17 = vmul.f32 %v2029_v0, %v1769_v8  ;;  %s2644_s21 = smov (!%p2093_p7, %s2642_s21), 15  ;;  %s2646_s27 = smov (!%p1710_p10, %s2170_s27), 15 }
  0x19   : > { %v587_v18 = vmul.f32 %v2029_v0, %v1772_v10  ;;  %v588_v19 = vmul.f32 %v2029_v0, %v1773_v11  ;;  %v591_v20 = vmul.f32 %v2029_v0, %v1780_v12  ;;  %v592_v21 = vmul.f32 %v2029_v0, %v1781_v13  ;;  %s2159_s16 = sshll.u32 %s2644_s21, 1  ;;  %s1715_s26 = sshll.u32 %s2646_s27, 1 }
  0x1a   : > { %v608_v22 = vadd.f32 %v2037_v6, %v589_v14  ;;  %v609_v23 = vadd.f32 %v2037_v6, %v590_v15  ;;  %v604_v24 = vadd.f32 %v2037_v6, %v585_v16  ;;  %v605_v25 = vadd.f32 %v2037_v6, %v586_v17  ;;  %s509_s29 = sadd.s32 %s2159_s16, %s2013_s19  ;;  %s2224_s16 = sadd.s32 %s1715_s26, %s2013_s19 }
  0x1b   : > { %v606_v26 = vadd.f32 %v2037_v6, %v587_v18  ;;  %v607_v27 = vadd.f32 %v2037_v6, %v588_v19  ;;  %v610_v28 = vadd.f32 %v2037_v6, %v591_v20  ;;  %v611_v29 = vadd.f32 %v2037_v6, %v592_v21  ;;  %s2182_s18 = scalar_select %p547_p9, 1, 0 }
  0x1c   : > { %v624_v30 = vmax.f32 %v608_v22, 0.0  ;;  %v625_v31 = vmax.f32 %v609_v23, 0.0  ;;  %v620_v32 = vmax.f32 %v604_v24, 0.0  ;;  %v621_v33 = vmax.f32 %v605_v25, 0.0  ;;  %s2186_s20 = sshll.u32 %s509_s29, 2  ;;  %s1717_s19 = sshll.u32 %s2224_s16, 2 }
  0x1d   : > { %v622_v34 = vmax.f32 %v606_v26, 0.0  ;;  %v623_v35 = vmax.f32 %v607_v27, 0.0  ;;  %v626_v36 = vmax.f32 %v610_v28, 0.0  ;;  %v627_v37 = vmax.f32 %v611_v29, 0.0  ;;  %s511_s22 = scalar_lea.vmem %s2618_s2, %s2186_s20  ;;  %s1917_s20 = smov 24  }
  0x1e   : > { %v640_v38 = vpack.c.bf16 %v624_v30, %v624_v30  ;;  %v641_v39 = vpack.c.bf16 %v625_v31, %v625_v31  ;;  %v636_v40 = vpack.c.bf16 %v620_v32, %v620_v32  ;;  %v637_v41 = vpack.c.bf16 %v621_v33, %v621_v33  ;;  %s1732_s16 = sshll.u32 %s2009_s17, 1 }
  0x1f   : > { %v638_v42 = vpack.c.bf16 %v622_v34, %v622_v34  ;;  %v639_v43 = vpack.c.bf16 %v623_v35, %v623_v35  ;;  %v642_v44 = vpack.c.bf16 %v626_v36, %v626_v36  ;;  %v643_v45 = vpack.c.bf16 %v627_v37, %v627_v37 }
  0x20   : > { %658 = vst.msk [vmem:[%s2061_s23 + $0x14] sm:$0xf] %vm652_vm0, %v641_v39  ;;  %v729_v47 = vunpack.c.l.b16 %v640_v38  ;;  %v730_v48 = vunpack.c.l.b16 %v641_v39  ;;  %v725_v49 = vunpack.c.l.b16 %v636_v40  ;;  %v726_v50 = vunpack.c.l.b16 %v637_v41 }
  0x21   : > { %657 = vst.msk [vmem:[%s2061_s23 + $0x10] sm:$0xf] %vm652_vm0, %v640_v38  ;;  %v727_v52 = vunpack.c.l.b16 %v638_v42  ;;  %v728_v53 = vunpack.c.l.b16 %v639_v43  ;;  %v731_v54 = vunpack.c.l.b16 %v642_v44  ;;  %v732_v55 = vunpack.c.l.b16 %v643_v45 }
  0x22   : > { %v746_v56 = vpack.c.b16 %v730_v48, %v729_v47  ;;  %654 = vst.msk [vmem:[%s2061_s23 + $0x4] sm:$0xf] %vm652_vm0, %v637_v41  ;;  %v744_v57 = vpack.c.b16 %v726_v50, %v725_v49  ;;  %v1784_v58 = vunpack.c.l.bf16 %v1809_v46  ;;  %v1785_v61 = vunpack.c.h.bf16 %v1809_v46 }
  0x23   : > { %653 = vst.msk [vmem:[%s2061_s23] sm:$0xf] %vm652_vm0, %v636_v40  ;;  %v745_v59 = vpack.c.b16 %v728_v53, %v727_v52  ;;  %v747_v60 = vpack.c.b16 %v732_v55, %v731_v54  ;;  %v1788_v62 = vunpack.c.l.bf16 %v1810_v51  ;;  %v1789_v9 = vunpack.c.h.bf16 %v1810_v51 }
  0x24   : > { %v775_v63 = vshrl.u32 %v746_v56, 16  ;;  %v778_v1 = vshll.u32 %v746_v56, 16  ;;  %v761_v2 = vshrl.u32 %v744_v57, 16  ;;  %v764_v3 = vshll.u32 %v744_v57, 16  ;;  %655 = vst.msk [vmem:[%s2061_s23 + $0x8] sm:$0xf] %vm652_vm0, %v638_v42 }
  0x25   : > { %656 = vst.msk [vmem:[%s2061_s23 + $0xc] sm:$0xf] %vm652_vm0, %v639_v43  ;;  %v768_v5 = vshrl.u32 %v745_v59, 16  ;;  %v771_v7 = vshll.u32 %v745_v59, 16  ;;  %v782_v8 = vshrl.u32 %v747_v60, 16  ;;  %v785_v12 = vshll.u32 %v747_v60, 16 }
  0x26   : > { %v777_v10 = vrot.slane %v775_v63, 7  ;;  %v763_v11 = vrot.slane %v761_v2, 7  ;;  %660 = vst.msk [vmem:[%s2061_s23 + $0x1c] sm:$0xf] %vm652_vm0, %v643_v45  ;;  %v593_v13 = vmul.f32 %v2029_v0, %v1784_v58  ;;  %v594_v16 = vmul.f32 %v2029_v0, %v1785_v61 }
  0x27   : > { %v770_v14 = vrot.slane %v768_v5, 7  ;;  %v784_v15 = vrot.slane %v782_v8, 7  ;;  %659 = vst.msk [vmem:[%s2061_s23 + $0x18] sm:$0xf] %vm652_vm0, %v642_v44  ;;  %v595_v17 = vmul.f32 %v2029_v0, %v1788_v62  ;;  %v596_v29 = vmul.f32 %v2029_v0, %v1789_v9 }
  0x28   : > { %v780_v18 = vor.u32 %v778_v1, %v777_v10  ;;  %v859_v19 = vsel %vm2078_vm4, %v777_v10, 0  ;;  %v766_v20 = vor.u32 %v764_v3, %v763_v11  ;;  %v857_v21 = vsel %vm2078_vm4, %v763_v11, 0  ;;  %v1811_v3 = vld [vmem:[%s2024_s25 + $0x30] sm:$0xff]  }
  0x29   : > { %v1006_v22 = vrot.slane %v859_v19, 1  ;;  %v1000_v23 = vrot.slane %v857_v21, 1  ;;  %v773_v24 = vor.u32 %v771_v7, %v770_v14  ;;  %v858_v25 = vsel %vm2078_vm4, %v770_v14, 0 }
  0x2a   : > { %v2105_v26 = vsel %vm2078_vm4, 0, %v780_v18  ;;  %v2109_v27 = vsel %vm2078_vm4, 0, %v766_v20  ;;  %v887_v28 = vshll.u32 %v857_v21, 16  ;;  %v1003_v33 = vrot.slane %v858_v25, 1 }
  0x2b   : > { %v1005_v30 = vrot.slane %v2105_v26, 1  ;;  %v999_v31 = vrot.slane %v2109_v27, 1  ;;  %v2116_v32 = vsel %vm2078_vm4, 0, %v773_v24  ;;  %v880_v35 = vshrl.u32 %v2109_v27, 16 }
  0x2c   : > { %v1002_v34 = vrot.slane %v2116_v32, 1  ;;  %v882_v36 = vshll.u32 %v2109_v27, 16  ;;  %v787_v37 = vor.u32 %v785_v12, %v784_v15  ;;  %v860_v40 = vsel %vm2078_vm4, %v784_v15, 0 }
  0x2d   : > { %v1007_v38 = vsel %vm995_vm3, %v1005_v30, %v1006_v22  ;;  %v1001_v39 = vsel %vm995_vm3, %v999_v31, %v1000_v23  ;;  %v612_v41 = vadd.f32 %v2037_v6, %v593_v13  ;;  %v889_v43 = vrot.slane %v887_v28, 1  ;;  %v1812_v22 = vld [vmem:[%s2024_s25 + $0x38] sm:$0xff]  }
  0x2e   : > { %1026 = vrot.lane.b32.xlu0 %v1007_v38, %s1915_s24  ;;  %1022 = vrot.lane.b32.xlu1 %v1001_v39, %s1915_s24  ;;  %v884_v42 = vrot.slane %v882_v36, 1  ;;  %v2136_v44 = vsel %vm2078_vm4, 0, %v787_v37  ;;  %v1009_v45 = vrot.slane %v860_v40, 1  ;;  %v1004_v46 = vsel %vm995_vm3, %v1002_v34, %v1003_v33 }
  0x2f   : > { %v1008_v47 = vrot.slane %v2136_v44, 1  ;;  %v613_v48 = vadd.f32 %v2037_v6, %v594_v16  ;;  %v628_v49 = vmax.f32 %v612_v41, 0.0  ;;  %v894_v51 = vshll.u32 %v2116_v32, 16 }
  0x30   : > { %v885_v50 = vor.u32 %v884_v42, %v880_v35  ;;  %v899_v52 = vshll.u32 %v858_v25, 16  ;;  %v904_v53 = vshrl.u32 %v2105_v26, 16  ;;  %v906_v57 = vshll.u32 %v2105_v26, 16 }
  0x31   : > { %v1010_v54 = vsel %vm995_vm3, %v1008_v47, %v1009_v45  ;;  %v629_v55 = vmax.f32 %v613_v48, 0.0  ;;  %v644_v56 = vpack.c.bf16 %v628_v49, %v628_v49  ;;  %v892_v59 = vshrl.u32 %v2116_v32, 16 }
  0x32   : > { %v890_v58 = vsel %vm866_vm5, %v885_v50, %v889_v43  ;;  %1028 = vrot.lane.b32.xlu2 %v1010_v54, %s1915_s24  ;;  %v896_v60 = vrot.slane %v894_v51, 1  ;;  %v911_v61 = vshll.u32 %v859_v19, 16  ;;  %v908_v1 = vrot.slane %v906_v57, 1 }
  0x33   : > { %v645_v62 = vpack.c.bf16 %v629_v55, %v629_v55  ;;  %661 = vst.msk [vmem:[%s2061_s23 + $0x20] sm:$0xf] %vm652_vm0, %v644_v56  ;;  %v733_v63 = vunpack.c.l.b16 %v644_v56  ;;  %v614_v2 = vadd.f32 %v2037_v6, %v595_v17  ;;  %v901_v5 = vrot.slane %v899_v52, 1 }
  0x34   : > { %v913_v7 = vrot.slane %v911_v61, 1  ;;  %v615_v8 = vadd.f32 %v2037_v6, %v596_v29  ;;  %v916_v9 = vshrl.u32 %v2136_v44, 16  ;;  %v909_v11 = vor.u32 %v908_v1, %v904_v53 }
  0x35   : > { %662 = vst.msk [vmem:[%s2061_s23 + $0x24] sm:$0xf] %vm652_vm0, %v645_v62  ;;  %v734_v10 = vunpack.c.l.b16 %v645_v62  ;;  %v630_v12 = vmax.f32 %v614_v2, 0.0  ;;  %v918_v13 = vshll.u32 %v2136_v44, 16  ;;  %v897_v14 = vor.u32 %v896_v60, %v892_v59  ;;  %v1803_v59 = vld [vmem:[%s511_s22] sm:$0xff]  }
  0x36   : > { %1024 = vrot.lane.b32.xlu1 %v1004_v46, %s1915_s24  ;;  %965 = vrot.lane.b32.xlu0 %v890_v58, %s1916_s28  ;;  %v631_v15 = vmax.f32 %v615_v8, 0.0  ;;  %v923_v16 = vshll.u32 %v860_v40, 16  ;;  %v1792_v17 = vunpack.c.l.bf16 %v1811_v3  ;;  %v914_v19 = vsel %vm866_vm5, %v909_v11, %v913_v7 }
  0x37   : > { %v748_v18 = vpack.c.b16 %v734_v10, %v733_v63  ;;  %v646_v20 = vpack.c.bf16 %v630_v12, %v630_v12  ;;  %v920_v21 = vrot.slane %v918_v13, 1  ;;  %v1793_v25 = vunpack.c.h.bf16 %v1811_v3 }
  0x38   : > { %v647_v23 = vpack.c.bf16 %v631_v15, %v631_v15  ;;  %v925_v24 = vrot.slane %v923_v16, 1  ;;  %v597_v28 = vmul.f32 %v2029_v0, %v1792_v17  ;;  %v1796_v37 = vunpack.c.l.bf16 %v1812_v22 }
  0x39   : > { %v789_v29 = vshrl.u32 %v748_v18, 16  ;;  %v792_v30 = vshll.u32 %v748_v18, 16  ;;  %663 = vst.msk [vmem:[%s2061_s23 + $0x28] sm:$0xf] %vm652_vm0, %v646_v20  ;;  %v735_v31 = vunpack.c.l.b16 %v646_v20  ;;  %v921_v33 = vor.u32 %v920_v21, %v916_v9 }
  0x3a   : > { %969 = vrot.lane.b32.xlu2 %v914_v19, %s1916_s28  ;;  %664 = vst.msk [vmem:[%s2061_s23 + $0x2c] sm:$0xf] %vm652_vm0, %v647_v23  ;;  %v736_v34 = vunpack.c.l.b16 %v647_v23  ;;  %v598_v35 = vmul.f32 %v2029_v0, %v1793_v25  ;;  %v616_v36 = vadd.f32 %v2037_v6, %v597_v28  ;;  %v902_v39 = vsel %vm866_vm5, %v897_v14, %v901_v5 }
  0x3b   : > { %v791_v38 = vrot.slane %v789_v29, 7  ;;  %v926_v40 = vsel %vm866_vm5, %v921_v33, %v925_v24  ;;  %v1797_v41 = vunpack.c.h.bf16 %v1812_v22  ;;  %v599_v46 = vmul.f32 %v2029_v0, %v1796_v37 }
  0x3c   : > { %v749_v42 = vpack.c.b16 %v736_v34, %v735_v31  ;;  %v617_v43 = vadd.f32 %v2037_v6, %v598_v35  ;;  %v632_v45 = vmax.f32 %v616_v36, 0.0  ;;  %v699_v50 = vstv %s2182_s18  ;;  %s494_s18 = scalar_lea.vmem %s2617_s1, %s1717_s19 }
  0x3d   : > { %v794_v47 = vor.u32 %v792_v30, %v791_v38  ;;  %v861_v48 = vsel %vm2078_vm4, %v791_v38, 0  ;;  %v600_v49 = vmul.f32 %v2029_v0, %v1797_v41  ;;  %v618_v58 = vadd.f32 %v2037_v6, %v599_v46  ;;  %v1799_v46 = vld [vmem:[%s494_s18] sm:$0xff]  }
  0x3e   : > { %v1012_v51 = vrot.slane %v861_v48, 1  ;;  %967 = vrot.lane.b32.xlu0 %v902_v39, %s1916_s28  ;;  %v935_v52 = vshll.u32 %v861_v48, 16  ;;  %v796_v53 = vshrl.u32 %v749_v42, 16  ;;  %v799_v54 = vshll.u32 %v749_v42, 16 }
  0x3f   : > { %v2214_v55 = vsel %vm2078_vm4, 0, %v794_v47  ;;  %v633_v56 = vmax.f32 %v617_v43, 0.0  ;;  %v648_v57 = vpack.c.bf16 %v632_v45, %v632_v45  ;;  %v619_v5 = vadd.f32 %v2037_v6, %v600_v49 }
  0x40   : > { %v1011_v60 = vrot.slane %v2214_v55, 1  ;;  %v928_v61 = vshrl.u32 %v2214_v55, 16  ;;  %v930_v62 = vshll.u32 %v2214_v55, 16  ;;  %v937_v63 = vrot.slane %v935_v52, 1 }
  0x41   : > { %v798_v1 = vrot.slane %v796_v53, 7  ;;  %v649_v2 = vpack.c.bf16 %v633_v56, %v633_v56  ;;  %665 = vst.msk [vmem:[%s2061_s23 + $0x30] sm:$0xf] %vm652_vm0, %v648_v57  ;;  %v737_v3 = vunpack.c.l.b16 %v648_v57  ;;  %v634_v9 = vmax.f32 %v618_v58, 0.0 }
  0x42   : > { %v1013_v7 = vsel %vm995_vm3, %v1011_v60, %v1012_v51  ;;  %v932_v8 = vrot.slane %v930_v62, 1  ;;  %971 = vrot.lane.b32.xlu2 %v926_v40, %s1916_s28  ;;  %v1804_v10 = vunpack.c.l.bf16 %v1803_v59  ;;  %v635_v14 = vmax.f32 %v619_v5, 0.0 }
  0x43   : > { %1030 = vrot.lane.b32.xlu1 %v1013_v7, %s1915_s24  ;;  %v801_v11 = vor.u32 %v799_v54, %v798_v1  ;;  %v862_v12 = vsel %vm2078_vm4, %v798_v1, 0  ;;  %666 = vst.msk [vmem:[%s2061_s23 + $0x34] sm:$0xf] %vm652_vm0, %v649_v2  ;;  %v738_v13 = vunpack.c.l.b16 %v649_v2  ;;  %v650_v17 = vpack.c.bf16 %v634_v9, %v634_v9 }
  0x44   : > { %v933_v15 = vor.u32 %v932_v8, %v928_v61  ;;  %v947_v16 = vshll.u32 %v862_v12, 16  ;;  %v1015_v18 = vrot.slane %v862_v12, 1  ;;  %v651_v21 = vpack.c.bf16 %v635_v14, %v635_v14 }
  0x45   : > { %v2236_v19 = vsel %vm2078_vm4, 0, %v801_v11  ;;  %v750_v20 = vpack.c.b16 %v738_v13, %v737_v3  ;;  %v1805_v22 = vunpack.c.h.bf16 %v1803_v59  ;;  %667 = vst.msk [vmem:[%s2061_s23 + $0x38] sm:$0xf] %vm652_vm0, %v650_v17  ;;  %v739_v31 = vunpack.c.l.b16 %v650_v17 }
  0x46   : > { %v938_v23 = vsel %vm866_vm5, %v933_v15, %v937_v63  ;;  %v940_v24 = vshrl.u32 %v2236_v19, 16  ;;  %v942_v25 = vshll.u32 %v2236_v19, 16  ;;  %v949_v28 = vrot.slane %v947_v16, 1  ;;  %668 = vst.msk [vmem:[%s2061_s23 + $0x3c] sm:$0xf] %vm652_vm0, %v651_v21 }
  0x47   : > { %v803_v29 = vshrl.u32 %v750_v20, 16  ;;  %v806_v30 = vshll.u32 %v750_v20, 16  ;;  %v740_v33 = vunpack.c.l.b16 %v651_v21  ;;  %v1014_v35 = vrot.slane %v2236_v19, 1  ;;  %s693_s23 = scalar_select %p546_p11, 1, 0 }
  0x48   : > { %v944_v34 = vrot.slane %v942_v25, 1  ;;  %v685_v36 = vmul.f32 %v2029_v0, %v1804_v10  ;;  %v686_v37 = vmul.f32 %v2029_v0, %v1805_v22  ;;  %vm2251_vm6 = vcmp.eq.s32.totalorder %v699_v50, 1 }
  0x49   : > { %v805_v38 = vrot.slane %v803_v29, 7  ;;  %v751_v39 = vpack.c.b16 %v740_v33, %v739_v31  ;;  %v1016_v42 = vsel %vm995_vm3, %v1014_v35, %v1015_v18  ;;  %v1800_v59 = vunpack.c.l.bf16 %v1799_v46 }
  0x4a   : > { %v945_v41 = vor.u32 %v944_v34, %v940_v24  ;;  %v687_v43 = vadd.f32 %v2037_v6, %v685_v36  ;;  %v688_v45 = vadd.f32 %v2037_v6, %v686_v37  ;;  %1032 = vrot.lane.b32.xlu2 %v1016_v42, %s1915_s24  ;;  %v1801_v63 = vunpack.c.h.bf16 %v1799_v46 }
  0x4b   : > { %973 = vrot.lane.b32.xlu1 %v938_v23, %s1916_s28  ;;  %v808_v47 = vor.u32 %v806_v30, %v805_v38  ;;  %v863_v48 = vsel %vm2078_vm4, %v805_v38, 0  ;;  %v810_v49 = vshrl.u32 %v751_v39, 16  ;;  %v813_v50 = vshll.u32 %v751_v39, 16 }
  0x4c   : > { %v950_v51 = vsel %vm866_vm5, %v945_v41, %v949_v28  ;;  %v959_v52 = vshll.u32 %v863_v48, 16  ;;  %v1018_v53 = vrot.slane %v863_v48, 1  ;;  %v689_v54 = vmax.f32 %v687_v43, 0.0 }
  0x4d   : > { %975 = vrot.lane.b32.xlu0 %v950_v51, %s1916_s28  ;;  %v2266_v56 = vsel %vm2078_vm4, 0, %v808_v47  ;;  %v812_v57 = vrot.slane %v810_v49, 7  ;;  %v690_v58 = vmax.f32 %v688_v45, 0.0  ;;  %v673_v14 = vmul.f32 %v2029_v0, %v1800_v59 }
  0x4e   : > { %v952_v60 = vshrl.u32 %v2266_v56, 16  ;;  %v954_v61 = vshll.u32 %v2266_v56, 16  ;;  %v1017_v62 = vrot.slane %v2266_v56, 1  ;;  %v691_v3 = vpack.c.bf16 %v689_v54, %v689_v54 }
  0x4f   : > { %v815_v1 = vor.u32 %v813_v50, %v812_v57  ;;  %v864_v2 = vsel %vm2078_vm4, %v812_v57, 0  ;;  %v692_v5 = vpack.c.bf16 %v690_v58, %v690_v58  ;;  %v961_v8 = vrot.slane %v959_v52, 1 }
  0x50   : > { %v956_v7 = vrot.slane %v954_v61, 1  ;;  %v1019_v9 = vsel %vm995_vm3, %v1017_v62, %v1018_v53  ;;  %v1078_v10 = vshll.u32 %v864_v2, 16  ;;  %v701_v12 = vsel %vm2251_vm6, 0, %v691_v3 }
  0x51   : > { %v2277_v11 = vsel %vm2078_vm4, 0, %v815_v1  ;;  %v702_v13 = vsel %vm2251_vm6, 0, %v692_v5  ;;  %v741_v18 = vunpack.c.l.b16 %v701_v12  ;;  %v674_v21 = vmul.f32 %v2029_v0, %v1801_v63 }
  0x52   : > { %v957_v15 = vor.u32 %v956_v7, %v952_v60  ;;  %v1071_v16 = vshrl.u32 %v2277_v11, 16  ;;  %v1073_v17 = vshll.u32 %v2277_v11, 16  ;;  %v742_v20 = vunpack.c.l.b16 %v702_v13 }
  0x53   : > { %1034 = vrot.lane.b32.xlu1 %v1019_v9, %s1915_s24  ;;  %v1080_v24 = vrot.slane %v1078_v10, 1  ;;  %v675_v25 = vadd.f32 %v2037_v6, %v673_v14  ;;  %v676_v29 = vadd.f32 %v2037_v6, %v674_v21  ;;  %v694_v30 = vstv %s693_s23  ;;  %s1725_s23 = sshll.u32 %s1901_s10, 1 }
  0x54   : > { %v962_v22 = vsel %vm866_vm5, %v957_v15, %v961_v8  ;;  %v1075_v23 = vrot.slane %v1073_v17, 1  ;;  %v752_v28 = vpack.c.b16 %v742_v20, %v741_v18  ;;  %v1086_v31 = vrot.slane %v2277_v11, 1 }
  0x55   : > { %977 = vrot.lane.b32.xlu0 %v962_v22, %s1916_s28  ;;  %v1087_v33 = vrot.slane %v864_v2, 1  ;;  %v677_v35 = vmax.f32 %v675_v25, 0.0  ;;  %v678_v0 = vmax.f32 %v676_v29, 0.0  ;;  %vm695_vm7 = vcmp.eq.s32.totalorder %v694_v30, 1 }
  0x56   : > { %v1076_v34 = vor.u32 %v1075_v23, %v1071_v16  ;;  %v817_v36 = vshrl.u32 %v752_v28, 16  ;;  %v820_v37 = vshll.u32 %v752_v28, 16 }
  0x57   : > { %v679_v39 = vpack.c.bf16 %v677_v35, %v677_v35  ;;  %v680_v41 = vpack.c.bf16 %v678_v0, %v678_v0  ;;  %v1088_v42 = vsel %vm995_vm3, %v1086_v31, %v1087_v33 }
  0x58   : > { %v1081_v38 = vsel %vm866_vm5, %v1076_v34, %v1080_v24  ;;  %v819_v40 = vrot.slane %v817_v36, 7 }
  0x59   : > { %1082 = vrot.lane.b32.xlu2 %v1081_v38, %s1916_s28  ;;  %v696_v6 = vsel %vm695_vm7, 0, %v679_v39  ;;  %v697_v46 = vsel %vm695_vm7, 0, %v680_v41 }
  0x5a   : > { %v822_v43 = vor.u32 %v820_v37, %v819_v40  ;;  %v865_v45 = vsel %vm2078_vm4, %v819_v40, 0  ;;  %v723_v47 = vunpack.c.l.b16 %v696_v6  ;;  %v724_v50 = vunpack.c.l.b16 %v697_v46 }
  0x5b   : > { %v1103_v48 = vshll.u32 %v865_v45, 16  ;;  %v1112_v49 = vrot.slane %v865_v45, 1 }
  0x5c   : > { %v2303_v51 = vsel %vm2078_vm4, 0, %v822_v43  ;;  %v743_v57 = vpack.c.b16 %v724_v50, %v723_v47 }
  0x5d   : > { %1089 = vrot.lane.b32.xlu0 %v1088_v42, %s1915_s24  ;;  %v1096_v52 = vshrl.u32 %v2303_v51, 16  ;;  %v1098_v53 = vshll.u32 %v2303_v51, 16  ;;  %v1111_v54 = vrot.slane %v2303_v51, 1  ;;  %v1105_v59 = vrot.slane %v1103_v48, 1 }
  0x5e   : > { %v754_v61 = vshrl.u32 %v743_v57, 16  ;;  %v757_v62 = vshll.u32 %v743_v57, 16  ;;  %v1764_v57 = vld [vmem:[%s2621_s5 + $0x10] sm:$0xff] }
  0x5f   : > { %v1100_v58 = vrot.slane %v1098_v53, 1  ;;  %v1113_v60 = vsel %vm995_vm3, %v1111_v54, %v1112_v49  ;;  %v1765_v54 = vld [vmem:[%s2621_s5 + $0x18] sm:$0xff] }
  0x60   : > { %v756_v1 = vrot.slane %v754_v61, 7 }
  0x61   : > { %1114 = vrot.lane.b32.xlu2 %v1113_v60, %s1915_s24  ;;  %v1101_v63 = vor.u32 %v1100_v58, %v1096_v52  ;;  %v1762_v58 = vld [vmem:[%s2621_s5] sm:$0xff] }
  0x62   : > { %v759_v3 = vor.u32 %v757_v62, %v756_v1  ;;  %v856_v5 = vsel %vm2078_vm4, %v756_v1, 0 }
  0x63   : > { %v1106_v2 = vsel %vm866_vm5, %v1101_v63, %v1105_v59  ;;  %v875_v7 = vshll.u32 %v856_v5, 16  ;;  %v997_v8 = vrot.slane %v856_v5, 1 }
  0x64   : > { %1107 = vrot.lane.b32.xlu1 %v1106_v2, %s1916_s28  ;;  %v2316_v9 = vsel %vm2078_vm4, 0, %v759_v3 }
  0x65   : > { %v868_v10 = vshrl.u32 %v2316_v9, 16  ;;  %v870_v12 = vshll.u32 %v2316_v9, 16  ;;  %v996_v13 = vrot.slane %v2316_v9, 1  ;;  %v877_v15 = vrot.slane %v875_v7, 1 }
  0x67   : > { %v872_v14 = vrot.slane %v870_v12, 1  ;;  %v998_v16 = vsel %vm995_vm3, %v996_v13, %v997_v8 }
  0x69   : > { %v873_v17 = vor.u32 %v872_v14, %v868_v10 }
  0x6b   : > { %v878_v18 = vsel %vm866_vm5, %v873_v17, %v877_v15 }
  0x6c   : > { %1020 = vrot.lane.b32.xlu1 %v998_v16, %s1915_s24  ;;  %963 = vrot.lane.b32.xlu0 %v878_v18, %s1916_s28  ;;  %s1918_s24 = smov 48  }
  0x8c   : > { %v1029_v4 = vpop.permute.xlu2 %1028 }
  0x94   : > { %v970_v20 = vpop.permute.xlu2 %969 }
  0x95   : > { %v1044_v21 = vsel %vm1036_vm8, %v2105_v26, %v970_v20 }
  0x9c   : > { %v972_v26 = vpop.permute.xlu2 %971 }
  0x9d   : > { %v1046_v31 = vsel %vm1036_vm8, %v2136_v44, %v972_v26 }
  0x9e   : > { %v2344_v35 = vsel %vm1053_vm9, %v1046_v31, %v1029_v4 }
  0xa0   : > { %v1027_v22 = vpop.permute.xlu0 %1026  ;;  %v1023_v23 = vpop.permute.xlu1 %1022 }
  0xa1   : > { %v2328_v24 = vsel %vm1053_vm9, %v1044_v21, %v1027_v22 }
  0xa2   : > { %1132 = vrot.lane.b32.xlu1 %v2328_v24, %s1917_s20 }
  0xa4   : > { %v1033_v37 = vpop.permute.xlu2 %1032 }
  0xa8   : > { %v966_v25 = vpop.permute.xlu0 %965  ;;  %v1025_v30 = vpop.permute.xlu1 %1024 }
  0xa9   : > { %v1040_v28 = vsel %vm1036_vm8, %v2109_v27, %v966_v25 }
  0xaa   : > { %v2335_v29 = vsel %vm1053_vm9, %v1040_v28, %v1023_v23 }
  0xab   : > { %1128 = vrot.lane.b32.xlu2 %v2335_v29, %s1917_s20 }
  0xb0   : > { %v968_v33 = vpop.permute.xlu0 %967 }
  0xb1   : > { %v1042_v34 = vsel %vm1036_vm8, %v2116_v32, %v968_v33 }
  0xb2   : > { %v2347_v27 = vsel %vm1053_vm9, %v1042_v34, %v1025_v30 }
  0xb3   : > { %1149 = vrot.lane.b32.xlu2 %v2344_v35, %s1918_s24  ;;  %1145 = vrot.lane.b32.xlu0 %v2347_v27, %s1918_s24  ;;  %v1083_v47 = vpop.permute.xlu2 %1082 }
  0xb4   : > { %v1092_v48 = vsel %vm1036_vm8, %v2277_v11, %v1083_v47 }
  0xb5   : > { %v1031_v36 = vpop.permute.xlu1 %1030 }
  0xbb   : > { %1130 = vrot.lane.b32.xlu2 %v2347_v27, %s1917_s20  ;;  %v1115_v52 = vpop.permute.xlu2 %1114 }
  0xbd   : > { %v974_v44 = vpop.permute.xlu1 %973 }
  0xbe   : > { %v1048_v32 = vsel %vm1036_vm8, %v2214_v55, %v974_v44  ;;  %v1203_v55 = vld [vmem:[%s2621_s5 + $0x20] sm:$0xf] }
  0xbf   : > { %v976_v0 = vpop.permute.xlu0 %975  ;;  %v2358_v38 = vsel %vm1053_vm9, %v1048_v32, %v1031_v36  ;;  %v1225_v41 = vunpack.c.l.b16 %v1203_v55  ;;  %v2449_v36 = vld [vmem:[%s2622_s6] ss:$0 sm:$0xff] }
  0xc0   : > { %v1050_v39 = vsel %vm1036_vm8, %v2236_v19, %v976_v0  ;;  %1136 = vrot.lane.b32.xlu0 %v2358_v38, %s1917_s20 }
  0xc1   : > { %v2365_v40 = vsel %vm1053_vm9, %v1050_v39, %v1033_v37  ;;  %v1230_v42 = vpack.c.b16 %v1225_v41, %v1225_v41 }
  0xc2   : > { %1153 = vrot.lane.b32.xlu1 %v2365_v40, %s1918_s24 }
  0xc3   : > { %v1254_v45 = vsel %vm1252_vm10, %v1230_v42, 0 }
  0xc4   : > { %1813 = vmatpush.bf16.msra.mxu1 %v1254_v45  ;;  %1259 = vmatpush.bf16.msra.mxu0 %v1254_v45 }
  0xc5   : > { %v1035_v6 = vpop.permute.xlu1 %1034  ;;  %1814 = vmatpush.bf16.msra.mxu2 %v1254_v45  ;;  %1815 = vmatpush.bf16.msra.mxu3 %v1254_v45 }
  0xc7   : > { %v978_v43 = vpop.permute.xlu0 %977 }
  0xc8   : > { %v1052_v19 = vsel %vm1036_vm8, %v2266_v56, %v978_v43  ;;  %1147 = vrot.lane.b32.xlu0 %v2328_v24, %s1918_s24  ;;  %1816 = vmatpush.bf16.msra.mxu1 %v1765_v54 }
  0xc9   : > { %v2377_v46 = vsel %vm1053_vm9, %v1052_v19, %v1035_v6  ;;  %1260 = vmatpush.bf16.msra.mxu0 %v1765_v54  ;;  %1817 = vmatpush.bf16.msra.mxu2 %v1765_v54 }
  0xca   : > { %1140 = vrot.lane.b32.xlu1 %v2377_v46, %s1917_s20  ;;  %1818 = vmatpush.bf16.msra.mxu3 %v1765_v54 }
  0xcc   : > { %1819 = vmatpush.bf16.msra.mxu1 %v1764_v57 }
  0xcd   : > { %1261 = vmatpush.bf16.msra.mxu0 %v1764_v57  ;;  %1820 = vmatpush.bf16.msra.mxu2 %v1764_v57 }
  0xce   : > { %1821 = vmatpush.bf16.msra.mxu3 %v1764_v57 }
  0xcf   : > { %v1090_v49 = vpop.permute.xlu0 %1089 }
  0xd0   : > { %v1094_v56 = vsel %vm1053_vm9, %v1092_v48, %v1090_v49  ;;  %1134 = vrot.lane.b32.xlu0 %v2344_v35, %s1917_s20 }
  0xd1   : > { %1157 = vrot.lane.b32.xlu2 %v1094_v56, %s1918_s24 }
  0xd2   : > { %1151 = vrot.lane.b32.xlu1 %v2358_v38, %s1918_s24 }
  0xd6   : > { %v1108_v50 = vpop.permute.xlu1 %1107 }
  0xd7   : > { %v1117_v11 = vsel %vm1036_vm8, %v2303_v51, %v1108_v50  ;;  %v1763_v51 = vld [vmem:[%s2621_s5 + $0x8] sm:$0xff] }
  0xd8   : > { %1155 = vrot.lane.b32.xlu0 %v2377_v46, %s1918_s24  ;;  %v1119_v53 = vsel %vm1053_vm9, %v1117_v11, %v1115_v52  ;;  %1822 = vmatpush.bf16.msra.mxu1 %v1763_v51 }
  0xd9   : > { %1138 = vrot.lane.b32.xlu2 %v2365_v40, %s1917_s20  ;;  %1262 = vmatpush.bf16.msra.mxu0 %v1763_v51 }
  0xda   : > { %1142 = vrot.lane.b32.xlu1 %v1094_v56, %s1917_s20  ;;  %1823 = vmatpush.bf16.msra.mxu2 %v1763_v51  ;;  %s517_s20 = sadd.s32 %s1897_s30, %s1725_s23  ;;  %s2650_s30 = smov (!%p539_p13, %s1897_s30), 1 }
  0xdb   : > { %1824 = vmatpush.bf16.msra.mxu3 %v1763_v51  ;;  %s542_s19 = sadd.s32 %s1732_s16, %s2650_s30 }
  0xdc   : > { %1825 = vmatpush.bf16.msra.mxu1 %v1762_v58  ;;  %s1733_s27 = sshll.u32 %s542_s19, 1 }
  0xdd   : > { %1263 = vmatpush.bf16.msra.mxu0 %v1762_v58  ;;  %s544_s23 = scalar_lea.vmem %s2625_s9, %s1733_s27 }
  0xde   : > { %1826 = vmatpush.bf16.msra.mxu2 %v1762_v58  ;;  %v1021_v60 = vpop.permute.xlu1 %1020  ;;  %v964_v2 = vpop.permute.xlu0 %963 }
  0xdf   : > { %1827 = vmatpush.bf16.msra.mxu3 %v1762_v58  ;;  %v1038_v3 = vsel %vm1036_vm8, %v2316_v9, %v964_v2 }
  0xe0   : > { %v1055_v5 = vsel %vm1053_vm9, %v1038_v3, %v1021_v60 }
  0xe1   : > { %1159 = vrot.lane.b32.xlu2 %v1119_v53, %s1918_s24  ;;  %s1726_s24 = sshll.u32 %s517_s20, 4 }
  0xe2   : > { %p519_p12 = scmp.lt.s32.totalorder %s1726_s24, 63 }
  0xe4   : > { %s2648_s24 = smov (!%p519_p12, %s1726_s24), 63 }
  0xe5   : > { %s1727_s21 = sshll.u32 %s2648_s24, 2 }
  0xe6   : > { %s2457_s26 = scalar_lea.vmem %s2623_s7, %s1727_s21 }
 0x105   : > { %v1129_v59 = vpop.permute.xlu2 %1128 }
 0x106   : > { %v1163_v7 = vsel %vm1161_vm12, %v1055_v5, %v1129_v59 }
 0x10d   : > { %v1150_v62 = vpop.permute.xlu2 %1149 }
 0x114   : > { %v1133_v61 = vpop.permute.xlu1 %1132 }
 0x115   : > { %v1167_v63 = vsel %vm1161_vm12, %v2347_v27, %v1133_v61  ;;  %v1131_v12 = vpop.permute.xlu2 %1130 }
 0x116   : > { %v1184_v1 = vsel %vm1178_vm11, %v1167_v63, %v1150_v62  ;;  %v1165_v17 = vsel %vm1161_vm12, %v2335_v29, %v1131_v12 }
 0x117   : > { %1752 = vmatmul.msk.bf16.vlgmr.msra.gmra.mxu1 %vm1235_vm13, %v1184_v1 }
 0x125   : > { %v1146_v8 = vpop.permute.xlu0 %1145 }
 0x126   : > { %v1180_v10 = vsel %vm1178_vm11, %v1163_v7, %v1146_v8 }
 0x127   : > { %1750 = vmatmul.msk.bf16.vlgmr.msra.gmra.mxu0 %vm1235_vm13, %v1180_v10 }
 0x12b   : > { %v1158_v9 = vpop.permute.xlu2 %1157 }
 0x132   : > { %v1137_v13 = vpop.permute.xlu0 %1136 }
 0x133   : > { %v1171_v14 = vsel %vm1161_vm12, %v2344_v35, %v1137_v13  ;;  %v1139_v25 = vpop.permute.xlu2 %1138 }
 0x134   : > { %v1154_v15 = vpop.permute.xlu1 %1153  ;;  %v1173_v26 = vsel %vm1161_vm12, %v2358_v38, %v1139_v25 }
 0x135   : > { %v1188_v16 = vsel %vm1178_vm11, %v1171_v14, %v1154_v15 }
 0x136   : > { %1754 = vmatmul.msk.bf16.vlgmr.msra.gmra.mxu2 %vm1235_vm13, %v1188_v16 }
 0x13a   : > { %v1148_v18 = vpop.permute.xlu0 %1147 }
 0x13b   : > { %v1182_v4 = vsel %vm1178_vm11, %v1165_v17, %v1148_v18  ;;  %v1160_v33 = vpop.permute.xlu2 %1159 }
 0x13c   : > { %v1141_v20 = vpop.permute.xlu1 %1140  ;;  %1751 = vmatmul.msk.bf16.gmra.mxu0 %vm1235_vm13, %v1182_v4 }
 0x13d   : > { %v1175_v21 = vsel %vm1161_vm12, %v2365_v40, %v1141_v20 }
 0x13e   : > { %v1192_v22 = vsel %vm1178_vm11, %v1175_v21, %v1158_v9 }
 0x13f   : > { %1756 = vmatmul.msk.bf16.vlgmr.msra.gmra.mxu3 %vm1235_vm13, %v1192_v22 }
 0x142   : > { %v1135_v23 = vpop.permute.xlu0 %1134 }
 0x143   : > { %v1169_v28 = vsel %vm1161_vm12, %v2328_v24, %v1135_v23 }
 0x144   : > { %v1152_v29 = vpop.permute.xlu1 %1151 }
 0x145   : > { %v1186_v30 = vsel %vm1178_vm11, %v1169_v28, %v1152_v29 }
 0x146   : > { %1753 = vmatmul.msk.bf16.gmra.mxu1 %vm1235_vm13, %v1186_v30 }
 0x14a   : > { %v1156_v31 = vpop.permute.xlu0 %1155 }
 0x14b   : > { %v1190_v34 = vsel %vm1178_vm11, %v1173_v26, %v1156_v31 }
 0x14c   : > { %v1143_v35 = vpop.permute.xlu1 %1142  ;;  %1755 = vmatmul.msk.bf16.gmra.mxu2 %vm1235_vm13, %v1190_v34 }
 0x14d   : > { %v1177_v27 = vsel %vm1161_vm12, %v2377_v46, %v1143_v35 }
 0x14e   : > { %v1194_v24 = vsel %vm1178_vm11, %v1177_v27, %v1160_v33 }
 0x14f   : > { %1757 = vmatmul.msk.bf16.gmra.mxu3 %vm1235_vm13, %v1194_v24 }
 0x194   : > { %v1275_v44 = vpop.f32.mrf.mxu1 }
 0x195   : > { %v1276_v32 = vadd.f32 %v2449_v36, %v1275_v44 }
 0x197   : > { %1309 = vst.msk [vmem:[#allocation2 + $0x20] sm:$0xff] %vm1036_vm8, %v1276_v32 }
 0x19c   : > { %v1277_v37 = vpop.f32.mrf.mxu1 }
 0x19d   : > { %v1278_v0 = vadd.f32 %v2449_v36, %v1277_v37 }
 0x19e   : > { %v2459_v38 = vld [vmem:[#allocation2 + $0x20] sm:$0xff] }
 0x19f   : > { %v1435_v39 = vpack.c.bf16 %v2459_v38, %v2459_v38  ;;  %1310 = vst.msk [vmem:[#allocation2 + $0x28] sm:$0xff] %vm1036_vm8, %v1278_v0  ;;  %v1378_v22 = vmul.f32 %v2459_v38, %v2459_v38  ;;  %v1344_v44 = vsel %vm1036_vm8, %v2459_v38, 0.0 }
 0x1a1   : > { %1451 = vst.msk [vmem:[%s2457_s26 + $0x10] sm:$0xf] %vm652_vm0, %v1435_v39 }
 0x1a4   : > { %v1265_v40 = vpop.f32.mrf.mxu0 }
 0x1a5   : > { %v1266_v55 = vadd.f32 %v2449_v36, %v1265_v40 }
 0x1a6   : > { %v2467_v41 = vld [vmem:[#allocation2 + $0x28] sm:$0xff] }
 0x1a7   : > { %v1436_v42 = vpack.c.bf16 %v2467_v41, %v2467_v41  ;;  %1305 = vst.msk [vmem:[#allocation2] sm:$0xff] %vm1036_vm8, %v1266_v55  ;;  %v1379_v32 = vmul.f32 %v2467_v41, %v2467_v41  ;;  %v1346_v38 = vsel %vm1036_vm8, %v2467_v41, 0.0 }
 0x1a9   : > { %1452 = vst.msk [vmem:[%s2457_s26 + $0x14] sm:$0xf] %vm652_vm0, %v1436_v42 }
 0x1ac   : > { %v1267_v6 = vpop.f32.mrf.mxu0 }
 0x1ad   : > { %v1268_v43 = vadd.f32 %v2449_v36, %v1267_v6  ;;  %v1397_v6 = vsel %vm1036_vm8, %v1378_v22, 0.0 }
 0x1ae   : > { %v1321_v45 = vld [vmem:[#allocation2] sm:$0xff] }
 0x1af   : > { %v1431_v19 = vpack.c.bf16 %v1321_v45, %v1321_v45  ;;  %1306 = vst.msk [vmem:[#allocation2 + $0x8] sm:$0xff] %vm1036_vm8, %v1268_v43  ;;  %v1374_v2 = vmul.f32 %v1321_v45, %v1321_v45  ;;  %v1337_v8 = vsel %vm1036_vm8, %v1321_v45, 0.0 }
 0x1b1   : > { %1447 = vst.msk [vmem:[%s2457_s26] sm:$0xf] %vm652_vm0, %v1431_v19  ;;  %v1390_v20 = vsel %vm1036_vm8, %v1374_v2, 0.0 }
 0x1b6   : > { %v1322_v46 = vld [vmem:[#allocation2 + $0x8] sm:$0xff] }
 0x1b7   : > { %v1432_v47 = vpack.c.bf16 %v1322_v46, %v1322_v46  ;;  %v1375_v1 = vmul.f32 %v1322_v46, %v1322_v46  ;;  %v1338_v3 = vsel %vm1036_vm8, %v1322_v46, 0.0  ;;  %v1399_v46 = vsel %vm1036_vm8, %v1379_v32, 0.0 }
 0x1b8   : > { %v1339_v18 = vadd.f32 %v1338_v3, %v1337_v8 }
 0x1b9   : > { %1448 = vst.msk [vmem:[%s2457_s26 + $0x4] sm:$0xf] %vm652_vm0, %v1432_v47  ;;  %v1285_v48 = vpop.f32.mrf.mxu2  ;;  %v1270_v49 = vpop.f32.mrf.mxu0  ;;  %v1391_v14 = vsel %vm1036_vm8, %v1375_v1, 0.0 }
 0x1ba   : > { %v1286_v56 = vadd.f32 %v2449_v36, %v1285_v48  ;;  %v1271_v50 = vadd.f32 %v2449_v36, %v1270_v49  ;;  %v1392_v23 = vadd.f32 %v1391_v14, %v1390_v20 }
 0x1bc   : > { %1313 = vst.msk [vmem:[#allocation2 + $0x40] sm:$0xff] %vm1036_vm8, %v1286_v56 }
 0x1bd   : > { %1307 = vst.msk [vmem:[#allocation2 + $0x10] sm:$0xff] %vm1036_vm8, %v1271_v50 }
 0x1c1   : > { %v1287_v11 = vpop.f32.mrf.mxu2  ;;  %v1272_v52 = vpop.f32.mrf.mxu0 }
 0x1c2   : > { %v1288_v53 = vadd.f32 %v2449_v36, %v1287_v11  ;;  %v1295_v54 = vpop.f32.mrf.mxu3  ;;  %v1273_v61 = vadd.f32 %v2449_v36, %v1272_v52 }
 0x1c3   : > { %v2485_v57 = vld [vmem:[#allocation2 + $0x40] sm:$0xff]  ;;  %v1296_v51 = vadd.f32 %v2449_v36, %v1295_v54  ;;  %v1280_v58 = vpop.f32.mrf.mxu1 }
 0x1c4   : > { %v1439_v59 = vpack.c.bf16 %v2485_v57, %v2485_v57  ;;  %v1323_v60 = vld [vmem:[#allocation2 + $0x10] sm:$0xff]  ;;  %1314 = vst.msk [vmem:[#allocation2 + $0x48] sm:$0xff] %vm1036_vm8, %v1288_v53  ;;  %v1281_v63 = vadd.f32 %v2449_v36, %v1280_v58  ;;  %v1382_v49 = vmul.f32 %v2485_v57, %v2485_v57 }
 0x1c5   : > { %v1433_v62 = vpack.c.bf16 %v1323_v60, %v1323_v60  ;;  %1317 = vst.msk [vmem:[#allocation2 + $0x60] sm:$0xff] %vm1036_vm8, %v1296_v51  ;;  %v1376_v5 = vmul.f32 %v1323_v60, %v1323_v60  ;;  %v1340_v15 = vsel %vm1036_vm8, %v1323_v60, 0.0 }
 0x1c6   : > { %1455 = vst.msk [vmem:[%s2457_s26 + $0x20] sm:$0xf] %vm652_vm0, %v1439_v59  ;;  %v1341_v25 = vadd.f32 %v1340_v15, %v1339_v18  ;;  %v1405_v8 = vsel %vm1036_vm8, %v1382_v49, 0.0 }
 0x1c7   : > { %1449 = vst.msk [vmem:[%s2457_s26 + $0x8] sm:$0xf] %vm652_vm0, %v1433_v62  ;;  %v1393_v21 = vsel %vm1036_vm8, %v1376_v5, 0.0 }
 0x1c8   : > { %1308 = vst.msk [vmem:[#allocation2 + $0x18] sm:$0xff] %vm1036_vm8, %v1273_v61  ;;  %v1394_v35 = vadd.f32 %v1393_v21, %v1392_v23  ;;  %v1352_v61 = vsel %vm1036_vm8, %v2485_v57, 0.0 }
 0x1c9   : > { %1311 = vst.msk [vmem:[#allocation2 + $0x30] sm:$0xff] %vm1036_vm8, %v1281_v63 }
 0x1ca   : > { %v1297_v7 = vpop.f32.mrf.mxu3 }
 0x1cb   : > { %v2502_v10 = vld [vmem:[#allocation2 + $0x48] sm:$0xff]  ;;  %v1298_v12 = vadd.f32 %v2449_v36, %v1297_v7  ;;  %v1282_v13 = vpop.f32.mrf.mxu1 }
 0x1cc   : > { %v1440_v16 = vpack.c.bf16 %v2502_v10, %v2502_v10  ;;  %v2509_v9 = vld [vmem:[#allocation2 + $0x60] sm:$0xff]  ;;  %v1283_v17 = vadd.f32 %v2449_v36, %v1282_v13  ;;  %v1383_v1 = vmul.f32 %v2502_v10, %v2502_v10  ;;  %v1354_v13 = vsel %vm1036_vm8, %v2502_v10, 0.0 }
 0x1cd   : > { %v1443_v4 = vpack.c.bf16 %v2509_v9, %v2509_v9  ;;  %1318 = vst.msk [vmem:[#allocation2 + $0x68] sm:$0xff] %vm1036_vm8, %v1298_v12  ;;  %v1386_v22 = vmul.f32 %v2509_v9, %v2509_v9 }
 0x1ce   : > { %1456 = vst.msk [vmem:[%s2457_s26 + $0x24] sm:$0xf] %vm652_vm0, %v1440_v16  ;;  %v1407_v18 = vsel %vm1036_vm8, %v1383_v1, 0.0 }
 0x1cf   : > { %1459 = vst.msk [vmem:[%s2457_s26 + $0x30] sm:$0xf] %vm652_vm0, %v1443_v4  ;;  %v1324_v28 = vld [vmem:[#allocation2 + $0x18] sm:$0xff]  ;;  %v1290_v29 = vpop.f32.mrf.mxu2 }
 0x1d0   : > { %v1342_v30 = vsel %vm1036_vm8, %v1324_v28, 0.0  ;;  %v1377_v26 = vmul.f32 %v1324_v28, %v1324_v28  ;;  %v1434_v31 = vpack.c.bf16 %v1324_v28, %v1324_v28  ;;  %v1327_v33 = vld [vmem:[#allocation2 + $0x30] sm:$0xff]  ;;  %1312 = vst.msk [vmem:[#allocation2 + $0x38] sm:$0xff] %vm1036_vm8, %v1283_v17  ;;  %v1291_v34 = vadd.f32 %v2449_v36, %v1290_v29 }
 0x1d1   : > { %v1343_v27 = vadd.f32 %v1342_v30, %v1341_v25  ;;  %v1437_v24 = vpack.c.bf16 %v1327_v33, %v1327_v33  ;;  %v1380_v55 = vmul.f32 %v1327_v33, %v1327_v33  ;;  %v1348_v47 = vsel %vm1036_vm8, %v1327_v33, 0.0 }
 0x1d2   : > { %v1395_v37 = vsel %vm1036_vm8, %v1377_v26, 0.0  ;;  %1450 = vst.msk [vmem:[%s2457_s26 + $0xc] sm:$0xf] %vm652_vm0, %v1434_v31  ;;  %v1300_v0 = vpop.f32.mrf.mxu3  ;;  %v1360_v31 = vsel %vm1036_vm8, %v2509_v9, 0.0 }
 0x1d3   : > { %v1345_v39 = vadd.f32 %v1344_v44, %v1343_v27  ;;  %v1396_v40 = vadd.f32 %v1395_v37, %v1394_v35  ;;  %1453 = vst.msk [vmem:[%s2457_s26 + $0x18] sm:$0xf] %vm652_vm0, %v1437_v24  ;;  %v1301_v42 = vadd.f32 %v2449_v36, %v1300_v0  ;;  %v1401_v50 = vsel %vm1036_vm8, %v1380_v55, 0.0 }
 0x1d4   : > { %v2539_v43 = vld [vmem:[#allocation2 + $0x68] sm:$0xff]  ;;  %1315 = vst.msk [vmem:[#allocation2 + $0x50] sm:$0xff] %vm1036_vm8, %v1291_v34  ;;  %v1413_v44 = vsel %vm1036_vm8, %v1386_v22, 0.0 }
 0x1d5   : > { %v1398_v45 = vadd.f32 %v1397_v6, %v1396_v40  ;;  %v1347_v19 = vadd.f32 %v1346_v38, %v1345_v39  ;;  %1319 = vst.msk [vmem:[#allocation2 + $0x70] sm:$0xff] %vm1036_vm8, %v1301_v42  ;;  %v1444_v48 = vpack.c.bf16 %v2539_v43, %v2539_v43  ;;  %v1387_v33 = vmul.f32 %v2539_v43, %v2539_v43 }
 0x1d6   : > { %v1362_v32 = vsel %vm1036_vm8, %v2539_v43, 0.0 }
 0x1d7   : > { %v1349_v41 = vadd.f32 %v1348_v47, %v1347_v19  ;;  %v1400_v56 = vadd.f32 %v1399_v46, %v1398_v45  ;;  %v1328_v11 = vld [vmem:[#allocation2 + $0x38] sm:$0xff]  ;;  %v1292_v52 = vpop.f32.mrf.mxu2  ;;  %1460 = vst.msk [vmem:[%s2457_s26 + $0x34] sm:$0xf] %vm652_vm0, %v1444_v48  ;;  %v1415_v39 = vsel %vm1036_vm8, %v1387_v33, 0.0 }
 0x1d8   : > { %v1350_v53 = vsel %vm1036_vm8, %v1328_v11, 0.0  ;;  %v1381_v54 = vmul.f32 %v1328_v11, %v1328_v11  ;;  %v1438_v51 = vpack.c.bf16 %v1328_v11, %v1328_v11  ;;  %v1293_v58 = vadd.f32 %v2449_v36, %v1292_v52 }
 0x1d9   : > { %v1402_v59 = vadd.f32 %v1401_v50, %v1400_v56  ;;  %v1351_v60 = vadd.f32 %v1350_v53, %v1349_v41 }
 0x1da   : > { %v1403_v62 = vsel %vm1036_vm8, %v1381_v54, 0.0  ;;  %1454 = vst.msk [vmem:[%s2457_s26 + $0x1c] sm:$0xf] %vm652_vm0, %v1438_v51  ;;  %v1302_v63 = vpop.f32.mrf.mxu3 }
 0x1db   : > { %v1353_v2 = vadd.f32 %v1352_v61, %v1351_v60  ;;  %v1404_v3 = vadd.f32 %v1403_v62, %v1402_v59  ;;  %v1331_v5 = vld [vmem:[#allocation2 + $0x50] sm:$0xff]  ;;  %1316 = vst.msk [vmem:[#allocation2 + $0x58] sm:$0xff] %vm1036_vm8, %v1293_v58  ;;  %v1303_v7 = vadd.f32 %v2449_v36, %v1302_v63 }
 0x1dc   : > { %v1441_v57 = vpack.c.bf16 %v1331_v5, %v1331_v5  ;;  %v1335_v12 = vld [vmem:[#allocation2 + $0x70] sm:$0xff]  ;;  %v1384_v15 = vmul.f32 %v1331_v5, %v1331_v5  ;;  %v1356_v4 = vsel %vm1036_vm8, %v1331_v5, 0.0 }
 0x1dd   : > { %v1406_v14 = vadd.f32 %v1405_v8, %v1404_v3  ;;  %1320 = vst.msk [vmem:[#allocation2 + $0x78] sm:$0xff] %vm1036_vm8, %v1303_v7  ;;  %v1355_v16 = vadd.f32 %v1354_v13, %v1353_v2  ;;  %v1445_v17 = vpack.c.bf16 %v1335_v12, %v1335_v12  ;;  %v1388_v37 = vmul.f32 %v1335_v12, %v1335_v12 }
 0x1de   : > { %1457 = vst.msk [vmem:[%s2457_s26 + $0x28] sm:$0xf] %vm652_vm0, %v1441_v57  ;;  %v1409_v20 = vsel %vm1036_vm8, %v1384_v15, 0.0  ;;  %v1364_v40 = vsel %vm1036_vm8, %v1335_v12, 0.0 }
 0x1df   : > { %v1408_v36 = vadd.f32 %v1407_v18, %v1406_v14  ;;  %1461 = vst.msk [vmem:[%s2457_s26 + $0x38] sm:$0xf] %vm652_vm0, %v1445_v17  ;;  %v1357_v21 = vadd.f32 %v1356_v4, %v1355_v16  ;;  %v1417_v38 = vsel %vm1036_vm8, %v1388_v37, 0.0 }
 0x1e1   : > { %v1410_v29 = vadd.f32 %v1409_v20, %v1408_v36 }
 0x1e2   : > { %v1332_v10 = vld [vmem:[#allocation2 + $0x58] sm:$0xff] }
 0x1e3   : > { %v1358_v23 = vsel %vm1036_vm8, %v1332_v10, 0.0  ;;  %v1385_v25 = vmul.f32 %v1332_v10, %v1332_v10  ;;  %v1442_v28 = vpack.c.bf16 %v1332_v10, %v1332_v10 }
 0x1e4   : > { %v1359_v30 = vadd.f32 %v1358_v23, %v1357_v21  ;;  %v1336_v26 = vld [vmem:[#allocation2 + $0x78] sm:$0xff] }
 0x1e5   : > { %v1411_v34 = vsel %vm1036_vm8, %v1385_v25, 0.0  ;;  %1458 = vst.msk [vmem:[%s2457_s26 + $0x2c] sm:$0xf] %vm652_vm0, %v1442_v28  ;;  %v1446_v35 = vpack.c.bf16 %v1336_v26, %v1336_v26  ;;  %v1389_v55 = vmul.f32 %v1336_v26, %v1336_v26  ;;  %v1366_v45 = vsel %vm1036_vm8, %v1336_v26, 0.0 }
 0x1e6   : > { %v1361_v27 = vadd.f32 %v1360_v31, %v1359_v30  ;;  %v1412_v24 = vadd.f32 %v1411_v34, %v1410_v29 }
 0x1e7   : > { %1462 = vst.msk [vmem:[%s2457_s26 + $0x3c] sm:$0xf] %vm652_vm0, %v1446_v35  ;;  %v1419_v46 = vsel %vm1036_vm8, %v1389_v55, 0.0 }
 0x1e8   : > { %v1414_v9 = vadd.f32 %v1413_v44, %v1412_v24  ;;  %v1363_v0 = vadd.f32 %v1362_v32, %v1361_v27 }
 0x1ea   : > { %v1365_v42 = vadd.f32 %v1364_v40, %v1363_v0  ;;  %v1416_v6 = vadd.f32 %v1415_v39, %v1414_v9 }
 0x1ec   : > { %v1367_v43 = vadd.f32 %v1366_v45, %v1365_v42  ;;  %v1418_v19 = vadd.f32 %v1417_v38, %v1416_v6 }
 0x1ee   : > { %v1368_v47 = vrot.slane %v1367_v43, 4  ;;  %v1420_v48 = vadd.f32 %v1419_v46, %v1418_v19 }
 0x1f0   : > { %v1369_v49 = vadd.f32 %v1368_v47, %v1367_v43  ;;  %v1421_v41 = vrot.slane %v1420_v48, 4 }
 0x1f2   : > { %v1370_v56 = vrot.slane %v1369_v49, 2  ;;  %v1422_v50 = vadd.f32 %v1421_v41, %v1420_v48 }
 0x1f4   : > { %v1371_v11 = vadd.f32 %v1370_v56, %v1369_v49  ;;  %v1423_v52 = vrot.slane %v1422_v50, 2 }
 0x1f6   : > { %v1372_v53 = vrot.slane %v1371_v11, 1  ;;  %v1424_v54 = vadd.f32 %v1423_v52, %v1422_v50 }
 0x1f8   : > { %v1425_v51 = vrot.slane %v1424_v54, 1  ;;  %v1373_v58 = vadd.f32 %v1372_v53, %v1371_v11 }
 0x1fa   : > { %v1426_v59 = vadd.f32 %v1425_v51, %v1424_v54 }
 0x1fc   : > { %v1428_v60 = vsel %vm843_vm1, %v1373_v58, %v1426_v59 }
 0x1fd   : > { %1430 = vst.msk [vmem:[%s544_s23] sm:$0x3] %vm1429_vm14, %v1428_v60 }
 0x1fe PF: > { %s20_s13 = sadd.s32 1, %s1913_s13   ;;  %s2631_s30 = smov %s1905_s11 }
 0x1ff   : > { %p17_p0 = scmp.ge.s32.totalorder %s20_s13, 6   ;;  %s2632_s10 = smov %s1909_s12 }
 0x200   : > { %s2633_s11 = smov %s2636_s14  ;;  %s2634_s12 = smov %s2640_s15 }
 0x201   :  { %19 = sbr.rel (!%p17_p0) target bundleno = 3 (0x3), region = 108 }

// kernel: down_conv_forward.7
= control target key start
LH: loop header
LB: loop body
LE: loop exit
PB: predicated region body
PF: predicated region fallthrough
CT: control target
= control target key end

     0   :  { %s1173_s18 = smov 0   ;;  %s1175_s19 = smov 0   ;;  %s1587_s0 = inlined_call_operand.vmem [shape: bf16[2,16,16,8], index: 0, kind: input, shape index: {}]   ;;  %s1588_s1 = inlined_call_operand.vmem [shape: bf16[2,16,16,8], index: 1, kind: input, shape index: {}, may-alias: {1,4}]   ;;  %s1589_s2 = inlined_call_operand.vmem [shape: f32[1,8], index: 2, kind: input, shape index: {}]   ;;  %s1590_s3 = inlined_call_operand.vmem [shape: f32[1,8], index: 3, kind: input, shape index: {}]   ;;  %s1591_s4 = inlined_call_operand.vmem [shape: bf16[2,16,16,8], index: 4, kind: output, shape index: {0}, may-alias: {1,4}]   ;;  %s1592_s5 = inlined_call_operand.vmem [shape: bf16[2,8,8,8], index: 5, kind: output, shape index: {1}]  }
   0x1   :  { %s1177_s20 = smov 0  }
   0x2 LB: > { %s28_s21 = sadd.s32 1, %s1137_s19  ;;  %p920_p0 = scmp.ge.s32.totalorder %s1141_s20, 1  ;;  %s1141_s20 = sphi %s1177_s20, %s16_s20   ;;  %s1137_s19 = sphi %s1175_s19, %s1594_s19   ;;  %s1133_s18 = sphi %s1173_s18, %s1593_s18  }
   0x3   : > { %p30_p1 = scmp.ge.s32.totalorder %s28_s21, 2  ;;  %p232_p2 = scmp.lt.s32.totalorder %s1141_s20, 3 }
   0x5   : > { %s1596_s21 = smov (%p30_p1, %s28_s21), 0  ;;  %p233_p3 = pnand %p920_p0, %p232_p2 }
   0x6   : > { %p290_p4 = scmp.lt.s32.totalorder (!%p233_p3), %s1133_s18, 1 }
   0x7   : > { %236 = sbr.rel (%p233_p3) target bundleno = 108 (0x6c), region = 36 }
   0xc   : > { %s1598_s18 = smov (!%p290_p4, %s1133_s18), 1  ;;  %v1211_v0 = vld [vmem:[%s1589_s2] ss:$0 sm:$0xff]  ;;  %vm677_vm0 = vcmask 64512   ;;  %vm628_vm1 = vcmask 60416  }
   0xd   : > { %s1194_s22 = sshll.u32 %s1598_s18, 7  ;;  %v1219_v6 = vld [vmem:[%s1590_s3] ss:$0 sm:$0xff]  ;;  %s934_s11 = sshll.u32 %s1598_s18, 5 }
   0xe   : > { %s1200_s25 = scalar_lea.vmem %s1587_s0, %s1194_s22  ;;  %s1206_s28 = scalar_lea.vmem %s1588_s1, %s1194_s22 }
   0xf   : > { %v936_v1 = vld [vmem:[%s1200_s25] sm:$0xff]   ;;  %v1063_v2 = vld [vmem:[%s1200_s25 + $0x8] sm:$0xff]   ;;  %v1079_v14 = vld [vmem:[%s1206_s28 + $0x10] sm:$0xff]   ;;  %s1419_s10 = scalar_lea.vmem %s1591_s4, %s1194_s22  ;;  %s330_s14 = scalar_lea.vmem %s1592_s5, %s934_s11 }
  0x10   : > { %v1000_v3 = vld [vmem:[%s1206_s28] sm:$0xff]   ;;  %v937_v4 = vunpack.c.l.bf16 %v936_v1  ;;  %v941_v5 = vunpack.c.l.bf16 %v1063_v2  ;;  %v1078_v7 = vld [vmem:[%s1206_s28 + $0x8] sm:$0xff]   ;;  %v938_v8 = vunpack.c.h.bf16 %v936_v1  ;;  %v942_v11 = vunpack.c.h.bf16 %v1063_v2  ;;  %v1080_v15 = vld [vmem:[%s1206_s28 + $0x18] sm:$0xff]  }
  0x11   : > { %v1001_v9 = vunpack.c.l.bf16 %v1000_v3  ;;  %v1005_v10 = vunpack.c.l.bf16 %v1078_v7  ;;  %v1002_v17 = vunpack.c.h.bf16 %v1000_v3  ;;  %v1006_v19 = vunpack.c.h.bf16 %v1078_v7  ;;  %v1064_v24 = vld [vmem:[%s1200_s25 + $0x10] sm:$0xff]   ;;  %v1065_v25 = vld [vmem:[%s1200_s25 + $0x18] sm:$0xff]   ;;  %v1081_v33 = vld [vmem:[%s1206_s28 + $0x20] sm:$0xff]  }
  0x12   : > { %v400_v12 = vmul.f32 %v1211_v0, %v937_v4  ;;  %v402_v13 = vmul.f32 %v1211_v0, %v941_v5  ;;  %v401_v16 = vmul.f32 %v1211_v0, %v938_v8  ;;  %v403_v18 = vmul.f32 %v1211_v0, %v942_v11  ;;  %v1236_v34 = vld [vmem:[%s1206_s28 + $0x28] sm:$0xff]   ;;  %v1066_v47 = vld [vmem:[%s1200_s25 + $0x20] sm:$0xff]  }
  0x13   : > { %v1009_v26 = vunpack.c.l.bf16 %v1079_v14  ;;  %v1013_v27 = vunpack.c.l.bf16 %v1080_v15  ;;  %v1010_v28 = vunpack.c.h.bf16 %v1079_v14  ;;  %v945_v32 = vunpack.c.l.bf16 %v1064_v24  ;;  %v1067_v48 = vld [vmem:[%s1200_s25 + $0x28] sm:$0xff]  }
  0x14   : > { %v436_v20 = vadd.f32 %v1219_v6, %v400_v12  ;;  %v438_v21 = vadd.f32 %v1219_v6, %v402_v13  ;;  %v437_v22 = vadd.f32 %v1219_v6, %v401_v16  ;;  %v439_v23 = vadd.f32 %v1219_v6, %v403_v18  ;;  %v1083_v16 = vld [vmem:[%s1206_s28 + $0x30] sm:$0xff]  }
  0x15   : > { %v949_v36 = vunpack.c.l.bf16 %v1065_v25  ;;  %v946_v37 = vunpack.c.h.bf16 %v1064_v24  ;;  %v950_v38 = vunpack.c.h.bf16 %v1065_v25  ;;  %v404_v42 = vmul.f32 %v1211_v0, %v945_v32 }
  0x16   : > { %v532_v29 = vadd.f32 %v1001_v9, %v436_v20  ;;  %v534_v30 = vadd.f32 %v1005_v10, %v438_v21  ;;  %v533_v31 = vadd.f32 %v1002_v17, %v437_v22  ;;  %v535_v35 = vadd.f32 %v1006_v19, %v439_v23  ;;  %v1069_v20 = vld [vmem:[%s1200_s25 + $0x38] sm:$0xff]  }
  0x17   : > { %v406_v44 = vmul.f32 %v1211_v0, %v949_v36  ;;  %v405_v45 = vmul.f32 %v1211_v0, %v946_v37  ;;  %v407_v46 = vmul.f32 %v1211_v0, %v950_v38  ;;  %v1014_v50 = vunpack.c.h.bf16 %v1080_v15  ;;  %v1068_v15 = vld [vmem:[%s1200_s25 + $0x30] sm:$0xff]   ;;  %v1084_v23 = vld [vmem:[%s1206_s28 + $0x38] sm:$0xff]  }
  0x18   : > { %v1238_v39 = vmax.f32 %v532_v29, 0.0  ;;  %v1240_v40 = vmax.f32 %v534_v30, 0.0  ;;  %v1242_v41 = vmax.f32 %v533_v31, 0.0  ;;  %v1245_v43 = vmax.f32 %v535_v35, 0.0 }
  0x19   : > { %v1017_v51 = vunpack.c.l.bf16 %v1081_v33  ;;  %v1021_v52 = vunpack.c.l.bf16 %v1236_v34  ;;  %v440_v54 = vadd.f32 %v1219_v6, %v404_v42  ;;  %v442_v55 = vadd.f32 %v1219_v6, %v406_v44  ;;  %v1085_v42 = vld [vmem:[%s1206_s28 + $0x40] sm:$0xff]  }
  0x1a   : > { %v661_v49 = vmax.f32 %v1238_v39, %v1240_v40  ;;  %v662_v53 = vmax.f32 %v1242_v41, %v1245_v43  ;;  %v1018_v56 = vunpack.c.h.bf16 %v1081_v33  ;;  %v441_v57 = vadd.f32 %v1219_v6, %v405_v45 }
  0x1b   : > { %v443_v58 = vadd.f32 %v1219_v6, %v407_v46  ;;  %v953_v59 = vunpack.c.l.bf16 %v1066_v47  ;;  %v957_v60 = vunpack.c.l.bf16 %v1067_v48  ;;  %v536_v61 = vadd.f32 %v1009_v26, %v440_v54  ;;  %v1086_v46 = vld [vmem:[%s1206_s28 + $0x48] sm:$0xff]  }
  0x1c   : > { %678 = vst.msk [vmem:[#allocation2] sm:$0xff] %vm677_vm0, %v661_v49  ;;  %v538_v62 = vadd.f32 %v1013_v27, %v442_v55  ;;  %v954_v63 = vunpack.c.h.bf16 %v1066_v47  ;;  %v958_v1 = vunpack.c.h.bf16 %v1067_v48  ;;  %v537_v2 = vadd.f32 %v1010_v28, %v441_v57 }
  0x1d   : > { %679 = vst.msk [vmem:[#allocation2 + $0x8] sm:$0xff] %vm677_vm0, %v662_v53  ;;  %v539_v3 = vadd.f32 %v1014_v50, %v443_v58  ;;  %v408_v4 = vmul.f32 %v1211_v0, %v953_v59  ;;  %v410_v5 = vmul.f32 %v1211_v0, %v957_v60  ;;  %v1265_v7 = vmax.f32 %v536_v61, 0.0 }
  0x1e   : > { %v1267_v8 = vmax.f32 %v538_v62, 0.0  ;;  %v409_v9 = vmul.f32 %v1211_v0, %v954_v63  ;;  %v411_v10 = vmul.f32 %v1211_v0, %v958_v1  ;;  %v1271_v11 = vmax.f32 %v537_v2, 0.0 }
  0x1f   : > { %v1273_v12 = vmax.f32 %v539_v3, 0.0  ;;  %v444_v13 = vadd.f32 %v1219_v6, %v408_v4  ;;  %v446_v14 = vadd.f32 %v1219_v6, %v410_v5  ;;  %v1022_v19 = vunpack.c.h.bf16 %v1236_v34 }
  0x20   : > { %v663_v17 = vmax.f32 %v1265_v7, %v1267_v8  ;;  %v445_v18 = vadd.f32 %v1219_v6, %v409_v9  ;;  %v447_v25 = vadd.f32 %v1219_v6, %v411_v10  ;;  %v961_v27 = vunpack.c.l.bf16 %v1068_v15 }
  0x21   : > { %v664_v21 = vmax.f32 %v1271_v11, %v1273_v12  ;;  %v540_v22 = vadd.f32 %v1017_v51, %v444_v13  ;;  %v542_v24 = vadd.f32 %v1021_v52, %v446_v14  ;;  %v965_v29 = vunpack.c.l.bf16 %v1069_v20  ;;  %v1070_v51 = vld [vmem:[%s1200_s25 + $0x40] sm:$0xff]   ;;  %v1071_v52 = vld [vmem:[%s1200_s25 + $0x48] sm:$0xff]  }
  0x22   : > { %680 = vst.msk [vmem:[#allocation2 + $0x10] sm:$0xff] %vm677_vm0, %v663_v17  ;;  %v541_v26 = vadd.f32 %v1018_v56, %v445_v18  ;;  %v1025_v30 = vunpack.c.l.bf16 %v1083_v16  ;;  %v543_v32 = vadd.f32 %v1022_v19, %v447_v25  ;;  %v412_v34 = vmul.f32 %v1211_v0, %v961_v27 }
  0x23   : > { %681 = vst.msk [vmem:[#allocation2 + $0x18] sm:$0xff] %vm677_vm0, %v664_v21  ;;  %v1290_v28 = vmax.f32 %v540_v22, 0.0  ;;  %v1292_v31 = vmax.f32 %v542_v24, 0.0  ;;  %v414_v35 = vmul.f32 %v1211_v0, %v965_v29  ;;  %v1029_v36 = vunpack.c.l.bf16 %v1084_v23  ;;  %v1073_v21 = vld [vmem:[%s1200_s25 + $0x58] sm:$0xff]   ;;  %v1087_v22 = vld [vmem:[%s1206_s28 + $0x50] sm:$0xff]  }
  0x24   : > { %v1294_v33 = vmax.f32 %v541_v26, 0.0  ;;  %v962_v37 = vunpack.c.h.bf16 %v1068_v15  ;;  %v966_v38 = vunpack.c.h.bf16 %v1069_v20  ;;  %v1301_v45 = vmax.f32 %v543_v32, 0.0  ;;  %v1072_v20 = vld [vmem:[%s1200_s25 + $0x50] sm:$0xff]  }
  0x25   : > { %v665_v44 = vmax.f32 %v1290_v28, %v1292_v31  ;;  %v448_v47 = vadd.f32 %v1219_v6, %v412_v34  ;;  %v450_v48 = vadd.f32 %v1219_v6, %v414_v35  ;;  %v1026_v54 = vunpack.c.h.bf16 %v1083_v16 }
  0x26   : > { %v413_v49 = vmul.f32 %v1211_v0, %v962_v37  ;;  %v415_v50 = vmul.f32 %v1211_v0, %v966_v38  ;;  %v666_v53 = vmax.f32 %v1294_v33, %v1301_v45  ;;  %v1030_v55 = vunpack.c.h.bf16 %v1084_v23 }
  0x27   : > { %682 = vst.msk [vmem:[#allocation2 + $0x20] sm:$0xff] %vm677_vm0, %v665_v44  ;;  %v544_v56 = vadd.f32 %v1025_v30, %v448_v47  ;;  %v546_v57 = vadd.f32 %v1029_v36, %v450_v48  ;;  %v969_v60 = vunpack.c.l.bf16 %v1070_v51  ;;  %v973_v61 = vunpack.c.l.bf16 %v1071_v52  ;;  %v1088_v30 = vld [vmem:[%s1206_s28 + $0x58] sm:$0xff]  }
  0x28   : > { %v449_v58 = vadd.f32 %v1219_v6, %v413_v49  ;;  %v451_v59 = vadd.f32 %v1219_v6, %v415_v50  ;;  %683 = vst.msk [vmem:[#allocation2 + $0x28] sm:$0xff] %vm677_vm0, %v666_v53  ;;  %v1033_v62 = vunpack.c.l.bf16 %v1085_v42  ;;  %v1037_v63 = vunpack.c.l.bf16 %v1086_v46 }
  0x29   : > { %v1316_v1 = vmax.f32 %v544_v56, 0.0  ;;  %v1318_v2 = vmax.f32 %v546_v57, 0.0  ;;  %v416_v5 = vmul.f32 %v1211_v0, %v969_v60  ;;  %v418_v9 = vmul.f32 %v1211_v0, %v973_v61  ;;  %v1074_v56 = vld [vmem:[%s1200_s25 + $0x60] sm:$0xff]   ;;  %v1075_v61 = vld [vmem:[%s1200_s25 + $0x68] sm:$0xff]  }
  0x2a   : > { %v545_v3 = vadd.f32 %v1026_v54, %v449_v58  ;;  %v547_v4 = vadd.f32 %v1030_v55, %v451_v59  ;;  %v970_v10 = vunpack.c.h.bf16 %v1070_v51  ;;  %v974_v13 = vunpack.c.h.bf16 %v1071_v52  ;;  %v1089_v57 = vld [vmem:[%s1206_s28 + $0x60] sm:$0xff]  }
  0x2b   : > { %v667_v14 = vmax.f32 %v1316_v1, %v1318_v2  ;;  %v452_v17 = vadd.f32 %v1219_v6, %v416_v5  ;;  %v454_v18 = vadd.f32 %v1219_v6, %v418_v9  ;;  %v1034_v24 = vunpack.c.h.bf16 %v1085_v42 }
  0x2c   : > { %v1324_v15 = vmax.f32 %v545_v3, 0.0  ;;  %v1326_v16 = vmax.f32 %v547_v4, 0.0  ;;  %v417_v19 = vmul.f32 %v1211_v0, %v970_v10  ;;  %v419_v23 = vmul.f32 %v1211_v0, %v974_v13  ;;  %v1090_v4 = vld [vmem:[%s1206_s28 + $0x68] sm:$0xff]  }
  0x2d   : > { %684 = vst.msk [vmem:[#allocation2 + $0x30] sm:$0xff] %vm677_vm0, %v667_v14  ;;  %v1038_v25 = vunpack.c.h.bf16 %v1086_v46  ;;  %v548_v27 = vadd.f32 %v1033_v62, %v452_v17  ;;  %v550_v29 = vadd.f32 %v1037_v63, %v454_v18  ;;  %v977_v35 = vunpack.c.l.bf16 %v1072_v20 }
  0x2e   : > { %v668_v26 = vmax.f32 %v1324_v15, %v1326_v16  ;;  %v453_v32 = vadd.f32 %v1219_v6, %v417_v19  ;;  %v455_v34 = vadd.f32 %v1219_v6, %v419_v23  ;;  %v981_v36 = vunpack.c.l.bf16 %v1073_v21 }
  0x2f   : > { %v1342_v37 = vmax.f32 %v548_v27, 0.0  ;;  %v1344_v38 = vmax.f32 %v550_v29, 0.0  ;;  %v1041_v42 = vunpack.c.l.bf16 %v1087_v22  ;;  %v420_v47 = vmul.f32 %v1211_v0, %v977_v35 }
  0x30   : > { %685 = vst.msk [vmem:[#allocation2 + $0x38] sm:$0xff] %vm677_vm0, %v668_v26  ;;  %v549_v44 = vadd.f32 %v1034_v24, %v453_v32  ;;  %v551_v46 = vadd.f32 %v1038_v25, %v455_v34  ;;  %v422_v48 = vmul.f32 %v1211_v0, %v981_v36  ;;  %v1045_v50 = vunpack.c.l.bf16 %v1088_v30 }
  0x31   : > { %v669_v49 = vmax.f32 %v1342_v37, %v1344_v38  ;;  %v978_v51 = vunpack.c.h.bf16 %v1072_v20  ;;  %v456_v54 = vadd.f32 %v1219_v6, %v420_v47  ;;  %v982_v58 = vunpack.c.h.bf16 %v1073_v21 }
  0x32   : > { %v1350_v52 = vmax.f32 %v549_v44, 0.0  ;;  %v1352_v53 = vmax.f32 %v551_v46, 0.0  ;;  %v458_v55 = vadd.f32 %v1219_v6, %v422_v48  ;;  %v1042_v60 = vunpack.c.h.bf16 %v1087_v22  ;;  %v1077_v44 = vld [vmem:[%s1200_s25 + $0x78] sm:$0xff]  }
  0x33   : > { %686 = vst.msk [vmem:[#allocation2 + $0x40] sm:$0xff] %vm677_vm0, %v669_v49  ;;  %v421_v59 = vmul.f32 %v1211_v0, %v978_v51  ;;  %v552_v63 = vadd.f32 %v1041_v42, %v456_v54  ;;  %v1046_v3 = vunpack.c.h.bf16 %v1088_v30  ;;  %v423_v9 = vmul.f32 %v1211_v0, %v982_v58  ;;  %v1076_v42 = vld [vmem:[%s1200_s25 + $0x70] sm:$0xff]  }
  0x34   : > { %v670_v62 = vmax.f32 %v1350_v52, %v1352_v53  ;;  %v554_v5 = vadd.f32 %v1045_v50, %v458_v55  ;;  %v985_v13 = vunpack.c.l.bf16 %v1074_v56  ;;  %v989_v17 = vunpack.c.l.bf16 %v1075_v61  ;;  %v1091_v49 = vld [vmem:[%s1206_s28 + $0x70] sm:$0xff]   ;;  %v1092_v50 = vld [vmem:[%s1206_s28 + $0x78] sm:$0xff]  }
  0x35   : > { %v457_v10 = vadd.f32 %v1219_v6, %v421_v59  ;;  %v1367_v14 = vmax.f32 %v552_v63, 0.0  ;;  %v1049_v18 = vunpack.c.l.bf16 %v1089_v57  ;;  %v459_v20 = vadd.f32 %v1219_v6, %v423_v9 }
  0x36   : > { %687 = vst.msk [vmem:[#allocation2 + $0x48] sm:$0xff] %vm677_vm0, %v670_v62  ;;  %v1369_v19 = vmax.f32 %v554_v5, 0.0  ;;  %v424_v22 = vmul.f32 %v1211_v0, %v985_v13  ;;  %v426_v23 = vmul.f32 %v1211_v0, %v989_v17  ;;  %v1053_v24 = vunpack.c.l.bf16 %v1090_v4 }
  0x37   : > { %v553_v21 = vadd.f32 %v1042_v60, %v457_v10  ;;  %v986_v25 = vunpack.c.h.bf16 %v1074_v56  ;;  %v990_v26 = vunpack.c.h.bf16 %v1075_v61  ;;  %v555_v29 = vadd.f32 %v1046_v3, %v459_v20 }
  0x38   : > { %v671_v27 = vmax.f32 %v1367_v14, %v1369_v19  ;;  %v460_v32 = vadd.f32 %v1219_v6, %v424_v22  ;;  %v462_v34 = vadd.f32 %v1219_v6, %v426_v23  ;;  %v1050_v47 = vunpack.c.h.bf16 %v1089_v57 }
  0x39   : > { %v1376_v30 = vmax.f32 %v553_v21, 0.0  ;;  %v425_v35 = vmul.f32 %v1211_v0, %v986_v25  ;;  %v427_v36 = vmul.f32 %v1211_v0, %v990_v26  ;;  %v1385_v46 = vmax.f32 %v555_v29, 0.0 }
  0x3a   : > { %688 = vst.msk [vmem:[#allocation2 + $0x50] sm:$0xff] %vm677_vm0, %v671_v27  ;;  %v1054_v48 = vunpack.c.h.bf16 %v1090_v4  ;;  %v556_v51 = vadd.f32 %v1049_v18, %v460_v32  ;;  %v558_v54 = vadd.f32 %v1053_v24, %v462_v34  ;;  %v993_v59 = vunpack.c.l.bf16 %v1076_v42 }
  0x3b   : > { %v461_v55 = vadd.f32 %v1219_v6, %v425_v35  ;;  %v463_v56 = vadd.f32 %v1219_v6, %v427_v36  ;;  %v672_v58 = vmax.f32 %v1376_v30, %v1385_v46  ;;  %v997_v60 = vunpack.c.l.bf16 %v1077_v44 }
  0x3c   : > { %v1393_v61 = vmax.f32 %v556_v51, 0.0  ;;  %v1395_v62 = vmax.f32 %v558_v54, 0.0  ;;  %v428_v3 = vmul.f32 %v1211_v0, %v993_v59  ;;  %v1057_v5 = vunpack.c.l.bf16 %v1091_v49  ;;  %v712_v59 = vld [vmem:[#allocation2 + $0x11] ss:$2 sm:$0xff] }
  0x3d   : > { %v557_v63 = vadd.f32 %v1050_v47, %v461_v55  ;;  %v559_v57 = vadd.f32 %v1054_v48, %v463_v56  ;;  %689 = vst.msk [vmem:[#allocation2 + $0x58] sm:$0xff] %vm677_vm0, %v672_v58  ;;  %v430_v4 = vmul.f32 %v1211_v0, %v997_v60  ;;  %v1061_v9 = vunpack.c.l.bf16 %v1092_v50  ;;  %v710_v56 = vld [vmem:[#allocation2 + $0x1] ss:$2 sm:$0xff]  ;;  %v696_v58 = vld [vmem:[#allocation2 + $0x10] ss:$2 sm:$0xff] }
  0x3e   : > { %v673_v10 = vmax.f32 %v1393_v61, %v1395_v62  ;;  %v464_v18 = vadd.f32 %v1219_v6, %v428_v3  ;;  %v994_v21 = vunpack.c.h.bf16 %v1076_v42  ;;  %v596_v22 = vpack.c.bf16 %v1238_v39, %v1238_v39 }
  0x3f   : > { %v1402_v13 = vmax.f32 %v557_v63, 0.0  ;;  %v1404_v17 = vmax.f32 %v559_v57, 0.0  ;;  %v466_v20 = vadd.f32 %v1219_v6, %v430_v4  ;;  %v598_v23 = vpack.c.bf16 %v1240_v40, %v1240_v40  ;;  %v714_v63 = vld [vmem:[#allocation2 + $0x21] ss:$2 sm:$0xff]  ;;  %v716_v4 = vld [vmem:[#allocation2 + $0x31] ss:$2 sm:$0xff] }
  0x40   : > { %v597_v24 = vpack.c.bf16 %v1242_v41, %v1242_v41  ;;  %690 = vst.msk [vmem:[#allocation2 + $0x60] sm:$0xff] %vm677_vm0, %v673_v10  ;;  %v998_v25 = vunpack.c.h.bf16 %v1077_v44  ;;  %v560_v27 = vadd.f32 %v1057_v5, %v464_v18  ;;  %v1058_v29 = vunpack.c.h.bf16 %v1091_v49  ;;  %v702_v10 = vld [vmem:[#allocation2 + $0x40] ss:$2 sm:$0xff] }
  0x41   : > { %v674_v26 = vmax.f32 %v1402_v13, %v1404_v17  ;;  %v562_v39 = vadd.f32 %v1061_v9, %v466_v20  ;;  %v429_v40 = vmul.f32 %v1211_v0, %v994_v21  ;;  %v1062_v32 = vunpack.c.h.bf16 %v1092_v50  ;;  %629 = vst.msk [vmem:[%s1419_s10] sm:$0xf] %vm628_vm1, %v596_v22 }
  0x42   : > { %v431_v41 = vmul.f32 %v1211_v0, %v998_v25  ;;  %v1426_v34 = vmax.f32 %v560_v27, 0.0  ;;  %v599_v36 = vpack.c.bf16 %v1245_v43, %v1245_v43  ;;  %v600_v0 = vpack.c.bf16 %v1265_v7, %v1265_v7  ;;  %630 = vst.msk [vmem:[%s1419_s10 + $0x4] sm:$0xf] %vm628_vm1, %v597_v24 }
  0x43   : > { %691 = vst.msk [vmem:[#allocation2 + $0x68] sm:$0xff] %vm677_vm0, %v674_v26  ;;  %v1428_v35 = vmax.f32 %v562_v39, 0.0  ;;  %v465_v42 = vadd.f32 %v1219_v6, %v429_v40  ;;  %v601_v43 = vpack.c.bf16 %v1271_v11, %v1271_v11  ;;  %v603_v11 = vpack.c.bf16 %v1273_v12, %v1273_v12 }
  0x44   : > { %v467_v44 = vadd.f32 %v1219_v6, %v431_v41  ;;  %631 = vst.msk [vmem:[%s1419_s10 + $0x8] sm:$0xf] %vm628_vm1, %v598_v23  ;;  %v602_v6 = vpack.c.bf16 %v1267_v8, %v1267_v8  ;;  %v604_v51 = vpack.c.bf16 %v1290_v28, %v1290_v28  ;;  %v605_v54 = vpack.c.bf16 %v1294_v33, %v1294_v33  ;;  %v704_v20 = vld [vmem:[#allocation2 + $0x50] ss:$2 sm:$0xff]  ;;  %v720_v21 = vld [vmem:[#allocation2 + $0x51] ss:$2 sm:$0xff] }
  0x45   : > { %v675_v47 = vmax.f32 %v1426_v34, %v1428_v35  ;;  %v561_v48 = vadd.f32 %v1058_v29, %v465_v42  ;;  %632 = vst.msk [vmem:[%s1419_s10 + $0xc] sm:$0xf] %vm628_vm1, %v599_v36  ;;  %v606_v12 = vpack.c.bf16 %v1292_v31, %v1292_v31  ;;  %v607_v28 = vpack.c.bf16 %v1301_v45, %v1301_v45 }
  0x46   : > { %v563_v49 = vadd.f32 %v1062_v32, %v467_v44  ;;  %633 = vst.msk [vmem:[%s1419_s10 + $0x10] sm:$0xf] %vm628_vm1, %v600_v0  ;;  %v608_v55 = vpack.c.bf16 %v1316_v1, %v1316_v1  ;;  %v609_v33 = vpack.c.bf16 %v1324_v15, %v1324_v15  ;;  %v610_v31 = vpack.c.bf16 %v1318_v2, %v1318_v2 }
  0x47   : > { %692 = vst.msk [vmem:[#allocation2 + $0x70] sm:$0xff] %vm677_vm0, %v675_v47  ;;  %v1449_v7 = vmax.f32 %v561_v48, 0.0  ;;  %v611_v45 = vpack.c.bf16 %v1326_v16, %v1326_v16  ;;  %v612_v1 = vpack.c.bf16 %v1342_v37, %v1342_v37  ;;  %v613_v15 = vpack.c.bf16 %v1350_v52, %v1350_v52 }
  0x48   : > { %v1451_v50 = vmax.f32 %v563_v49, 0.0  ;;  %634 = vst.msk [vmem:[%s1419_s10 + $0x14] sm:$0xf] %vm628_vm1, %v601_v43  ;;  %v614_v2 = vpack.c.bf16 %v1344_v38, %v1344_v38  ;;  %v615_v16 = vpack.c.bf16 %v1352_v53, %v1352_v53  ;;  %v616_v37 = vpack.c.bf16 %v1367_v14, %v1367_v14 }
  0x49   : > { %635 = vst.msk [vmem:[%s1419_s10 + $0x18] sm:$0xf] %vm628_vm1, %v602_v6  ;;  %v617_v52 = vpack.c.bf16 %v1376_v30, %v1376_v30  ;;  %v618_v38 = vpack.c.bf16 %v1369_v19, %v1369_v19  ;;  %v619_v53 = vpack.c.bf16 %v1385_v46, %v1385_v46  ;;  %v620_v14 = vpack.c.bf16 %v1393_v61, %v1393_v61  ;;  %v694_v19 = vld [vmem:[#allocation2] ss:$2 sm:$0xff] }
  0x4a   : > { %v676_v8 = vmax.f32 %v1449_v7, %v1451_v50  ;;  %636 = vst.msk [vmem:[%s1419_s10 + $0x1c] sm:$0xf] %vm628_vm1, %v603_v11  ;;  %v621_v30 = vpack.c.bf16 %v1402_v13, %v1402_v13  ;;  %v622_v46 = vpack.c.bf16 %v1395_v62, %v1395_v62  ;;  %v623_v60 = vpack.c.bf16 %v1404_v17, %v1404_v17  ;;  %v698_v61 = vld [vmem:[#allocation2 + $0x20] ss:$2 sm:$0xff]  ;;  %v700_v62 = vld [vmem:[#allocation2 + $0x30] ss:$2 sm:$0xff] }
  0x4b   : > { %637 = vst.msk [vmem:[%s1419_s10 + $0x20] sm:$0xf] %vm628_vm1, %v604_v51  ;;  %v624_v57 = vpack.c.bf16 %v1426_v34, %v1426_v34  ;;  %v725_v3 = vmax.f32 %v694_v19, %v710_v56  ;;  %v625_v5 = vpack.c.bf16 %v1449_v7, %v1449_v7  ;;  %v726_v9 = vmax.f32 %v696_v58, %v712_v59  ;;  %v718_v13 = vld [vmem:[#allocation2 + $0x41] ss:$2 sm:$0xff]  ;;  %v706_v24 = vld [vmem:[#allocation2 + $0x60] ss:$2 sm:$0xff] }
  0x4c   : > { %693 = vst.msk [vmem:[#allocation2 + $0x78] sm:$0xff] %vm677_vm0, %v676_v8  ;;  %v626_v17 = vpack.c.bf16 %v1428_v35, %v1428_v35  ;;  %v727_v18 = vmax.f32 %v698_v61, %v714_v63  ;;  %v627_v22 = vpack.c.bf16 %v1451_v50, %v1451_v50  ;;  %v728_v23 = vmax.f32 %v700_v62, %v716_v4  ;;  %v722_v25 = vld [vmem:[#allocation2 + $0x61] ss:$2 sm:$0xff] }
  0x4d   : > { %638 = vst.msk [vmem:[%s1419_s10 + $0x24] sm:$0xf] %vm628_vm1, %v605_v54  ;;  %v733_v26 = vpack.c.bf16 %v725_v3, %v725_v3  ;;  %v729_v27 = vmax.f32 %v702_v10, %v718_v13  ;;  %v734_v40 = vpack.c.bf16 %v726_v9, %v726_v9  ;;  %v730_v41 = vmax.f32 %v704_v20, %v720_v21 }
  0x4e   : > { %639 = vst.msk [vmem:[%s1419_s10 + $0x28] sm:$0xf] %vm628_vm1, %v606_v12  ;;  %v735_v32 = vpack.c.bf16 %v727_v18, %v727_v18  ;;  %v731_v34 = vmax.f32 %v706_v24, %v722_v25  ;;  %v736_v35 = vpack.c.bf16 %v728_v23, %v728_v23 }
  0x4f   : > { %640 = vst.msk [vmem:[%s1419_s10 + $0x2c] sm:$0xf] %vm628_vm1, %v607_v28  ;;  %v737_v42 = vpack.c.bf16 %v729_v27, %v729_v27  ;;  %v738_v44 = vpack.c.bf16 %v730_v41, %v730_v41 }
  0x50   : > { %641 = vst.msk [vmem:[%s1419_s10 + $0x30] sm:$0xf] %vm628_vm1, %v608_v55  ;;  %v739_v0 = vpack.c.bf16 %v731_v34, %v731_v34 }
  0x51   : > { %642 = vst.msk [vmem:[%s1419_s10 + $0x34] sm:$0xf] %vm628_vm1, %v609_v33 }
  0x52   : > { %643 = vst.msk [vmem:[%s1419_s10 + $0x38] sm:$0xf] %vm628_vm1, %v610_v31 }
  0x53   : > { %644 = vst.msk [vmem:[%s1419_s10 + $0x3c] sm:$0xf] %vm628_vm1, %v611_v45  ;;  %v708_v39 = vld [vmem:[#allocation2 + $0x70] ss:$2 sm:$0xff]  ;;  %v724_v29 = vld [vmem:[#allocation2 + $0x71] ss:$2 sm:$0xff] }
  0x54   : > { %645 = vst.msk [vmem:[%s1419_s10 + $0x40] sm:$0xf] %vm628_vm1, %v612_v1  ;;  %v732_v36 = vmax.f32 %v708_v39, %v724_v29 }
  0x55   : > { %646 = vst.msk [vmem:[%s1419_s10 + $0x44] sm:$0xf] %vm628_vm1, %v613_v15 }
  0x56   : > { %647 = vst.msk [vmem:[%s1419_s10 + $0x48] sm:$0xf] %vm628_vm1, %v614_v2  ;;  %v740_v47 = vpack.c.bf16 %v732_v36, %v732_v36 }
  0x57   : > { %648 = vst.msk [vmem:[%s1419_s10 + $0x4c] sm:$0xf] %vm628_vm1, %v615_v16 }
  0x58   : > { %649 = vst.msk [vmem:[%s1419_s10 + $0x50] sm:$0xf] %vm628_vm1, %v616_v37 }
  0x59   : > { %650 = vst.msk [vmem:[%s1419_s10 + $0x54] sm:$0xf] %vm628_vm1, %v617_v52 }
  0x5a   : > { %651 = vst.msk [vmem:[%s1419_s10 + $0x58] sm:$0xf] %vm628_vm1, %v618_v38 }
  0x5b   : > { %652 = vst.msk [vmem:[%s1419_s10 + $0x5c] sm:$0xf] %vm628_vm1, %v619_v53 }
  0x5c   : > { %653 = vst.msk [vmem:[%s1419_s10 + $0x60] sm:$0xf] %vm628_vm1, %v620_v14 }
  0x5d   : > { %654 = vst.msk [vmem:[%s1419_s10 + $0x64] sm:$0xf] %vm628_vm1, %v621_v30 }
  0x5e   : > { %655 = vst.msk [vmem:[%s1419_s10 + $0x68] sm:$0xf] %vm628_vm1, %v622_v46 }
  0x5f   : > { %656 = vst.msk [vmem:[%s1419_s10 + $0x6c] sm:$0xf] %vm628_vm1, %v623_v60 }
  0x60   : > { %657 = vst.msk [vmem:[%s1419_s10 + $0x70] sm:$0xf] %vm628_vm1, %v624_v57 }
  0x61   : > { %658 = vst.msk [vmem:[%s1419_s10 + $0x74] sm:$0xf] %vm628_vm1, %v625_v5 }
  0x62   : > { %659 = vst.msk [vmem:[%s1419_s10 + $0x78] sm:$0xf] %vm628_vm1, %v626_v17 }
  0x63   : > { %660 = vst.msk [vmem:[%s1419_s10 + $0x7c] sm:$0xf] %vm628_vm1, %v627_v22 }
  0x64   : > { %741 = vst.msk [vmem:[%s330_s14] sm:$0xf] %vm628_vm1, %v733_v26 }
  0x65   : > { %742 = vst.msk [vmem:[%s330_s14 + $0x4] sm:$0xf] %vm628_vm1, %v734_v40 }
  0x66   : > { %743 = vst.msk [vmem:[%s330_s14 + $0x8] sm:$0xf] %vm628_vm1, %v735_v32 }
  0x67   : > { %744 = vst.msk [vmem:[%s330_s14 + $0xc] sm:$0xf] %vm628_vm1, %v736_v35 }
  0x68   : > { %745 = vst.msk [vmem:[%s330_s14 + $0x10] sm:$0xf] %vm628_vm1, %v737_v42 }
  0x69   : > { %746 = vst.msk [vmem:[%s330_s14 + $0x14] sm:$0xf] %vm628_vm1, %v738_v44 }
  0x6a   : > { %747 = vst.msk [vmem:[%s330_s14 + $0x18] sm:$0xf] %vm628_vm1, %v739_v0 }
  0x6b   : > { %748 = vst.msk [vmem:[%s330_s14 + $0x1c] sm:$0xf] %vm628_vm1, %v740_v47 }
  0x6c PF: > { %s16_s20 = sadd.s32 1, %s1141_s20   ;;  %s1593_s18 = smov %s1137_s19 }
  0x6d   : > { %p13_p5 = scmp.ge.s32.totalorder %s16_s20, 4   ;;  %s1594_s19 = smov %s1596_s21 }
  0x6f   :  { %15 = sbr.rel (!%p13_p5) target bundleno = 2 (0x2), region = 96 }

// kernel: down_conv_forward.6
= control target key start
LH: loop header
LB: loop body
LE: loop exit
PB: predicated region body
PF: predicated region fallthrough
CT: control target
= control target key end

     0   :  { %s2427_s21 = smov 0   ;;  %s2429_s22 = smov 0   ;;  %s3092_s0 = inlined_call_operand.vmem [shape: bf16[2,16,16,8], index: 0, kind: input, shape index: {}, may-alias: {0,1,2}]   ;;  %s3093_s1 = inlined_call_operand.vmem [shape: bf16[2,16,16,8], index: 1, kind: input, shape index: {}, may-alias: {0,1,2}]   ;;  %s3094_s2 = inlined_call_operand.vmem [shape: bf16[2,16,16,8], index: 2, kind: input, shape index: {}, may-alias: {0,1,2}]   ;;  %s3095_s3 = inlined_call_operand.vmem [shape: bf16[2,16,16,8], index: 3, kind: input, shape index: {}, may-alias: {3,4,5}]   ;;  %s3096_s4 = inlined_call_operand.vmem [shape: bf16[2,16,16,8], index: 4, kind: input, shape index: {}, may-alias: {3,4,5}]   ;;  %s3097_s5 = inlined_call_operand.vmem [shape: bf16[2,16,16,8], index: 5, kind: input, shape index: {}, may-alias: {3,4,5}]   ;;  %s3098_s6 = inlined_call_operand.vmem [shape: f32[1,8], index: 6, kind: input, shape index: {}]   ;;  %s3099_s7 = inlined_call_operand.vmem [shape: f32[1,8], index: 7, kind: input, shape index: {}]   ;;  %s3100_s8 = inlined_call_operand.vmem [shape: bf16[72,8], index: 8, kind: input, shape index: {}]   ;;  %s3101_s9 = inlined_call_operand.vmem [shape: f32[1,8], index: 9, kind: input, shape index: {}]   ;;  %s3102_s10 = inlined_call_operand.vmem [shape: bf16[512,8], index: 10, kind: output, shape index: {0}]   ;;  %s3103_s11 = inlined_call_operand.vmem [shape: bf16[2,16,16,8], index: 11, kind: output, shape index: {1}]   ;;  %s3104_s12 = inlined_call_operand.vmem [shape: f32[2,2,2,8], index: 12, kind: output, shape index: {2}]  }
   0x1   :  { %s2431_s23 = smov 0   ;;  %s2433_s24 = smov 0  }
   0x2   :  { %s2435_s25 = smov 0  }
   0x3 LB: > { %3106 = sst [smem:[#allocation3_spill]] %s2352_s24  ;;  %s32_s26 = sadd.s32 1, %s2348_s23  ;;  %s2356_s25 = sphi %s2435_s25, %s23_s25   ;;  %s2352_s24 = sphi %s2433_s24, %s3118_s24   ;;  %s2348_s23 = sphi %s2431_s23, %s3120_s23   ;;  %s2344_s22 = sphi %s2429_s22, %s3116_s22   ;;  %s2340_s21 = sphi %s2427_s21, %s3119_s21  }
   0x4   : > { %s35_s27 = sadd.s32 1, %s2352_s24  ;;  %p33_p0 = scmp.ge.s32.totalorder %s32_s26, 2 }
   0x5   : > { %p2076_p1 = scmp.ge.s32.totalorder %s2356_s25, 1  ;;  %p541_p2 = scmp.lt.s32.totalorder %s2356_s25, 5 }
   0x6   : > { %s3122_s26 = smov (%p33_p0, %s32_s26), 0  ;;  %s3124_s27 = smov (!%p33_p0, %s35_s27), %s2352_s24 }
   0x7   : > { %3107 = sst [smem:[#allocation4_spill]] %s3122_s26  ;;  %p542_p3 = pnand %p2076_p1, %p541_p2 }
   0x8   : > { %p37_p4 = scmp.ge.s32.totalorder %s3124_s27, 2  ;;  %s2462_s28 = sshll.u32 (!%p542_p3), %s2340_s21, 3 }
   0x9   : > { %545 = sbr.rel (%p542_p3) target bundleno = 517 (0x205), region = 60  ;;  %p671_p5 = scmp.lt.s32.totalorder (!%p542_p3), %s2344_s22, 1 }
   0xa   : > { %s3126_s27 = smov (%p37_p4, %s3124_s27), 0  ;;  %p673_p6 = scmp.lt.s32.totalorder (!%p542_p3), %s2462_s28, 15 }
   0xb   : > { %3108 = sst [smem:[#allocation5_spill]] %s3126_s27  ;;  %s2515_s24 = sadd.s32 (!%p542_p3), 4294967295, %s2462_s28 }
   0xc   : > { %p683_p7 = scmp.gt.s32.totalorder (!%p542_p3), %s2515_s24, 0  ;;  %p2083_p8 = scmp.lt.s32.totalorder (!%p542_p3), %s2515_s24, 15 }
   0xd   : > { %p791_p10 = scmp.eq.s32.totalorder (!%p542_p3), %s2340_s21, 1  ;;  %p790_p11 = scmp.eq.s32.totalorder (!%p542_p3), %s2340_s21, 0 }
   0xe   : > { %s2467_s29 = scalar_select %p671_p5, %s2344_s22, 1  ;;  %v2491_v0 = vld [vmem:[%s3098_s6] ss:$0 sm:$0xff]  ;;  %vm944_vm0 = vcmask 60416   ;;  %vm1147_vm1 = vcmask 1040384   ;;  %vm1299_vm3 = vcmask 1046528  }
   0xf   : > { %s674_s30 = scalar_select %p673_p6, %s2462_s28, 15  ;;  %v2496_v1 = vld [vmem:[%s3099_s7] ss:$0 sm:$0xff]  ;;  %vm1148_vm2 = vsmask.f32 256  ;;  %vm1340_vm8 = vcmask 64512  }
  0x10   : > { %s2471_s13 = sshll.u32 %s2467_s29, 5  ;;  %vm2558_vm4 = vmand %vm1147_vm1, %vm1148_vm2  ;;  %vm1170_vm5 = vsmask.f32 7424  ;;  %vm1357_vm9 = vcmask 130048   ;;  %vm1556_vm10 = vcmask 1043456   ;;  %vm1482_vm11 = vcmask 392192  }
  0x11   : > { %s2078_s14 = sshll.u32 %s674_s30, 1  ;;  %vm1465_vm12 = vcmask 195584   ;;  %vm1539_vm13 = vcmask 588800   ;;  %p783_p13 = scmp.lt.s32.totalorder %s2340_s21, 1  ;;  %vm1733_vm14 = vcmask 58368  }
  0x12   : > { %s677_s15 = sadd.s32 %s2471_s13, %s2078_s14  ;;  %s699_s14 = sadd.s32 8, %s2462_s28 }
  0x13   : > { %s2474_s16 = sshll.u32 %s677_s15, 2  ;;  %s2358_s15 = smov 16  }
  0x14   : > { %s2480_s19 = scalar_lea.vmem %s3092_s0, %s2474_s16  ;;  %s2486_s26 = scalar_lea.vmem %s3095_s3, %s2474_s16 }
  0x15   : > { %v2243_v2 = vld [vmem:[%s2480_s19 + $0x10] sm:$0xff]   ;;  %v2163_v4 = vld [vmem:[%s2480_s19] sm:$0xff]   ;;  %v2242_v10 = vld [vmem:[%s2480_s19 + $0x8] sm:$0xff]   ;;  %s2526_s18 = scalar_lea.vmem %s3103_s11, %s2474_s16  ;;  %p2605_p9 = scmp.lt.s32.totalorder %s699_s14, 15 }
  0x16   : > { %v2250_v3 = vld [vmem:[%s2486_s26 + $0x10] sm:$0xff]   ;;  %v2172_v5 = vunpack.c.l.bf16 %v2243_v2  ;;  %v2173_v6 = vunpack.c.h.bf16 %v2243_v2  ;;  %v2195_v9 = vld [vmem:[%s2486_s26] sm:$0xff]   ;;  %v2249_v11 = vld [vmem:[%s2486_s26 + $0x8] sm:$0xff]   ;;  %v2164_v12 = vunpack.c.l.bf16 %v2163_v4  ;;  %v2165_v13 = vunpack.c.h.bf16 %v2163_v4  ;;  %s684_s16 = scalar_select %p683_p7, %s2515_s24, 0 }
  0x17   : > { %v2204_v7 = vunpack.c.l.bf16 %v2250_v3  ;;  %v2205_v8 = vunpack.c.h.bf16 %v2250_v3  ;;  %v2196_v14 = vunpack.c.l.bf16 %v2195_v9  ;;  %v2197_v15 = vunpack.c.h.bf16 %v2195_v9  ;;  %v2244_v20 = vld [vmem:[%s2480_s19 + $0x18] sm:$0xff]   ;;  %v2245_v57 = vld [vmem:[%s2480_s19 + $0x20] sm:$0xff]   ;;  %s3130_s14 = smov (!%p2605_p9, %s699_s14), 15  ;;  %s2359_s28 = smov 8  }
  0x18   : > { %v849_v16 = vmul.f32 %v2491_v0, %v2172_v5  ;;  %v850_v17 = vmul.f32 %v2491_v0, %v2173_v6  ;;  %v2168_v18 = vunpack.c.l.bf16 %v2242_v10  ;;  %v2169_v19 = vunpack.c.h.bf16 %v2242_v10  ;;  %v2251_v29 = vld [vmem:[%s2486_s26 + $0x18] sm:$0xff]   ;;  %v2542_v4 = vld [vmem:[%s2486_s26 + $0x20] sm:$0xff]   ;;  %s3128_s16 = smov (!%p2083_p8, %s684_s16), 15  ;;  %s3132_s14 = smov (!%p2605_p9, %s3130_s14), 15 }
  0x19   : > { %v845_v21 = vmul.f32 %v2491_v0, %v2164_v12  ;;  %v846_v22 = vmul.f32 %v2491_v0, %v2165_v13  ;;  %v2200_v23 = vunpack.c.l.bf16 %v2249_v11  ;;  %v2201_v24 = vunpack.c.h.bf16 %v2249_v11  ;;  %s2088_s20 = sshll.u32 %s3128_s16, 1  ;;  %s2650_s27 = sshll.u32 %s3132_s14, 1 }
  0x1a   : > { %v868_v25 = vadd.f32 %v2496_v1, %v849_v16  ;;  %v869_v26 = vadd.f32 %v2496_v1, %v850_v17  ;;  %v847_v27 = vmul.f32 %v2491_v0, %v2168_v18  ;;  %v848_v28 = vmul.f32 %v2491_v0, %v2169_v19  ;;  %s2554_s30 = sadd.s32 %s2088_s20, %s2471_s13  ;;  %s708_s17 = sadd.s32 %s2650_s27, %s2471_s13 }
  0x1b   : > { %v864_v30 = vadd.f32 %v2496_v1, %v845_v21  ;;  %v865_v31 = vadd.f32 %v2496_v1, %v846_v22  ;;  %v2176_v32 = vunpack.c.l.bf16 %v2244_v20  ;;  %v2177_v39 = vunpack.c.h.bf16 %v2244_v20  ;;  %s2670_s13 = sshll.u32 %s708_s17, 2  ;;  %s2090_s17 = sshll.u32 %s2554_s30, 2 }
  0x1c   : > { %v900_v33 = vadd.f32 %v2204_v7, %v868_v25  ;;  %v901_v34 = vadd.f32 %v2205_v8, %v869_v26  ;;  %v866_v35 = vadd.f32 %v2496_v1, %v847_v27  ;;  %v867_v36 = vadd.f32 %v2496_v1, %v848_v28  ;;  %s710_s14 = scalar_lea.vmem %s3094_s2, %s2670_s13  ;;  %s755_s27 = scalar_lea.vmem %s3097_s5, %s2670_s13 }
  0x1d   : > { %v896_v37 = vadd.f32 %v2196_v14, %v864_v30  ;;  %v897_v38 = vadd.f32 %v2197_v15, %v865_v31  ;;  %v2208_v40 = vunpack.c.l.bf16 %v2251_v29  ;;  %v2209_v47 = vunpack.c.h.bf16 %v2251_v29  ;;  %s693_s16 = scalar_lea.vmem %s3093_s1, %s2090_s17 }
  0x1e   : > { %v916_v41 = vmax.f32 %v900_v33, 0.0  ;;  %v917_v42 = vmax.f32 %v901_v34, 0.0  ;;  %v898_v43 = vadd.f32 %v2200_v23, %v866_v35  ;;  %v899_v44 = vadd.f32 %v2201_v24, %v867_v36  ;;  %s997_s30 = scalar_select %p790_p11, 1, 0 }
  0x1f   : > { %v912_v45 = vmax.f32 %v896_v37, 0.0  ;;  %v913_v46 = vmax.f32 %v897_v38, 0.0  ;;  %v851_v48 = vmul.f32 %v2491_v0, %v2176_v32  ;;  %v852_v55 = vmul.f32 %v2491_v0, %v2177_v39 }
  0x20   : > { %v932_v49 = vpack.c.bf16 %v916_v41, %v916_v41  ;;  %v933_v50 = vpack.c.bf16 %v917_v42, %v917_v42  ;;  %v914_v51 = vmax.f32 %v898_v43, 0.0  ;;  %v915_v52 = vmax.f32 %v899_v44, 0.0 }
  0x21   : > { %v928_v53 = vpack.c.bf16 %v912_v45, %v912_v45  ;;  %v929_v54 = vpack.c.bf16 %v913_v46, %v913_v46  ;;  %v870_v56 = vadd.f32 %v2496_v1, %v851_v48  ;;  %v871_v2 = vadd.f32 %v2496_v1, %v852_v55 }
  0x22   : > { %950 = vst.msk [vmem:[%s2526_s18 + $0x14] sm:$0xf] %vm944_vm0, %v933_v50  ;;  %v1033_v58 = vunpack.c.l.b16 %v932_v49  ;;  %v1034_v59 = vunpack.c.l.b16 %v933_v50  ;;  %v930_v60 = vpack.c.bf16 %v914_v51, %v914_v51  ;;  %v931_v61 = vpack.c.bf16 %v915_v52, %v915_v52 }
  0x23   : > { %949 = vst.msk [vmem:[%s2526_s18 + $0x10] sm:$0xf] %vm944_vm0, %v932_v49  ;;  %v1029_v62 = vunpack.c.l.b16 %v928_v53  ;;  %v1030_v63 = vunpack.c.l.b16 %v929_v54  ;;  %v902_v3 = vadd.f32 %v2208_v40, %v870_v56  ;;  %v2180_v8 = vunpack.c.l.bf16 %v2245_v57 }
  0x24   : > { %v1050_v5 = vpack.c.b16 %v1034_v59, %v1033_v58  ;;  %946 = vst.msk [vmem:[%s2526_s18 + $0x4] sm:$0xf] %vm944_vm0, %v929_v54  ;;  %v1031_v6 = vunpack.c.l.b16 %v930_v60  ;;  %v1032_v7 = vunpack.c.l.b16 %v931_v61  ;;  %v903_v10 = vadd.f32 %v2209_v47, %v871_v2 }
  0x25   : > { %v1048_v9 = vpack.c.b16 %v1030_v63, %v1029_v62  ;;  %945 = vst.msk [vmem:[%s2526_s18] sm:$0xf] %vm944_vm0, %v928_v53  ;;  %v918_v11 = vmax.f32 %v902_v3, 0.0  ;;  %v2181_v12 = vunpack.c.h.bf16 %v2245_v57  ;;  %v2212_v16 = vunpack.c.l.bf16 %v2542_v4 }
  0x26   : > { %v1079_v13 = vshrl.u32 %v1050_v5, 16  ;;  %v1082_v14 = vshll.u32 %v1050_v5, 16  ;;  %947 = vst.msk [vmem:[%s2526_s18 + $0x8] sm:$0xf] %vm944_vm0, %v930_v60  ;;  %v1049_v15 = vpack.c.b16 %v1032_v7, %v1031_v6  ;;  %v919_v20 = vmax.f32 %v903_v10, 0.0 }
  0x27   : > { %v1065_v18 = vshrl.u32 %v1048_v9, 16  ;;  %v1068_v19 = vshll.u32 %v1048_v9, 16  ;;  %948 = vst.msk [vmem:[%s2526_s18 + $0xc] sm:$0xf] %vm944_vm0, %v931_v61  ;;  %v934_v21 = vpack.c.bf16 %v918_v11, %v918_v11  ;;  %v2213_v25 = vunpack.c.h.bf16 %v2542_v4 }
  0x28   : > { %v1081_v22 = vrot.slane %v1079_v13, 7  ;;  %v1072_v23 = vshrl.u32 %v1049_v15, 16  ;;  %v1075_v24 = vshll.u32 %v1049_v15, 16  ;;  %v935_v27 = vpack.c.bf16 %v919_v20, %v919_v20 }
  0x29   : > { %v1067_v26 = vrot.slane %v1065_v18, 7  ;;  %v1035_v28 = vunpack.c.l.b16 %v934_v21  ;;  %951 = vst.msk [vmem:[%s2526_s18 + $0x18] sm:$0xf] %vm944_vm0, %v934_v21  ;;  %v853_v29 = vmul.f32 %v2491_v0, %v2180_v8  ;;  %v854_v33 = vmul.f32 %v2491_v0, %v2181_v12  ;;  %v2246_v12 = vld [vmem:[%s2480_s19 + $0x28] sm:$0xff]  }
  0x2a   : > { %v1084_v30 = vor.u32 %v1082_v14, %v1081_v22  ;;  %v2570_v31 = vsel %vm2558_vm4, %v1081_v22, 0  ;;  %v1074_v32 = vrot.slane %v1072_v23, 7  ;;  %952 = vst.msk [vmem:[%s2526_s18 + $0x1c] sm:$0xf] %vm944_vm0, %v935_v27  ;;  %v1036_v37 = vunpack.c.l.b16 %v935_v27 }
  0x2b   : > { %v1310_v34 = vrot.slane %v2570_v31, 1  ;;  %v1070_v35 = vor.u32 %v1068_v19, %v1067_v26  ;;  %v1161_v36 = vsel %vm2558_vm4, %v1067_v26, 0  ;;  %v872_v56 = vadd.f32 %v2496_v1, %v853_v29 }
  0x2c   : > { %v2580_v38 = vsel %vm2558_vm4, 0, %v1084_v30  ;;  %v1304_v39 = vrot.slane %v1161_v36, 1  ;;  %v1077_v40 = vor.u32 %v1075_v24, %v1074_v32  ;;  %v1162_v41 = vsel %vm2558_vm4, %v1074_v32, 0 }
  0x2d   : > { %v1309_v42 = vrot.slane %v2580_v38, 1  ;;  %v2587_v43 = vsel %vm2558_vm4, 0, %v1070_v35  ;;  %v1307_v44 = vrot.slane %v1162_v41, 1  ;;  %v1191_v45 = vshll.u32 %v1161_v36, 16 }
  0x2e   : > { %v1303_v46 = vrot.slane %v2587_v43, 1  ;;  %v2593_v47 = vsel %vm2558_vm4, 0, %v1077_v40  ;;  %v1184_v48 = vshrl.u32 %v2587_v43, 16  ;;  %v1186_v49 = vshll.u32 %v2587_v43, 16 }
  0x2f   : > { %v1311_v50 = vsel %vm1299_vm3, %v1309_v42, %v1310_v34  ;;  %v1306_v51 = vrot.slane %v2593_v47, 1  ;;  %v1193_v52 = vrot.slane %v1191_v45, 1  ;;  %v1051_v53 = vpack.c.b16 %v1036_v37, %v1035_v28 }
  0x30   : > { %1330 = vrot.lane.b32.xlu0 %v1311_v50, %s2358_s15  ;;  %v1305_v54 = vsel %vm1299_vm3, %v1303_v46, %v1304_v39  ;;  %v1188_v55 = vrot.slane %v1186_v49, 1  ;;  %v873_v57 = vadd.f32 %v2496_v1, %v854_v33  ;;  %v1196_v61 = vshrl.u32 %v2593_v47, 16  ;;  %v2247_v33 = vld [vmem:[%s2480_s19 + $0x30] sm:$0xff]  }
  0x31   : > { %1326 = vrot.lane.b32.xlu1 %v1305_v54, %s2358_s15  ;;  %v1308_v58 = vsel %vm1299_vm3, %v1306_v51, %v1307_v44  ;;  %v1086_v59 = vshrl.u32 %v1051_v53, 16  ;;  %v1089_v60 = vshll.u32 %v1051_v53, 16  ;;  %v904_v63 = vadd.f32 %v2212_v16, %v872_v56  ;;  %v2254_v49 = vld [vmem:[%s2486_s26 + $0x30] sm:$0xff]  }
  0x32   : > { %v1189_v62 = vor.u32 %v1188_v55, %v1184_v48  ;;  %v905_v2 = vadd.f32 %v2213_v25, %v873_v57  ;;  %v1198_v3 = vshll.u32 %v2593_v47, 16  ;;  %v1203_v5 = vshll.u32 %v1162_v41, 16  ;;  %v2253_v25 = vld [vmem:[%s2486_s26 + $0x28] sm:$0xff]  }
  0x33   : > { %v1088_v4 = vrot.slane %v1086_v59, 7  ;;  %v1208_v6 = vshrl.u32 %v2580_v38, 16  ;;  %v1210_v7 = vshll.u32 %v2580_v38, 16  ;;  %v920_v9 = vmax.f32 %v904_v63, 0.0 }
  0x34   : > { %v1194_v8 = vsel %vm1170_vm5, %v1189_v62, %v1193_v52  ;;  %v921_v10 = vmax.f32 %v905_v2, 0.0  ;;  %v1200_v11 = vrot.slane %v1198_v3, 1  ;;  %v1205_v15 = vrot.slane %v1203_v5, 1 }
  0x35   : > { %v1091_v13 = vor.u32 %v1089_v60, %v1088_v4  ;;  %v1164_v14 = vsel %vm2558_vm4, %v1088_v4, 0  ;;  %v1212_v16 = vrot.slane %v1210_v7, 1  ;;  %v936_v19 = vpack.c.bf16 %v920_v9, %v920_v9  ;;  %v2248_v4 = vld [vmem:[%s2480_s19 + $0x38] sm:$0xff]   ;;  %s2681_s19 = scalar_select %p791_p10, 1, 0 }
  0x36   : > { %v1313_v18 = vrot.slane %v1164_v14, 1  ;;  %v937_v20 = vpack.c.bf16 %v921_v10, %v921_v10  ;;  %v1201_v21 = vor.u32 %v1200_v11, %v1196_v61  ;;  %v1215_v23 = vshll.u32 %v2570_v31, 16 }
  0x37   : > { %v2627_v22 = vsel %vm2558_vm4, 0, %v1091_v13  ;;  %v2184_v24 = vunpack.c.l.bf16 %v2246_v12  ;;  %953 = vst.msk [vmem:[%s2526_s18 + $0x20] sm:$0xf] %vm944_vm0, %v936_v19  ;;  %v1037_v27 = vunpack.c.l.b16 %v936_v19  ;;  %v1213_v30 = vor.u32 %v1212_v16, %v1208_v6 }
  0x38   : > { %1269 = vrot.lane.b32.xlu0 %v1194_v8, %s2359_s28  ;;  %v1312_v26 = vrot.slane %v2627_v22, 1  ;;  %v1038_v28 = vunpack.c.l.b16 %v937_v20  ;;  %954 = vst.msk [vmem:[%s2526_s18 + $0x24] sm:$0xf] %vm944_vm0, %v937_v20  ;;  %v1206_v29 = vsel %vm1170_vm5, %v1201_v21, %v1205_v15  ;;  %v1217_v31 = vrot.slane %v1215_v23, 1 }
  0x39   : > { %1328 = vrot.lane.b32.xlu1 %v1308_v58, %s2358_s15  ;;  %v2185_v32 = vunpack.c.h.bf16 %v2246_v12  ;;  %v2216_v36 = vunpack.c.l.bf16 %v2253_v25  ;;  %v855_v37 = vmul.f32 %v2491_v0, %v2184_v24  ;;  %v2217_v39 = vunpack.c.h.bf16 %v2253_v25 }
  0x3a   : > { %v1314_v34 = vsel %vm1299_vm3, %v1312_v26, %v1313_v18  ;;  %v1052_v35 = vpack.c.b16 %v1038_v28, %v1037_v27  ;;  %v1222_v41 = vshll.u32 %v2627_v22, 16  ;;  %v1227_v42 = vshll.u32 %v1164_v14, 16  ;;  %v2255_v18 = vld [vmem:[%s2486_s26 + $0x38] sm:$0xff]   ;;  %s2360_s26 = smov 24  }
  0x3b   : > { %1332 = vrot.lane.b32.xlu2 %v1314_v34, %s2358_s15  ;;  %v856_v40 = vmul.f32 %v2491_v0, %v2185_v32  ;;  %v874_v46 = vadd.f32 %v2496_v1, %v855_v37  ;;  %v2188_v48 = vunpack.c.l.bf16 %v2247_v33  ;;  %v1220_v51 = vshrl.u32 %v2627_v22, 16 }
  0x3c   : > { %v1093_v44 = vshrl.u32 %v1052_v35, 16  ;;  %v1096_v45 = vshll.u32 %v1052_v35, 16  ;;  %v1224_v52 = vrot.slane %v1222_v41, 1  ;;  %v2189_v53 = vunpack.c.h.bf16 %v2247_v33  ;;  %v2235_v41 = vld [vmem:[%s710_s14] sm:$0xff]   ;;  %s738_s14 = scalar_lea.vmem %s3096_s4, %s2090_s17 }
  0x3d   : > { %v875_v50 = vadd.f32 %v2496_v1, %v856_v40  ;;  %v1218_v55 = vsel %vm1170_vm5, %v1213_v30, %v1217_v31  ;;  %v906_v56 = vadd.f32 %v2216_v36, %v874_v46  ;;  %v1229_v57 = vrot.slane %v1227_v42, 1  ;;  %v2239_v46 = vld [vmem:[%s755_s27] sm:$0xff]  }
  0x3e   : > { %v1095_v54 = vrot.slane %v1093_v44, 7  ;;  %v2220_v59 = vunpack.c.l.bf16 %v2254_v49  ;;  %v857_v60 = vmul.f32 %v2491_v0, %v2188_v48  ;;  %v858_v61 = vmul.f32 %v2491_v0, %v2189_v53 }
  0x3f   : > { %v907_v58 = vadd.f32 %v2217_v39, %v875_v50  ;;  %v922_v2 = vmax.f32 %v906_v56, 0.0  ;;  %v2221_v3 = vunpack.c.h.bf16 %v2254_v49  ;;  %v1225_v8 = vor.u32 %v1224_v52, %v1220_v51 }
  0x40   : > { %v1098_v62 = vor.u32 %v1096_v45, %v1095_v54  ;;  %v1165_v63 = vsel %vm2558_vm4, %v1095_v54, 0  ;;  %1271 = vrot.lane.b32.xlu0 %v1206_v29, %s2359_s28  ;;  %v876_v11 = vadd.f32 %v2496_v1, %v857_v60  ;;  %v877_v12 = vadd.f32 %v2496_v1, %v858_v61 }
  0x41   : > { %v1316_v5 = vrot.slane %v1165_v63, 1  ;;  %v1239_v6 = vshll.u32 %v1165_v63, 16  ;;  %v923_v7 = vmax.f32 %v907_v58, 0.0  ;;  %v938_v10 = vpack.c.bf16 %v922_v2, %v922_v2 }
  0x42   : > { %v2666_v9 = vsel %vm2558_vm4, 0, %v1098_v62  ;;  %v2192_v16 = vunpack.c.l.bf16 %v2248_v4  ;;  %v908_v21 = vadd.f32 %v2220_v59, %v876_v11  ;;  %v909_v23 = vadd.f32 %v2221_v3, %v877_v12 }
  0x43   : > { %v1315_v13 = vrot.slane %v2666_v9, 1  ;;  %1273 = vrot.lane.b32.xlu2 %v1218_v55, %s2359_s28  ;;  %v1232_v14 = vshrl.u32 %v2666_v9, 16  ;;  %v1234_v15 = vshll.u32 %v2666_v9, 16  ;;  %v939_v19 = vpack.c.bf16 %v923_v7, %v923_v7  ;;  %955 = vst.msk [vmem:[%s2526_s18 + $0x28] sm:$0xf] %vm944_vm0, %v938_v10 }
  0x44   : > { %v1039_v20 = vunpack.c.l.b16 %v938_v10  ;;  %v1241_v26 = vrot.slane %v1239_v6, 1  ;;  %v2193_v27 = vunpack.c.h.bf16 %v2248_v4  ;;  %v924_v29 = vmax.f32 %v908_v21, 0.0 }
  0x45   : > { %v1317_v24 = vsel %vm1299_vm3, %v1315_v13, %v1316_v5  ;;  %v1236_v25 = vrot.slane %v1234_v15, 1  ;;  %956 = vst.msk [vmem:[%s2526_s18 + $0x2c] sm:$0xf] %vm944_vm0, %v939_v19  ;;  %v1040_v28 = vunpack.c.l.b16 %v939_v19  ;;  %v925_v30 = vmax.f32 %v909_v23, 0.0 }
  0x46   : > { %1334 = vrot.lane.b32.xlu1 %v1317_v24, %s2358_s15  ;;  %v2224_v31 = vunpack.c.l.bf16 %v2255_v18  ;;  %v2225_v33 = vunpack.c.h.bf16 %v2255_v18  ;;  %v859_v34 = vmul.f32 %v2491_v0, %v2192_v16  ;;  %v860_v35 = vmul.f32 %v2491_v0, %v2193_v27 }
  0x47   : > { %v1237_v32 = vor.u32 %v1236_v25, %v1232_v14  ;;  %v1053_v36 = vpack.c.b16 %v1040_v28, %v1039_v20  ;;  %v1230_v37 = vsel %vm1170_vm5, %v1225_v8, %v1229_v57  ;;  %v940_v39 = vpack.c.bf16 %v924_v29, %v924_v29 }
  0x48   : > { %v941_v40 = vpack.c.bf16 %v925_v30, %v925_v30  ;;  %v878_v42 = vadd.f32 %v2496_v1, %v859_v34  ;;  %v879_v44 = vadd.f32 %v2496_v1, %v860_v35  ;;  %v2236_v45 = vunpack.c.l.bf16 %v2235_v41  ;;  %v2227_v34 = vld [vmem:[%s693_s16] sm:$0xff]  }
  0x49   : > { %v1003_v48 = vstv %s2681_s19  ;;  %v1100_v49 = vshrl.u32 %v1053_v36, 16  ;;  %v1103_v50 = vshll.u32 %v1053_v36, 16  ;;  %957 = vst.msk [vmem:[%s2526_s18 + $0x30] sm:$0xf] %vm944_vm0, %v940_v39  ;;  %v1041_v51 = vunpack.c.l.b16 %v940_v39  ;;  %s2126_s19 = sshll.u32 %s2467_s29, 1 }
  0x4a   : > { %v1042_v52 = vunpack.c.l.b16 %v941_v40  ;;  %v1242_v53 = vsel %vm1170_vm5, %v1237_v32, %v1241_v26  ;;  %958 = vst.msk [vmem:[%s2526_s18 + $0x34] sm:$0xf] %vm944_vm0, %v941_v40  ;;  %v910_v54 = vadd.f32 %v2224_v31, %v878_v42  ;;  %v911_v55 = vadd.f32 %v2225_v33, %v879_v44 }
  0x4b   : > { %1275 = vrot.lane.b32.xlu2 %v1230_v37, %s2359_s28  ;;  %v2237_v56 = vunpack.c.h.bf16 %v2235_v41  ;;  %v1102_v57 = vrot.slane %v1100_v49, 7  ;;  %v2240_v59 = vunpack.c.l.bf16 %v2239_v46  ;;  %v985_v60 = vmul.f32 %v2491_v0, %v2236_v45 }
  0x4c   : > { %v1054_v58 = vpack.c.b16 %v1042_v52, %v1041_v51  ;;  %v926_v61 = vmax.f32 %v910_v54, 0.0  ;;  %v927_v62 = vmax.f32 %v911_v55, 0.0  ;;  %v2241_v63 = vunpack.c.h.bf16 %v2239_v46  ;;  %v2231_v54 = vld [vmem:[%s738_s14] sm:$0xff]  }
  0x4d   : > { %v986_v2 = vmul.f32 %v2491_v0, %v2237_v56  ;;  %v1105_v3 = vor.u32 %v1103_v50, %v1102_v57  ;;  %v1166_v4 = vsel %vm2558_vm4, %v1102_v57, 0  ;;  %v987_v14 = vadd.f32 %v2496_v1, %v985_v60 }
  0x4e   : > { %1277 = vrot.lane.b32.xlu1 %v1242_v53, %s2359_s28  ;;  %v1107_v5 = vshrl.u32 %v1054_v58, 16  ;;  %v1110_v6 = vshll.u32 %v1054_v58, 16  ;;  %v1251_v7 = vshll.u32 %v1166_v4, 16  ;;  %v942_v8 = vpack.c.bf16 %v926_v61, %v926_v61 }
  0x4f   : > { %v943_v10 = vpack.c.bf16 %v927_v62, %v927_v62  ;;  %v1319_v11 = vrot.slane %v1166_v4, 1  ;;  %v2715_v12 = vsel %vm2558_vm4, 0, %v1105_v3  ;;  %v988_v15 = vadd.f32 %v2496_v1, %v986_v2 }
  0x50   : > { %v1109_v13 = vrot.slane %v1107_v5, 7  ;;  %v1244_v16 = vshrl.u32 %v2715_v12, 16  ;;  %v1246_v18 = vshll.u32 %v2715_v12, 16  ;;  %959 = vst.msk [vmem:[%s2526_s18 + $0x38] sm:$0xf] %vm944_vm0, %v942_v8  ;;  %v1043_v19 = vunpack.c.l.b16 %v942_v8 }
  0x51   : > { %vm2723_vm6 = vcmp.eq.s32.totalorder %v1003_v48, 1  ;;  %960 = vst.msk [vmem:[%s2526_s18 + $0x3c] sm:$0xf] %vm944_vm0, %v943_v10  ;;  %v1044_v24 = vunpack.c.l.b16 %v943_v10  ;;  %v1318_v25 = vrot.slane %v2715_v12, 1  ;;  %v1253_v27 = vrot.slane %v1251_v7, 1 }
  0x52   : > { %v1112_v21 = vor.u32 %v1110_v6, %v1109_v13  ;;  %v1167_v23 = vsel %vm2558_vm4, %v1109_v13, 0  ;;  %v1248_v26 = vrot.slane %v1246_v18, 1  ;;  %v991_v29 = vadd.f32 %v2240_v59, %v987_v14 }
  0x53   : > { %v1322_v28 = vrot.slane %v1167_v23, 1  ;;  %v1055_v31 = vpack.c.b16 %v1044_v24, %v1043_v19  ;;  %v1320_v32 = vsel %vm1299_vm3, %v1318_v25, %v1319_v11  ;;  %v992_v33 = vadd.f32 %v2241_v63, %v988_v15 }
  0x54   : > { %v2739_v30 = vsel %vm2558_vm4, 0, %v1112_v21  ;;  %v1249_v35 = vor.u32 %v1248_v26, %v1244_v16  ;;  %v1263_v39 = vshll.u32 %v1167_v23, 16  ;;  %1336 = vrot.lane.b32.xlu2 %v1320_v32, %s2358_s15  ;;  %v993_v44 = vmax.f32 %v991_v29, 0.0 }
  0x55   : > { %v1256_v36 = vshrl.u32 %v2739_v30, 16  ;;  %v1258_v37 = vshll.u32 %v2739_v30, 16  ;;  %v1321_v40 = vrot.slane %v2739_v30, 1  ;;  %v1114_v41 = vshrl.u32 %v1055_v31, 16 }
  0x56   : > { %v1117_v42 = vshll.u32 %v1055_v31, 16  ;;  %v1254_v45 = vsel %vm1170_vm5, %v1249_v35, %v1253_v27  ;;  %v994_v48 = vmax.f32 %v992_v33, 0.0  ;;  %v2228_v49 = vunpack.c.l.bf16 %v2227_v34 }
  0x57   : > { %v1260_v46 = vrot.slane %v1258_v37, 1  ;;  %1279 = vrot.lane.b32.xlu0 %v1254_v45, %s2359_s28  ;;  %v1323_v50 = vsel %vm1299_vm3, %v1321_v40, %v1322_v28  ;;  %v1116_v51 = vrot.slane %v1114_v41, 7  ;;  %v995_v52 = vpack.c.bf16 %v993_v44, %v993_v44 }
  0x58   : > { %v2229_v53 = vunpack.c.h.bf16 %v2227_v34  ;;  %v1265_v56 = vrot.slane %v1263_v39, 1  ;;  %1338 = vrot.lane.b32.xlu1 %v1323_v50, %s2358_s15  ;;  %v996_v57 = vpack.c.bf16 %v994_v48, %v994_v48  ;;  %v967_v61 = vmul.f32 %v2491_v0, %v2228_v49 }
  0x59   : > { %v1261_v55 = vor.u32 %v1260_v46, %v1256_v36  ;;  %v1119_v58 = vor.u32 %v1117_v42, %v1116_v51  ;;  %v1168_v59 = vsel %vm2558_vm4, %v1116_v51, 0  ;;  %v1005_v60 = vsel %vm2723_vm6, 0, %v995_v52 }
  0x5a   : > { %v1382_v62 = vshll.u32 %v1168_v59, 16  ;;  %v1006_v63 = vsel %vm2723_vm6, 0, %v996_v57  ;;  %v2232_v2 = vunpack.c.l.bf16 %v2231_v54  ;;  %v2233_v3 = vunpack.c.h.bf16 %v2231_v54 }
  0x5b   : > { %v2767_v4 = vsel %vm2558_vm4, 0, %v1119_v58  ;;  %v1045_v5 = vunpack.c.l.b16 %v1005_v60  ;;  %v1046_v6 = vunpack.c.l.b16 %v1006_v63  ;;  %v968_v7 = vmul.f32 %v2491_v0, %v2229_v53 }
  0x5c   : > { %v1266_v8 = vsel %vm1170_vm5, %v1261_v55, %v1265_v56  ;;  %v1375_v10 = vshrl.u32 %v2767_v4, 16  ;;  %v1377_v11 = vshll.u32 %v2767_v4, 16  ;;  %v969_v14 = vadd.f32 %v2496_v1, %v967_v61 }
  0x5d   : > { %v1056_v13 = vpack.c.b16 %v1046_v6, %v1045_v5  ;;  %v970_v15 = vadd.f32 %v2496_v1, %v968_v7  ;;  %v1384_v18 = vrot.slane %v1382_v62, 1  ;;  %v998_v19 = vstv %s997_s30  ;;  %s2119_s30 = sshll.u32 %s2344_s22, 1 }
  0x5e   : > { %v1379_v16 = vrot.slane %v1377_v11, 1  ;;  %v973_v23 = vadd.f32 %v2232_v2, %v969_v14  ;;  %v1390_v24 = vrot.slane %v2767_v4, 1  ;;  %v1391_v25 = vrot.slane %v1168_v59, 1 }
  0x5f   : > { %1281 = vrot.lane.b32.xlu0 %v1266_v8, %s2359_s28  ;;  %v1121_v20 = vshrl.u32 %v1056_v13, 16  ;;  %v1124_v21 = vshll.u32 %v1056_v13, 16  ;;  %v974_v0 = vadd.f32 %v2233_v3, %v970_v15  ;;  %vm2778_vm7 = vcmp.eq.s32.totalorder %v998_v19, 1 }
  0x60   : > { %v1380_v26 = vor.u32 %v1379_v16, %v1375_v10  ;;  %v975_v28 = vmax.f32 %v973_v23, 0.0  ;;  %v1392_v36 = vsel %vm1299_vm3, %v1390_v24, %v1391_v25 }
  0x61   : > { %v1123_v27 = vrot.slane %v1121_v20, 7  ;;  %v976_v29 = vmax.f32 %v974_v0, 0.0 }
  0x62   : > { %v1385_v31 = vsel %vm1170_vm5, %v1380_v26, %v1384_v18  ;;  %v977_v34 = vpack.c.bf16 %v975_v28, %v975_v28 }
  0x63   : > { %1386 = vrot.lane.b32.xlu2 %v1385_v31, %s2359_s28  ;;  %v1126_v32 = vor.u32 %v1124_v21, %v1123_v27  ;;  %v1169_v33 = vsel %vm2558_vm4, %v1123_v27, 0  ;;  %v978_v35 = vpack.c.bf16 %v976_v29, %v976_v29 }
  0x64   : > { %v1407_v37 = vshll.u32 %v1169_v33, 16  ;;  %v1416_v39 = vrot.slane %v1169_v33, 1  ;;  %v1000_v41 = vsel %vm2778_vm7, 0, %v977_v34 }
  0x65   : > { %v2788_v40 = vsel %vm2558_vm4, 0, %v1126_v32  ;;  %v1001_v42 = vsel %vm2778_vm7, 0, %v978_v35  ;;  %v1027_v48 = vunpack.c.l.b16 %v1000_v41 }
  0x66   : > { %v1400_v44 = vshrl.u32 %v2788_v40, 16  ;;  %v1402_v45 = vshll.u32 %v2788_v40, 16  ;;  %v1415_v46 = vrot.slane %v2788_v40, 1  ;;  %v1028_v49 = vunpack.c.l.b16 %v1001_v42 }
  0x67   : > { %1393 = vrot.lane.b32.xlu0 %v1392_v36, %s2358_s15  ;;  %v1409_v51 = vrot.slane %v1407_v37, 1 }
  0x68   : > { %v1404_v50 = vrot.slane %v1402_v45, 1  ;;  %v1417_v52 = vsel %vm1299_vm3, %v1415_v46, %v1416_v39  ;;  %v1047_v53 = vpack.c.b16 %v1028_v49, %v1027_v48  ;;  %v2161_v48 = vld [vmem:[%s3100_s8 + $0x18] sm:$0xff] }
  0x6a   : > { %v1405_v54 = vor.u32 %v1404_v50, %v1400_v44  ;;  %v1058_v55 = vshrl.u32 %v1047_v53, 16  ;;  %v1061_v56 = vshll.u32 %v1047_v53, 16  ;;  %v2160_v50 = vld [vmem:[%s3100_s8 + $0x10] sm:$0xff] }
  0x6b   : > { %1418 = vrot.lane.b32.xlu2 %v1417_v52, %s2358_s15 }
  0x6c   : > { %v1410_v57 = vsel %vm1170_vm5, %v1405_v54, %v1409_v51  ;;  %v1060_v58 = vrot.slane %v1058_v55, 7  ;;  %v2158_v51 = vld [vmem:[%s3100_s8] sm:$0xff] }
  0x6d   : > { %1411 = vrot.lane.b32.xlu1 %v1410_v57, %s2359_s28 }
  0x6e   : > { %v1063_v59 = vor.u32 %v1061_v56, %v1060_v58  ;;  %v1160_v60 = vsel %vm2558_vm4, %v1060_v58, 0 }
  0x6f   : > { %v1179_v61 = vshll.u32 %v1160_v60, 16  ;;  %v1301_v62 = vrot.slane %v1160_v60, 1 }
  0x70   : > { %v2806_v63 = vsel %vm2558_vm4, 0, %v1063_v59 }
  0x71   : > { %v1172_v2 = vshrl.u32 %v2806_v63, 16  ;;  %v1174_v3 = vshll.u32 %v2806_v63, 16  ;;  %v1300_v5 = vrot.slane %v2806_v63, 1  ;;  %v1181_v7 = vrot.slane %v1179_v61, 1 }
  0x73   : > { %v1176_v6 = vrot.slane %v1174_v3, 1  ;;  %v1302_v8 = vsel %vm1299_vm3, %v1300_v5, %v1301_v62 }
  0x75   : > { %1324 = vrot.lane.b32.xlu1 %v1302_v8, %s2358_s15  ;;  %v1177_v10 = vor.u32 %v1176_v6, %v1172_v2  ;;  %s2361_s15 = smov 48  }
  0x77   : > { %v1182_v11 = vsel %vm1170_vm5, %v1177_v10, %v1181_v7 }
  0x78   : > { %1267 = vrot.lane.b32.xlu0 %v1182_v11, %s2359_s28 }
  0x95   : > { %v1333_v17 = vpop.permute.xlu2 %1332 }
  0x9d   : > { %v1274_v13 = vpop.permute.xlu2 %1273 }
  0x9e   : > { %v1348_v14 = vsel %vm1340_vm8, %v2580_v38, %v1274_v13 }
  0xa2   : > { %v1331_v15 = vpop.permute.xlu0 %1330 }
  0xa3   : > { %v2818_v16 = vsel %vm1357_vm9, %v1348_v14, %v1331_v15  ;;  %v1327_v18 = vpop.permute.xlu1 %1326 }
  0xa4   : > { %1436 = vrot.lane.b32.xlu1 %v2818_v16, %s2360_s26 }
  0xa5   : > { %v1276_v38 = vpop.permute.xlu2 %1275 }
  0xa6   : > { %v1350_v0 = vsel %vm1340_vm8, %v2627_v22, %v1276_v38 }
  0xa7   : > { %v2834_v26 = vsel %vm1357_vm9, %v1350_v0, %v1333_v17 }
  0xaa   : > { %v1270_v19 = vpop.permute.xlu0 %1269 }
  0xab   : > { %v1344_v20 = vsel %vm1340_vm8, %v2587_v43, %v1270_v19  ;;  %v1329_v23 = vpop.permute.xlu1 %1328 }
  0xac   : > { %v2825_v21 = vsel %vm1357_vm9, %v1344_v20, %v1327_v18 }
  0xad   : > { %1432 = vrot.lane.b32.xlu2 %v2825_v21, %s2360_s26 }
  0xae   : > { %v1337_v29 = vpop.permute.xlu2 %1336 }
  0xb2   : > { %v1272_v24 = vpop.permute.xlu0 %1271 }
  0xb3   : > { %v1346_v25 = vsel %vm1340_vm8, %v2593_v47, %v1272_v24 }
  0xb4   : > { %v2837_v43 = vsel %vm1357_vm9, %v1346_v25, %v1329_v23 }
  0xb5   : > { %1453 = vrot.lane.b32.xlu2 %v2834_v26, %s2361_s15  ;;  %1449 = vrot.lane.b32.xlu0 %v2837_v43, %s2361_s15 }
  0xb8   : > { %v1335_v27 = vpop.permute.xlu1 %1334 }
  0xbd   : > { %1434 = vrot.lane.b32.xlu2 %v2837_v43, %s2360_s26  ;;  %v1387_v41 = vpop.permute.xlu2 %1386 }
  0xbe   : > { %v1396_v42 = vsel %vm1340_vm8, %v2767_v4, %v1387_v41 }
  0xc0   : > { %v1278_v22 = vpop.permute.xlu1 %1277 }
  0xc1   : > { %v1352_v47 = vsel %vm1340_vm8, %v2666_v9, %v1278_v22  ;;  %v1507_v9 = vld [vmem:[%s3100_s8 + $0x20] sm:$0xf] }
  0xc2   : > { %v2848_v28 = vsel %vm1357_vm9, %v1352_v47, %v1335_v27  ;;  %v1529_v33 = vunpack.c.l.b16 %v1507_v9 }
  0xc3   : > { %1440 = vrot.lane.b32.xlu0 %v2848_v28, %s2360_s26 }
  0xc4   : > { %v1534_v34 = vpack.c.b16 %v1529_v33, %v1529_v33 }
  0xc5   : > { %v1419_v46 = vpop.permute.xlu2 %1418 }
  0xc6   : > { %v1558_v37 = vsel %vm1556_vm10, %v1534_v34, 0 }
  0xc7   : > { %2256 = vmatpush.bf16.msra.mxu1 %v1558_v37  ;;  %1563 = vmatpush.bf16.msra.mxu0 %v1558_v37 }
  0xc8   : > { %2257 = vmatpush.bf16.msra.mxu2 %v1558_v37  ;;  %2258 = vmatpush.bf16.msra.mxu3 %v1558_v37 }
  0xc9   : > { %v1280_v31 = vpop.permute.xlu0 %1279 }
  0xca   : > { %v1354_v1 = vsel %vm1340_vm8, %v2715_v12, %v1280_v31  ;;  %v1339_v35 = vpop.permute.xlu1 %1338 }
  0xcb   : > { %1451 = vrot.lane.b32.xlu0 %v2818_v16, %s2361_s15  ;;  %v2857_v32 = vsel %vm1357_vm9, %v1354_v1, %v1337_v29  ;;  %2259 = vmatpush.bf16.msra.mxu1 %v2161_v48 }
  0xcc   : > { %1457 = vrot.lane.b32.xlu1 %v2857_v32, %s2361_s15  ;;  %1564 = vmatpush.bf16.msra.mxu0 %v2161_v48 }
  0xcd   : > { %2260 = vmatpush.bf16.msra.mxu2 %v2161_v48  ;;  %2261 = vmatpush.bf16.msra.mxu3 %v2161_v48 }
  0xcf   : > { %2262 = vmatpush.bf16.msra.mxu1 %v2160_v50 }
  0xd0   : > { %1565 = vmatpush.bf16.msra.mxu0 %v2160_v50 }
  0xd1   : > { %v1282_v36 = vpop.permute.xlu0 %1281  ;;  %2263 = vmatpush.bf16.msra.mxu2 %v2160_v50  ;;  %2264 = vmatpush.bf16.msra.mxu3 %v2160_v50 }
  0xd2   : > { %v1356_v12 = vsel %vm1340_vm8, %v2739_v30, %v1282_v36 }
  0xd3   : > { %1438 = vrot.lane.b32.xlu0 %v2834_v26, %s2360_s26  ;;  %v2869_v39 = vsel %vm1357_vm9, %v1356_v12, %v1339_v35 }
  0xd4   : > { %1444 = vrot.lane.b32.xlu1 %v2869_v39, %s2360_s26 }
  0xd9   : > { %v1394_v44 = vpop.permute.xlu0 %1393 }
  0xda   : > { %v1398_v30 = vsel %vm1357_vm9, %v1396_v42, %v1394_v44 }
  0xdb   : > { %1459 = vrot.lane.b32.xlu0 %v2869_v39, %s2361_s15  ;;  %1461 = vrot.lane.b32.xlu2 %v1398_v30, %s2361_s15 }
  0xdc   : > { %1455 = vrot.lane.b32.xlu1 %v2848_v28, %s2361_s15 }
  0xdf   : > { %v1412_v45 = vpop.permute.xlu1 %1411 }
  0xe0   : > { %v1421_v4 = vsel %vm1340_vm8, %v2788_v40, %v1412_v45  ;;  %v2159_v40 = vld [vmem:[%s3100_s8 + $0x8] sm:$0xff] }
  0xe1   : > { %v1423_v49 = vsel %vm1357_vm9, %v1421_v4, %v1419_v46  ;;  %2265 = vmatpush.bf16.msra.mxu1 %v2159_v40  ;;  %1566 = vmatpush.bf16.msra.mxu0 %v2159_v40 }
  0xe2   : > { %2266 = vmatpush.bf16.msra.mxu2 %v2159_v40  ;;  %2267 = vmatpush.bf16.msra.mxu3 %v2159_v40 }
  0xe3   : > { %1442 = vrot.lane.b32.xlu2 %v2857_v32, %s2360_s26 }
  0xe4   : > { %1446 = vrot.lane.b32.xlu1 %v1398_v30, %s2360_s26  ;;  %s761_s26 = sadd.s32 %s2340_s21, %s2119_s30  ;;  %s3136_s21 = smov (!%p783_p13, %s2340_s21), 1 }
  0xe5   : > { %2268 = vmatpush.bf16.msra.mxu1 %v2158_v51  ;;  %1567 = vmatpush.bf16.msra.mxu0 %v2158_v51  ;;  %s786_s16 = sadd.s32 %s2126_s19, %s3136_s21 }
  0xe6   : > { %2269 = vmatpush.bf16.msra.mxu2 %v2158_v51  ;;  %2270 = vmatpush.bf16.msra.mxu3 %v2158_v51  ;;  %s2127_s18 = sshll.u32 %s786_s16, 1 }
  0xe7   : > { %v1325_v53 = vpop.permute.xlu1 %1324  ;;  %s788_s30 = scalar_lea.vmem %s3104_s12, %s2127_s18 }
  0xea   : > { %v1268_v58 = vpop.permute.xlu0 %1267 }
  0xeb   : > { %1463 = vrot.lane.b32.xlu2 %v1423_v49, %s2361_s15  ;;  %v1342_v59 = vsel %vm1340_vm8, %v2806_v63, %v1268_v58  ;;  %s2120_s15 = sshll.u32 %s761_s26, 4 }
  0xec   : > { %v1359_v60 = vsel %vm1357_vm9, %v1342_v59, %v1325_v53  ;;  %p763_p12 = scmp.lt.s32.totalorder %s2120_s15, 63 }
  0xee   : > { %s3134_s15 = smov (!%p763_p12, %s2120_s15), 63 }
  0xef   : > { %s2121_s27 = sshll.u32 %s3134_s15, 2 }
  0xf0   : > { %s2947_s13 = scalar_lea.vmem %s3102_s10, %s2121_s27 }
 0x107   : > { %v1433_v52 = vpop.permute.xlu2 %1432 }
 0x108   : > { %v1467_v61 = vsel %vm1465_vm12, %v1359_v60, %v1433_v52 }
 0x10f   : > { %v1454_v55 = vpop.permute.xlu2 %1453 }
 0x116   : > { %v1437_v54 = vpop.permute.xlu1 %1436 }
 0x117   : > { %v1471_v56 = vsel %vm1465_vm12, %v2837_v43, %v1437_v54  ;;  %v1435_v5 = vpop.permute.xlu2 %1434 }
 0x118   : > { %v1488_v57 = vsel %vm1482_vm11, %v1471_v56, %v1454_v55  ;;  %v1469_v6 = vsel %vm1465_vm12, %v2825_v21, %v1435_v5 }
 0x119   : > { %2146 = vmatmul.msk.bf16.vlgmr.msra.gmra.mxu1 %vm1539_vm13, %v1488_v57 }
 0x127   : > { %v1450_v62 = vpop.permute.xlu0 %1449 }
 0x128   : > { %v1484_v2 = vsel %vm1482_vm11, %v1467_v61, %v1450_v62 }
 0x129   : > { %2144 = vmatmul.msk.bf16.vlgmr.msra.gmra.mxu0 %vm1539_vm13, %v1484_v2 }
 0x135   : > { %v1441_v3 = vpop.permute.xlu0 %1440  ;;  %v1462_v11 = vpop.permute.xlu2 %1461 }
 0x136   : > { %v1475_v7 = vsel %vm1465_vm12, %v2834_v26, %v1441_v3 }
 0x13d   : > { %v1452_v8 = vpop.permute.xlu0 %1451  ;;  %v1443_v19 = vpop.permute.xlu2 %1442 }
 0x13e   : > { %v1486_v63 = vsel %vm1482_vm11, %v1469_v6, %v1452_v8  ;;  %v1458_v10 = vpop.permute.xlu1 %1457  ;;  %v1477_v20 = vsel %vm1465_vm12, %v2848_v28, %v1443_v19 }
 0x13f   : > { %2145 = vmatmul.msk.bf16.gmra.mxu0 %vm1539_vm13, %v1486_v63  ;;  %v1492_v17 = vsel %vm1482_vm11, %v1475_v7, %v1458_v10 }
 0x140   : > { %2148 = vmatmul.msk.bf16.vlgmr.msra.gmra.mxu2 %vm1539_vm13, %v1492_v17 }
 0x145   : > { %v1439_v13 = vpop.permute.xlu0 %1438  ;;  %v1464_v25 = vpop.permute.xlu2 %1463 }
 0x146   : > { %v1445_v14 = vpop.permute.xlu1 %1444  ;;  %v1473_v21 = vsel %vm1465_vm12, %v2818_v16, %v1439_v13  ;;  %v2939_v16 = vld [vmem:[%s3101_s9] ss:$0 sm:$0xff] }
 0x147   : > { %v1479_v15 = vsel %vm1465_vm12, %v2857_v32, %v1445_v14 }
 0x148   : > { %v1496_v18 = vsel %vm1482_vm11, %v1479_v15, %v1462_v11 }
 0x149   : > { %2150 = vmatmul.msk.bf16.vlgmr.msra.gmra.mxu3 %vm1539_vm13, %v1496_v18 }
 0x14d   : > { %v1460_v38 = vpop.permute.xlu0 %1459 }
 0x14e   : > { %v1494_v23 = vsel %vm1482_vm11, %v1477_v20, %v1460_v38  ;;  %v1456_v0 = vpop.permute.xlu1 %1455 }
 0x14f   : > { %v1490_v24 = vsel %vm1482_vm11, %v1473_v21, %v1456_v0 }
 0x150   : > { %2147 = vmatmul.msk.bf16.gmra.mxu1 %vm1539_vm13, %v1490_v24  ;;  %2149 = vmatmul.msk.bf16.gmra.mxu2 %vm1539_vm13, %v1494_v23 }
 0x156   : > { %v1447_v26 = vpop.permute.xlu1 %1446 }
 0x157   : > { %v1481_v43 = vsel %vm1465_vm12, %v2869_v39, %v1447_v26 }
 0x158   : > { %v1498_v27 = vsel %vm1482_vm11, %v1481_v43, %v1464_v25 }
 0x159   : > { %2151 = vmatmul.msk.bf16.gmra.mxu3 %vm1539_vm13, %v1498_v27 }
 0x196   : > { %v1579_v22 = vpop.f32.mrf.mxu1 }
 0x197   : > { %v1580_v47 = vadd.f32 %v2939_v16, %v1579_v22 }
 0x199   : > { %1613 = vst.msk [vmem:[#allocation2 + $0x20] sm:$0xff] %vm1340_vm8, %v1580_v47 }
 0x19e   : > { %v1581_v28 = vpop.f32.mrf.mxu1 }
 0x19f   : > { %v1582_v29 = vadd.f32 %v2939_v16, %v1581_v28 }
 0x1a0   : > { %v2949_v31 = vld [vmem:[#allocation2 + $0x20] sm:$0xff] }
 0x1a1   : > { %v1739_v1 = vpack.c.bf16 %v2949_v31, %v2949_v31  ;;  %1614 = vst.msk [vmem:[#allocation2 + $0x28] sm:$0xff] %vm1340_vm8, %v1582_v29  ;;  %v1682_v19 = vmul.f32 %v2949_v31, %v2949_v31  ;;  %v1648_v25 = vsel %vm1340_vm8, %v2949_v31, 0.0 }
 0x1a3   : > { %1755 = vst.msk [vmem:[%s2947_s13 + $0x10] sm:$0xf] %vm944_vm0, %v1739_v1  ;;  %v1701_v28 = vsel %vm1340_vm8, %v1682_v19, 0.0 }
 0x1a6   : > { %v1569_v32 = vpop.f32.mrf.mxu0 }
 0x1a7   : > { %v1570_v9 = vadd.f32 %v2939_v16, %v1569_v32 }
 0x1a8   : > { %v2957_v33 = vld [vmem:[#allocation2 + $0x28] sm:$0xff] }
 0x1a9   : > { %v1740_v34 = vpack.c.bf16 %v2957_v33, %v2957_v33  ;;  %1609 = vst.msk [vmem:[#allocation2] sm:$0xff] %vm1340_vm8, %v1570_v9  ;;  %v1683_v29 = vmul.f32 %v2957_v33, %v2957_v33  ;;  %v1650_v32 = vsel %vm1340_vm8, %v2957_v33, 0.0 }
 0x1ab   : > { %1756 = vst.msk [vmem:[%s2947_s13 + $0x14] sm:$0xf] %vm944_vm0, %v1740_v34 }
 0x1ae   : > { %v1571_v35 = vpop.f32.mrf.mxu0 }
 0x1af   : > { %v1572_v36 = vadd.f32 %v2939_v16, %v1571_v35 }
 0x1b0   : > { %v1625_v37 = vld [vmem:[#allocation2] sm:$0xff] }
 0x1b1   : > { %v1735_v12 = vpack.c.bf16 %v1625_v37, %v1625_v37  ;;  %1610 = vst.msk [vmem:[#allocation2 + $0x8] sm:$0xff] %vm1340_vm8, %v1572_v36  ;;  %v1678_v51 = vmul.f32 %v1625_v37, %v1625_v37  ;;  %v1641_v56 = vsel %vm1340_vm8, %v1625_v37, 0.0  ;;  %v1703_v36 = vsel %vm1340_vm8, %v1683_v29, 0.0 }
 0x1b3   : > { %1751 = vst.msk [vmem:[%s2947_s13] sm:$0xf] %vm944_vm0, %v1735_v12  ;;  %v1694_v8 = vsel %vm1340_vm8, %v1678_v51, 0.0 }
 0x1b8   : > { %v1626_v39 = vld [vmem:[#allocation2 + $0x8] sm:$0xff] }
 0x1b9   : > { %v1736_v41 = vpack.c.bf16 %v1626_v39, %v1626_v39  ;;  %v1679_v50 = vmul.f32 %v1626_v39, %v1626_v39  ;;  %v1642_v52 = vsel %vm1340_vm8, %v1626_v39, 0.0 }
 0x1ba   : > { %v1643_v5 = vadd.f32 %v1642_v52, %v1641_v56 }
 0x1bb   : > { %1752 = vst.msk [vmem:[%s2947_s13 + $0x4] sm:$0xf] %vm944_vm0, %v1736_v41  ;;  %v1695_v60 = vsel %vm1340_vm8, %v1679_v50, 0.0 }
 0x1bc   : > { %v1574_v42 = vpop.f32.mrf.mxu0  ;;  %v1696_v11 = vadd.f32 %v1695_v60, %v1694_v8 }
 0x1bd   : > { %v1575_v44 = vadd.f32 %v2939_v16, %v1574_v42 }
 0x1bf   : > { %1611 = vst.msk [vmem:[#allocation2 + $0x10] sm:$0xff] %vm1340_vm8, %v1575_v44 }
 0x1c3   : > { %v1589_v30 = vpop.f32.mrf.mxu2 }
 0x1c4   : > { %v1576_v45 = vpop.f32.mrf.mxu0  ;;  %v1590_v4 = vadd.f32 %v2939_v16, %v1589_v30 }
 0x1c5   : > { %v1577_v46 = vadd.f32 %v2939_v16, %v1576_v45 }
 0x1c6   : > { %v1627_v48 = vld [vmem:[#allocation2 + $0x10] sm:$0xff]  ;;  %1617 = vst.msk [vmem:[#allocation2 + $0x40] sm:$0xff] %vm1340_vm8, %v1590_v4 }
 0x1c7   : > { %v1737_v49 = vpack.c.bf16 %v1627_v48, %v1627_v48  ;;  %1612 = vst.msk [vmem:[#allocation2 + $0x18] sm:$0xff] %vm1340_vm8, %v1577_v46  ;;  %v1680_v53 = vmul.f32 %v1627_v48, %v1627_v48  ;;  %v1644_v62 = vsel %vm1340_vm8, %v1627_v48, 0.0 }
 0x1c8   : > { %v1645_v17 = vadd.f32 %v1644_v62, %v1643_v5 }
 0x1c9   : > { %1753 = vst.msk [vmem:[%s2947_s13 + $0x8] sm:$0xf] %vm944_vm0, %v1737_v49  ;;  %v1697_v63 = vsel %vm1340_vm8, %v1680_v53, 0.0 }
 0x1ca   : > { %v1698_v14 = vadd.f32 %v1697_v63, %v1696_v11 }
 0x1cb   : > { %v1591_v40 = vpop.f32.mrf.mxu2 }
 0x1cc   : > { %v1592_v54 = vadd.f32 %v2939_v16, %v1591_v40  ;;  %v1599_v55 = vpop.f32.mrf.mxu3 }
 0x1cd   : > { %v2981_v57 = vld [vmem:[#allocation2 + $0x40] sm:$0xff]  ;;  %v1600_v58 = vadd.f32 %v2939_v16, %v1599_v55  ;;  %v1584_v59 = vpop.f32.mrf.mxu1 }
 0x1ce   : > { %v1743_v61 = vpack.c.bf16 %v2981_v57, %v2981_v57  ;;  %1618 = vst.msk [vmem:[#allocation2 + $0x48] sm:$0xff] %vm1340_vm8, %v1592_v54  ;;  %v1628_v2 = vld [vmem:[#allocation2 + $0x18] sm:$0xff]  ;;  %v1585_v3 = vadd.f32 %v2939_v16, %v1584_v59  ;;  %v1686_v49 = vmul.f32 %v2981_v57, %v2981_v57  ;;  %v1656_v55 = vsel %vm1340_vm8, %v2981_v57, 0.0 }
 0x1cf   : > { %1621 = vst.msk [vmem:[#allocation2 + $0x60] sm:$0xff] %vm1340_vm8, %v1600_v58  ;;  %v1681_v6 = vmul.f32 %v1628_v2, %v1628_v2  ;;  %v1738_v7 = vpack.c.bf16 %v1628_v2, %v1628_v2  ;;  %v1646_v10 = vsel %vm1340_vm8, %v1628_v2, 0.0 }
 0x1d0   : > { %1759 = vst.msk [vmem:[%s2947_s13 + $0x20] sm:$0xf] %vm944_vm0, %v1743_v61  ;;  %v1647_v15 = vadd.f32 %v1646_v10, %v1645_v17  ;;  %v1709_v61 = vsel %vm1340_vm8, %v1686_v49, 0.0 }
 0x1d1   : > { %1754 = vst.msk [vmem:[%s2947_s13 + $0xc] sm:$0xf] %vm944_vm0, %v1738_v7  ;;  %v1699_v13 = vsel %vm1340_vm8, %v1681_v6, 0.0 }
 0x1d2   : > { %1615 = vst.msk [vmem:[#allocation2 + $0x30] sm:$0xff] %vm1340_vm8, %v1585_v3  ;;  %v1700_v23 = vadd.f32 %v1699_v13, %v1698_v14  ;;  %v1649_v22 = vadd.f32 %v1648_v25, %v1647_v15 }
 0x1d3   : > { %v1594_v18 = vpop.f32.mrf.mxu2 }
 0x1d4   : > { %v1601_v20 = vpop.f32.mrf.mxu3  ;;  %v1595_v21 = vadd.f32 %v2939_v16, %v1594_v18  ;;  %v1702_v31 = vadd.f32 %v1701_v28, %v1700_v23  ;;  %v1651_v34 = vadd.f32 %v1650_v32, %v1649_v22 }
 0x1d5   : > { %v1634_v38 = vld [vmem:[#allocation2 + $0x48] sm:$0xff]  ;;  %v1602_v0 = vadd.f32 %v2939_v16, %v1601_v20  ;;  %v1586_v24 = vpop.f32.mrf.mxu1 }
 0x1d6   : > { %v1744_v26 = vpack.c.bf16 %v1634_v38, %v1634_v38  ;;  %v3006_v43 = vld [vmem:[#allocation2 + $0x60] sm:$0xff]  ;;  %1619 = vst.msk [vmem:[#allocation2 + $0x50] sm:$0xff] %vm1340_vm8, %v1595_v21  ;;  %v1587_v47 = vadd.f32 %v2939_v16, %v1586_v24  ;;  %v1704_v41 = vadd.f32 %v1703_v36, %v1702_v31  ;;  %v1687_v56 = vmul.f32 %v1634_v38, %v1634_v38 }
 0x1d7   : > { %v1747_v27 = vpack.c.bf16 %v3006_v43, %v3006_v43  ;;  %1622 = vst.msk [vmem:[#allocation2 + $0x68] sm:$0xff] %vm1340_vm8, %v1602_v0  ;;  %v1658_v6 = vsel %vm1340_vm8, %v1634_v38, 0.0  ;;  %v1690_v19 = vmul.f32 %v3006_v43, %v3006_v43  ;;  %v1664_v23 = vsel %vm1340_vm8, %v3006_v43, 0.0 }
 0x1d8   : > { %1760 = vst.msk [vmem:[%s2947_s13 + $0x24] sm:$0xf] %vm944_vm0, %v1744_v26  ;;  %v1711_v17 = vsel %vm1340_vm8, %v1687_v56, 0.0 }
 0x1d9   : > { %1763 = vst.msk [vmem:[%s2947_s13 + $0x30] sm:$0xf] %vm944_vm0, %v1747_v27  ;;  %v1631_v1 = vld [vmem:[#allocation2 + $0x30] sm:$0xff]  ;;  %v1717_v26 = vsel %vm1340_vm8, %v1690_v19, 0.0 }
 0x1da   : > { %v1741_v9 = vpack.c.bf16 %v1631_v1, %v1631_v1  ;;  %1616 = vst.msk [vmem:[#allocation2 + $0x38] sm:$0xff] %vm1340_vm8, %v1587_v47  ;;  %v1684_v37 = vmul.f32 %v1631_v1, %v1631_v1  ;;  %v1652_v33 = vsel %vm1340_vm8, %v1631_v1, 0.0 }
 0x1db   : > { %v1596_v35 = vpop.f32.mrf.mxu2  ;;  %v1653_v4 = vadd.f32 %v1652_v33, %v1651_v34 }
 0x1dc   : > { %1757 = vst.msk [vmem:[%s2947_s13 + $0x18] sm:$0xf] %vm944_vm0, %v1741_v9  ;;  %v1604_v12 = vpop.f32.mrf.mxu3  ;;  %v1597_v39 = vadd.f32 %v2939_v16, %v1596_v35  ;;  %v1705_v48 = vsel %vm1340_vm8, %v1684_v37, 0.0 }
 0x1dd   : > { %v1635_v42 = vld [vmem:[#allocation2 + $0x50] sm:$0xff]  ;;  %v1605_v44 = vadd.f32 %v2939_v16, %v1604_v12  ;;  %v1706_v50 = vadd.f32 %v1705_v48, %v1704_v41 }
 0x1de   : > { %v1638_v30 = vld [vmem:[#allocation2 + $0x68] sm:$0xff]  ;;  %v1745_v45 = vpack.c.bf16 %v1635_v42, %v1635_v42  ;;  %1620 = vst.msk [vmem:[#allocation2 + $0x58] sm:$0xff] %vm1340_vm8, %v1597_v39  ;;  %v1688_v59 = vmul.f32 %v1635_v42, %v1635_v42  ;;  %v1660_v57 = vsel %vm1340_vm8, %v1635_v42, 0.0 }
 0x1df   : > { %v1748_v46 = vpack.c.bf16 %v1638_v30, %v1638_v30  ;;  %1623 = vst.msk [vmem:[#allocation2 + $0x70] sm:$0xff] %vm1340_vm8, %v1605_v44  ;;  %v1691_v0 = vmul.f32 %v1638_v30, %v1638_v30  ;;  %v1666_v27 = vsel %vm1340_vm8, %v1638_v30, 0.0 }
 0x1e0   : > { %1761 = vst.msk [vmem:[%s2947_s13 + $0x28] sm:$0xf] %vm944_vm0, %v1745_v45  ;;  %v1713_v13 = vsel %vm1340_vm8, %v1688_v59, 0.0 }
 0x1e1   : > { %1764 = vst.msk [vmem:[%s2947_s13 + $0x34] sm:$0xf] %vm944_vm0, %v1748_v46  ;;  %v1632_v40 = vld [vmem:[#allocation2 + $0x38] sm:$0xff]  ;;  %v1719_v31 = vsel %vm1340_vm8, %v1691_v0, 0.0 }
 0x1e2   : > { %v1654_v51 = vsel %vm1340_vm8, %v1632_v40, 0.0  ;;  %v1685_v52 = vmul.f32 %v1632_v40, %v1632_v40  ;;  %v1742_v53 = vpack.c.bf16 %v1632_v40, %v1632_v40 }
 0x1e3   : > { %v1655_v54 = vadd.f32 %v1654_v51, %v1653_v4 }
 0x1e4   : > { %v1707_v58 = vsel %vm1340_vm8, %v1685_v52, 0.0  ;;  %1758 = vst.msk [vmem:[%s2947_s13 + $0x1c] sm:$0xf] %vm944_vm0, %v1742_v53  ;;  %v1606_v60 = vpop.f32.mrf.mxu3 }
 0x1e5   : > { %v1657_v62 = vadd.f32 %v1656_v55, %v1655_v54  ;;  %v1708_v2 = vadd.f32 %v1707_v58, %v1706_v50  ;;  %v1636_v3 = vld [vmem:[#allocation2 + $0x58] sm:$0xff]  ;;  %v1607_v5 = vadd.f32 %v2939_v16, %v1606_v60 }
 0x1e6   : > { %v1639_v7 = vld [vmem:[#allocation2 + $0x70] sm:$0xff]  ;;  %v1689_v8 = vmul.f32 %v1636_v3, %v1636_v3  ;;  %v1746_v63 = vpack.c.bf16 %v1636_v3, %v1636_v3  ;;  %v1662_v15 = vsel %vm1340_vm8, %v1636_v3, 0.0 }
 0x1e7   : > { %v1710_v10 = vadd.f32 %v1709_v61, %v1708_v2  ;;  %v1659_v11 = vadd.f32 %v1658_v6, %v1657_v62  ;;  %1624 = vst.msk [vmem:[#allocation2 + $0x78] sm:$0xff] %vm1340_vm8, %v1607_v5  ;;  %v1749_v14 = vpack.c.bf16 %v1639_v7, %v1639_v7  ;;  %v1692_v22 = vmul.f32 %v1639_v7, %v1639_v7 }
 0x1e8   : > { %1762 = vst.msk [vmem:[%s2947_s13 + $0x2c] sm:$0xf] %vm944_vm0, %v1746_v63  ;;  %v1715_v20 = vsel %vm1340_vm8, %v1689_v8, 0.0  ;;  %v1668_v1 = vsel %vm1340_vm8, %v1639_v7, 0.0 }
 0x1e9   : > { %v1661_v16 = vadd.f32 %v1660_v57, %v1659_v11  ;;  %v1712_v18 = vadd.f32 %v1711_v17, %v1710_v10  ;;  %1765 = vst.msk [vmem:[%s2947_s13 + $0x38] sm:$0xf] %vm944_vm0, %v1749_v14  ;;  %v1721_v35 = vsel %vm1340_vm8, %v1692_v22, 0.0 }
 0x1eb   : > { %v1714_v21 = vadd.f32 %v1713_v13, %v1712_v18  ;;  %v1663_v38 = vadd.f32 %v1662_v15, %v1661_v16 }
 0x1ed   : > { %v1665_v24 = vadd.f32 %v1664_v23, %v1663_v38  ;;  %v1716_v25 = vadd.f32 %v1715_v20, %v1714_v21 }
 0x1ee   : > { %v1640_v47 = vld [vmem:[#allocation2 + $0x78] sm:$0xff] }
 0x1ef   : > { %v1718_v28 = vadd.f32 %v1717_v26, %v1716_v25  ;;  %v1667_v29 = vadd.f32 %v1666_v27, %v1665_v24  ;;  %v1693_v32 = vmul.f32 %v1640_v47, %v1640_v47  ;;  %v1750_v43 = vpack.c.bf16 %v1640_v47, %v1640_v47 }
 0x1f0   : > { %v1670_v36 = vsel %vm1340_vm8, %v1640_v47, 0.0 }
 0x1f1   : > { %v1669_v9 = vadd.f32 %v1668_v1, %v1667_v29  ;;  %v1720_v34 = vadd.f32 %v1719_v31, %v1718_v28  ;;  %1766 = vst.msk [vmem:[%s2947_s13 + $0x3c] sm:$0xf] %vm944_vm0, %v1750_v43  ;;  %v1723_v39 = vsel %vm1340_vm8, %v1693_v32, 0.0 }
 0x1f3   : > { %v1671_v37 = vadd.f32 %v1670_v36, %v1669_v9  ;;  %v1722_v12 = vadd.f32 %v1721_v35, %v1720_v34 }
 0x1f5   : > { %v1672_v41 = vrot.slane %v1671_v37, 4  ;;  %v1724_v42 = vadd.f32 %v1723_v39, %v1722_v12 }
 0x1f7   : > { %v1673_v44 = vadd.f32 %v1672_v41, %v1671_v37  ;;  %v1725_v33 = vrot.slane %v1724_v42, 4 }
 0x1f9   : > { %v1674_v30 = vrot.slane %v1673_v44, 2  ;;  %v1726_v45 = vadd.f32 %v1725_v33, %v1724_v42 }
 0x1fb   : > { %v1675_v4 = vadd.f32 %v1674_v30, %v1673_v44  ;;  %v1727_v46 = vrot.slane %v1726_v45, 2 }
 0x1fd   : > { %v1676_v48 = vrot.slane %v1675_v4, 1  ;;  %v1728_v49 = vadd.f32 %v1727_v46, %v1726_v45 }
 0x1ff   : > { %v1729_v50 = vrot.slane %v1728_v49, 1  ;;  %v1677_v40 = vadd.f32 %v1676_v48, %v1675_v4 }
 0x201   : > { %v1730_v51 = vadd.f32 %v1729_v50, %v1728_v49 }
 0x203   : > { %v1732_v52 = vsel %vm1147_vm1, %v1677_v40, %v1730_v51 }
 0x204   : > { %1734 = vst.msk [vmem:[%s788_s30] sm:$0x3] %vm1733_vm14, %v1732_v52 }
 0x205 PF: > { %s23_s25 = sadd.s32 1, %s2356_s25   ;;  %s3116_s22 = sld [smem:[#allocation3_spill]] }
 0x206   : > { %p20_p0 = scmp.ge.s32.totalorder %s23_s25, 6   ;;  %s3117_s29 = sld [smem:[#allocation4_spill]] }
 0x207   : > { %s3118_s24 = sld [smem:[#allocation5_spill]]  ;;  %s3119_s21 = smov %s2348_s23 }
 0x208   :  { %22 = sbr.rel (!%p20_p0) target bundleno = 3 (0x3), region = 129 }
 0x20c   : > { %s3120_s23 = smov %s3117_s29 }

</bundles_post_ra>
